<compile_context>
chip_gen: v7x
topology: tpu7x:2x2x1
jax: 0.10.0
libtpu: 0.0.40
codegen_flags: <defaults>
</compile_context>

<pallas_src>
import numpy as np
import jax
import jax.numpy as jnp
from jax import lax
from jax.experimental import pallas as pl
from jax.experimental.pallas import tpu as pltpu

SEQ_LEN = 24
C1, C2, C3 = 32, 64, 128
L1, L2, L3 = 24, 12, 6            # conv input lengths (pre-pool) at each stage
FC1_DIM, FC2_DIM = 256, 128
MATMUL_DTYPE = jnp.bfloat16       # MXU operand dtype; accumulation + epilogue stay f32


def _round_up(n, m):
    return ((n + m - 1) // m) * m


# --------------------------- Pallas kernel --------------------------------- #
def _matmul_bias_relu(x, w_ref, b_ref):
    """x:(M,K) f32 -> relu(x @ W + b):(M,N) f32; bf16 MXU operands, f32 accumulate."""
    y = jnp.dot(x.astype(MATMUL_DTYPE), w_ref[...],
                preferred_element_type=jnp.float32)
    return jnp.maximum(y + b_ref[...], 0.0)


def _pool_halves(h):
    """MaxPool1d(kernel=2, stride=2) in the member-split layout.

    h:(M, 2*half) with even positions in lanes [:half] and odd positions in lanes [half:]
    (half = 384 = 3 vregs, so both slices are vreg-aligned).  Returns the compacted
    (M, half) pooled map, position-major within.
    """
    half = h.shape[1] // 2
    return jnp.maximum(h[:, :half], h[:, half:])


def sales_cnn_kernel(x_ref,
                     w1_ref, b1_ref, w2_ref, b2_ref, w3_ref, b3_ref,
                     f1_ref, fb1_ref, f2_ref, fb2_ref, f3_ref, fb3_ref,
                     o_ref):
    h = _matmul_bias_relu(x_ref[...], w1_ref, b1_ref)      # (TB, 24*32) conv1+relu
    h = _pool_halves(h)                                     # (TB, 12*32) pool1 (compacted)
    h = _matmul_bias_relu(h, w2_ref, b2_ref)                # (TB, 12*64) conv2+relu
    h = _pool_halves(h)                                     # (TB,  6*64) pool2
    h = _matmul_bias_relu(h, w3_ref, b3_ref)                # (TB, 6*128) conv3+relu
    h = _pool_halves(h)                                     # (TB, 3*128) pool3
    z = _matmul_bias_relu(h, f1_ref, fb1_ref)               # (TB, 256)   fc1+relu
    z = _matmul_bias_relu(z, f2_ref, fb2_ref)               # (TB, 128)   fc2+relu
    # fc3: contract the feature dim of both operands -> a lane-dense (1, TB) output row.
    out = lax.dot_general(f3_ref[...], z.astype(MATMUL_DTYPE),
                          dimension_numbers=(((1,), (1,)), ((), ())),
                          preferred_element_type=jnp.float32)
    o_ref[0] = out + fb3_ref[...]


# ----------------------------- wrapper ------------------------------------- #
def sales_cnn_forward(x, kernel_params, tile_b=None):
    """x: (B, SEQ_LEN) float32 -> (B, 1) float32."""
    B = x.shape[0]
    if tile_b is None:
        # >=128 for a lane-dense output row / full MXU M; 256 also feeds v6e/v7x's 256-wide MXU.
        tile_b = min(256, _round_up(max(B, 1), 128))
    b_pad = _round_up(B, tile_b)
    num_tiles = b_pad // tile_b
    x_pad = jnp.pad(x.astype(jnp.float32), ((0, b_pad - B), (0, 0)))

    def wspec(a):   # weights/biases: full array, constant index map (fetched once, resident)
        return pl.BlockSpec(a.shape, lambda b: (0, 0))

    # FLOPs per batch row = 2 * sum(K*N) over the six effective matmuls.
    flops_per_row = 2 * (SEQ_LEN * (L1 * C1)
                         + (L2 * C1) * (L2 * C2)
                         + (L3 * C2) * (L3 * C3)
                         + ((L3 // 2) * C3) * FC1_DIM
                         + FC1_DIM * FC2_DIM + FC2_DIM)
    weight_bytes = sum(int(a.size) * a.dtype.itemsize for a in kernel_params)
    cost = pl.CostEstimate(flops=int(b_pad) * flops_per_row, transcendentals=0,
                           bytes_accessed=int(x_pad.size) * 4 + int(b_pad) * 4 + weight_bytes)

    out = pl.pallas_call(
        sales_cnn_kernel,
        out_shape=jax.ShapeDtypeStruct((num_tiles, 1, tile_b), jnp.float32),
        grid=(num_tiles,),
        in_specs=[pl.BlockSpec((tile_b, SEQ_LEN), lambda b: (b, 0))]
                 + [wspec(a) for a in kernel_params],
        out_specs=pl.BlockSpec((1, 1, tile_b), lambda b: (b, 0, 0)),
        compiler_params=pltpu.CompilerParams(
            dimension_semantics=("parallel",),        # v7x: batch tiles across both TCs
            vmem_limit_bytes=32 * 1024 * 1024),
        cost_estimate=cost,
    )(x_pad, *kernel_params)
    return out.reshape(-1)[:B].reshape(B, 1)


# --------------------- deterministic parameter setup ----------------------- #
def _col_base(l, L, C):
    """Member-split column base: even output positions first, odd positions second."""
    return (l % 2) * (L // 2) * C + (l // 2) * C


def build_kernel_params(torch_params):
    """Fold the 3-tap im2col and the channel-major flatten into block-structured 'effective'
    weights for the positions-on-lanes layout, with member-split (even|odd) output ordering
    so that every MaxPool1d(2) is a single vreg-aligned split-max that compacts the map."""
    (c1w, c1b, c2w, c2b, c3w, c3b, f1w, f1b, f2w, f2b, f3w, f3b) = (
        np.asarray(p, np.float32) for p in torch_params)

    # conv1: x (24,) -> (24*C1,) member-split.  W1[l_in, col(l)+co] = c1w[co, 0, t], l_in=l+t-1.
    w1 = np.zeros((L1, L1 * C1), np.float32)
    for l in range(L1):
        base = _col_base(l, L1, C1)
        for t in range(3):
            li = l + t - 1
            if 0 <= li < L1:
                w1[li, base:base + C1] = c1w[:, 0, t]
    b1 = np.tile(c1b, L1)[None, :]          # co == col % C1 in member-split order too

    # conv2 consumes the compacted pool1 output: K = 12*32 = 384 (position-major).
    w2 = np.zeros((L2 * C1, L2 * C2), np.float32)
    for l in range(L2):
        base = _col_base(l, L2, C2)
        for t in range(3):
            j = l + t - 1                    # pooled-input position
            if 0 <= j < L2:
                w2[j * C1:(j + 1) * C1, base:base + C2] = c2w[:, :, t].T
    b2 = np.tile(c2b, L2)[None, :]

    # conv3 consumes the compacted pool2 output: K = 6*64 = 384.
    w3 = np.zeros((L3 * C2, L3 * C3), np.float32)
    for l in range(L3):
        base = _col_base(l, L3, C3)
        for t in range(3):
            j = l + t - 1
            if 0 <= j < L3:
                w3[j * C2:(j + 1) * C2, base:base + C3] = c3w[:, :, t].T
    b3 = np.tile(c3b, L3)[None, :]

    # fc1 consumes the compacted pool3 output (lane l*C3 + c, l in 0..2); PyTorch's
    # channel-major flatten index is c*3 + l.
    f1 = np.zeros(((L3 // 2) * C3, FC1_DIM), np.float32)
    for l in range(L3 // 2):
        f1[l * C3:(l + 1) * C3, :] = f1w[:, l::3].T   # rows indexed by channel c
    fb1 = f1b[None, :]

    f2 = f2w.T                      # (256, 128)
    fb2 = f2b[None, :]
    f3 = f3w                        # (1, 128)
    fb3 = f3b[None, :]              # (1, 1)

    wdt, bdt = MATMUL_DTYPE, jnp.float32
    return (jnp.asarray(w1, wdt), jnp.asarray(b1, bdt),
            jnp.asarray(w2, wdt), jnp.asarray(b2, bdt),
            jnp.asarray(w3, wdt), jnp.asarray(b3, bdt),
            jnp.asarray(f1, wdt), jnp.asarray(fb1, bdt),
            jnp.asarray(f2, wdt), jnp.asarray(fb2, bdt),
            jnp.asarray(f3, wdt), jnp.asarray(fb3, bdt))


def init_params(key):
    ks = jax.random.split(key, 12)

    def u(k, shape, fan_in):
        bound = 1.0 / float(np.sqrt(fan_in))
        return jax.random.uniform(k, shape, jnp.float32, -bound, bound)

    conv1_w = u(ks[0], (C1, 1, 3), 1 * 3);        conv1_b = u(ks[1], (C1,), 1 * 3)
    conv2_w = u(ks[2], (C2, C1, 3), C1 * 3);      conv2_b = u(ks[3], (C2,), C1 * 3)
    conv3_w = u(ks[4], (C3, C2, 3), C2 * 3);      conv3_b = u(ks[5], (C3,), C2 * 3)
    fc1_w = u(ks[6], (FC1_DIM, C3 * 3), C3 * 3);  fc1_b = u(ks[7], (FC1_DIM,), C3 * 3)
    fc2_w = u(ks[8], (FC2_DIM, FC1_DIM), FC1_DIM); fc2_b = u(ks[9], (FC2_DIM,), FC1_DIM)
    fc3_w = u(ks[10], (1, FC2_DIM), FC2_DIM);      fc3_b = u(ks[11], (1,), FC2_DIM)
    torch_params = (conv1_w, conv1_b, conv2_w, conv2_b, conv3_w, conv3_b,
                    fc1_w, fc1_b, fc2_w, fc2_b, fc3_w, fc3_b)
    return torch_params, build_kernel_params(torch_params)


# --------------------------- pure-JAX reference ----------------------------- #
def torch_reference(x, tp):
    (c1w, c1b, c2w, c2b, c3w, c3b, f1w, f1b, f2w, f2b, f3w, f3b) = tp
    h = x[:, None, :]                                       # (B, 1, L)  NCW

    def conv(h, w, b):
        y = lax.conv_general_dilated(h, w, window_strides=(1,), padding=((1, 1),),
                                     dimension_numbers=("NCH", "OIH", "NCH"))
        return jax.nn.relu(y + b[None, :, None])

    def pool(h):
        return lax.reduce_window(h, -jnp.inf, lax.max, (1, 1, 2), (1, 1, 2), "VALID")

    h = pool(conv(h, c1w, c1b))
    h = pool(conv(h, c2w, c2b))
    h = pool(conv(h, c3w, c3b))
    h = h.reshape(h.shape[0], -1)                           # channel-major flatten (torch .view)
    h = jax.nn.relu(h @ f1w.T + f1b)
    h = jax.nn.relu(h @ f2w.T + f2b)
    return h @ f3w.T + f3b


if __name__ == "__main__":
    x = jax.random.normal(jax.random.PRNGKey(0), (2, SEQ_LEN), dtype=jnp.float32)
    torch_params, kernel_params = init_params(jax.random.PRNGKey(1))

    y_kernel = sales_cnn_forward(x, kernel_params)
    jax.block_until_ready(y_kernel)

    y_ref = torch_reference(x, torch_params)
    assert y_kernel.shape == (2, 1), y_kernel.shape
    # bf16 MXU operands (f32 accumulation/epilogue) vs a pure-f32 reference: allow ~1% error.
    assert jnp.allclose(y_kernel, y_ref, rtol=3e-2, atol=3e-2), (y_kernel, y_ref)
    print("KERNEL_OK")
</pallas_src>

<mosaic_0001>
module attributes {stable_mosaic.version = 11 : i64} {
  func.func @sales_cnn_kernel(%arg0: i32, %arg1: memref<128x24xf32, #tpu.memory_space<vmem>>, %arg2: memref<24x768xbf16, #tpu.memory_space<vmem>>, %arg3: memref<1x768xf32, #tpu.memory_space<vmem>>, %arg4: memref<384x768xbf16, #tpu.memory_space<vmem>>, %arg5: memref<1x768xf32, #tpu.memory_space<vmem>>, %arg6: memref<384x768xbf16, #tpu.memory_space<vmem>>, %arg7: memref<1x768xf32, #tpu.memory_space<vmem>>, %arg8: memref<384x256xbf16, #tpu.memory_space<vmem>>, %arg9: memref<1x256xf32, #tpu.memory_space<vmem>>, %arg10: memref<256x128xbf16, #tpu.memory_space<vmem>>, %arg11: memref<1x128xf32, #tpu.memory_space<vmem>>, %arg12: memref<1x128xbf16, #tpu.memory_space<vmem>>, %arg13: memref<1x1xf32, #tpu.memory_space<vmem>>, %arg14: memref<1x1x128xf32, #tpu.memory_space<vmem>>) attributes {dimension_semantics = [#tpu.dimension_semantics<parallel>], iteration_bounds = array<i64: 1>, scalar_prefetch = 0 : i64, scratch_operands = 0 : i64, tpu.core_type = #tpu.core_type<tc>, window_params = [{transform_indices = @transform_0, window_bounds = array<i64: 128, 24>}, {pipeline_mode = #tpu.pipeline_mode<synchronous>, transform_indices = @transform_1, window_bounds = array<i64: 24, 768>}, {pipeline_mode = #tpu.pipeline_mode<synchronous>, transform_indices = @transform_2, window_bounds = array<i64: 1, 768>}, {pipeline_mode = #tpu.pipeline_mode<synchronous>, transform_indices = @transform_3, window_bounds = array<i64: 384, 768>}, {pipeline_mode = #tpu.pipeline_mode<synchronous>, transform_indices = @transform_4, window_bounds = array<i64: 1, 768>}, {pipeline_mode = #tpu.pipeline_mode<synchronous>, transform_indices = @transform_5, window_bounds = array<i64: 384, 768>}, {pipeline_mode = #tpu.pipeline_mode<synchronous>, transform_indices = @transform_6, window_bounds = array<i64: 1, 768>}, {pipeline_mode = #tpu.pipeline_mode<synchronous>, transform_indices = @transform_7, window_bounds = array<i64: 384, 256>}, {pipeline_mode = #tpu.pipeline_mode<synchronous>, transform_indices = @transform_8, window_bounds = array<i64: 1, 256>}, {pipeline_mode = #tpu.pipeline_mode<synchronous>, transform_indices = @transform_9, window_bounds = array<i64: 256, 128>}, {pipeline_mode = #tpu.pipeline_mode<synchronous>, transform_indices = @transform_10, window_bounds = array<i64: 1, 128>}, {pipeline_mode = #tpu.pipeline_mode<synchronous>, transform_indices = @transform_11, window_bounds = array<i64: 1, 128>}, {pipeline_mode = #tpu.pipeline_mode<synchronous>, transform_indices = @transform_12, window_bounds = array<i64: 1, 1>}, {transform_indices = @transform_13, window_bounds = array<i64: 1, 1, 128>}]} {
    %c0 = arith.constant 0 : index
    %c0_0 = arith.constant 0 : index
    %0 = vector.load %arg1[%c0, %c0_0] : memref<128x24xf32, #tpu.memory_space<vmem>>, vector<128x24xf32>
    %1 = arith.truncf %0 : vector<128x24xf32> to vector<128x24xbf16>
    %c0_1 = arith.constant 0 : index
    %c0_2 = arith.constant 0 : index
    %2 = vector.load %arg2[%c0_1, %c0_2] : memref<24x768xbf16, #tpu.memory_space<vmem>>, vector<24x768xbf16>
    %cst = arith.constant dense<0.000000e+00> : vector<128x768xf32>
    %3 = tpu.matmul %1, %2, %cst {dimension_numbers = #tpu.dot_dimension_numbers<[1], [0], [0], [1], [0, 0, 1, 1], [], []>} : vector<128x24xbf16>, vector<24x768xbf16>, vector<128x768xf32> -> vector<128x768xf32>
    %c0_3 = arith.constant 0 : index
    %c0_4 = arith.constant 0 : index
    %4 = vector.load %arg3[%c0_3, %c0_4] : memref<1x768xf32, #tpu.memory_space<vmem>>, vector<1x768xf32>
    %5 = vector.broadcast %4 : vector<1x768xf32> to vector<128x768xf32>
    %6 = arith.addf %3, %5 : vector<128x768xf32>
    %cst_5 = arith.constant 0.000000e+00 : f32
    %7 = vector.broadcast %cst_5 : f32 to vector<128x768xf32>
    %8 = arith.maximumf %6, %7 : vector<128x768xf32>
    %9 = vector.extract_strided_slice %8 {offsets = [0, 0], sizes = [128, 384], strides = [1, 1]} : vector<128x768xf32> to vector<128x384xf32>
    %10 = vector.extract_strided_slice %8 {offsets = [0, 384], sizes = [128, 384], strides = [1, 1]} : vector<128x768xf32> to vector<128x384xf32>
    %11 = arith.maximumf %9, %10 : vector<128x384xf32>
    %12 = arith.truncf %11 : vector<128x384xf32> to vector<128x384xbf16>
    %c0_6 = arith.constant 0 : index
    %c0_7 = arith.constant 0 : index
    %13 = vector.load %arg4[%c0_6, %c0_7] : memref<384x768xbf16, #tpu.memory_space<vmem>>, vector<384x768xbf16>
    %cst_8 = arith.constant dense<0.000000e+00> : vector<128x768xf32>
    %14 = tpu.matmul %12, %13, %cst_8 {dimension_numbers = #tpu.dot_dimension_numbers<[1], [0], [0], [1], [0, 0, 1, 1], [], []>} : vector<128x384xbf16>, vector<384x768xbf16>, vector<128x768xf32> -> vector<128x768xf32>
    %c0_9 = arith.constant 0 : index
    %c0_10 = arith.constant 0 : index
    %15 = vector.load %arg5[%c0_9, %c0_10] : memref<1x768xf32, #tpu.memory_space<vmem>>, vector<1x768xf32>
    %16 = vector.broadcast %15 : vector<1x768xf32> to vector<128x768xf32>
    %17 = arith.addf %14, %16 : vector<128x768xf32>
    %cst_11 = arith.constant 0.000000e+00 : f32
    %18 = vector.broadcast %cst_11 : f32 to vector<128x768xf32>
    %19 = arith.maximumf %17, %18 : vector<128x768xf32>
    %20 = vector.extract_strided_slice %19 {offsets = [0, 0], sizes = [128, 384], strides = [1, 1]} : vector<128x768xf32> to vector<128x384xf32>
    %21 = vector.extract_strided_slice %19 {offsets = [0, 384], sizes = [128, 384], strides = [1, 1]} : vector<128x768xf32> to vector<128x384xf32>
    %22 = arith.maximumf %20, %21 : vector<128x384xf32>
    %23 = arith.truncf %22 : vector<128x384xf32> to vector<128x384xbf16>
    %c0_12 = arith.constant 0 : index
    %c0_13 = arith.constant 0 : index
    %24 = vector.load %arg6[%c0_12, %c0_13] : memref<384x768xbf16, #tpu.memory_space<vmem>>, vector<384x768xbf16>
    %cst_14 = arith.constant dense<0.000000e+00> : vector<128x768xf32>
    %25 = tpu.matmul %23, %24, %cst_14 {dimension_numbers = #tpu.dot_dimension_numbers<[1], [0], [0], [1], [0, 0, 1, 1], [], []>} : vector<128x384xbf16>, vector<384x768xbf16>, vector<128x768xf32> -> vector<128x768xf32>
    %c0_15 = arith.constant 0 : index
    %c0_16 = arith.constant 0 : index
    %26 = vector.load %arg7[%c0_15, %c0_16] : memref<1x768xf32, #tpu.memory_space<vmem>>, vector<1x768xf32>
    %27 = vector.broadcast %26 : vector<1x768xf32> to vector<128x768xf32>
    %28 = arith.addf %25, %27 : vector<128x768xf32>
    %cst_17 = arith.constant 0.000000e+00 : f32
    %29 = vector.broadcast %cst_17 : f32 to vector<128x768xf32>
    %30 = arith.maximumf %28, %29 : vector<128x768xf32>
    %31 = vector.extract_strided_slice %30 {offsets = [0, 0], sizes = [128, 384], strides = [1, 1]} : vector<128x768xf32> to vector<128x384xf32>
    %32 = vector.extract_strided_slice %30 {offsets = [0, 384], sizes = [128, 384], strides = [1, 1]} : vector<128x768xf32> to vector<128x384xf32>
    %33 = arith.maximumf %31, %32 : vector<128x384xf32>
    %34 = arith.truncf %33 : vector<128x384xf32> to vector<128x384xbf16>
    %c0_18 = arith.constant 0 : index
    %c0_19 = arith.constant 0 : index
    %35 = vector.load %arg8[%c0_18, %c0_19] : memref<384x256xbf16, #tpu.memory_space<vmem>>, vector<384x256xbf16>
    %cst_20 = arith.constant dense<0.000000e+00> : vector<128x256xf32>
    %36 = tpu.matmul %34, %35, %cst_20 {dimension_numbers = #tpu.dot_dimension_numbers<[1], [0], [0], [1], [0, 0, 1, 1], [], []>} : vector<128x384xbf16>, vector<384x256xbf16>, vector<128x256xf32> -> vector<128x256xf32>
    %c0_21 = arith.constant 0 : index
    %c0_22 = arith.constant 0 : index
    %37 = vector.load %arg9[%c0_21, %c0_22] : memref<1x256xf32, #tpu.memory_space<vmem>>, vector<1x256xf32>
    %38 = vector.broadcast %37 : vector<1x256xf32> to vector<128x256xf32>
    %39 = arith.addf %36, %38 : vector<128x256xf32>
    %cst_23 = arith.constant 0.000000e+00 : f32
    %40 = vector.broadcast %cst_23 : f32 to vector<128x256xf32>
    %41 = arith.maximumf %39, %40 : vector<128x256xf32>
    %42 = arith.truncf %41 : vector<128x256xf32> to vector<128x256xbf16>
    %c0_24 = arith.constant 0 : index
    %c0_25 = arith.constant 0 : index
    %43 = vector.load %arg10[%c0_24, %c0_25] : memref<256x128xbf16, #tpu.memory_space<vmem>>, vector<256x128xbf16>
    %cst_26 = arith.constant dense<0.000000e+00> : vector<128x128xf32>
    %44 = tpu.matmul %42, %43, %cst_26 {dimension_numbers = #tpu.dot_dimension_numbers<[1], [0], [0], [1], [0, 0, 1, 1], [], []>} : vector<128x256xbf16>, vector<256x128xbf16>, vector<128x128xf32> -> vector<128x128xf32>
    %c0_27 = arith.constant 0 : index
    %c0_28 = arith.constant 0 : index
    %45 = vector.load %arg11[%c0_27, %c0_28] : memref<1x128xf32, #tpu.memory_space<vmem>>, vector<1x128xf32>
    %46 = vector.broadcast %45 : vector<1x128xf32> to vector<128x128xf32>
    %47 = arith.addf %44, %46 : vector<128x128xf32>
    %cst_29 = arith.constant 0.000000e+00 : f32
    %48 = vector.broadcast %cst_29 : f32 to vector<128x128xf32>
    %49 = arith.maximumf %47, %48 : vector<128x128xf32>
    %c0_30 = arith.constant 0 : index
    %c0_31 = arith.constant 0 : index
    %50 = vector.load %arg12[%c0_30, %c0_31] : memref<1x128xbf16, #tpu.memory_space<vmem>>, vector<1x128xbf16>
    %51 = arith.truncf %49 : vector<128x128xf32> to vector<128x128xbf16>
    %cst_32 = arith.constant dense<0.000000e+00> : vector<1x128xf32>
    %52 = tpu.matmul %50, %51, %cst_32 {dimension_numbers = #tpu.dot_dimension_numbers<[1], [1], [0], [0], [0, 0, 1, 0], [], []>} : vector<1x128xbf16>, vector<128x128xbf16>, vector<1x128xf32> -> vector<1x128xf32>
    %c0_33 = arith.constant 0 : index
    %c0_34 = arith.constant 0 : index
    %53 = vector.load %arg13[%c0_33, %c0_34] : memref<1x1xf32, #tpu.memory_space<vmem>>, vector<1x1xf32>
    %54 = vector.broadcast %53 : vector<1x1xf32> to vector<1x128xf32>
    %55 = arith.addf %52, %54 : vector<1x128xf32>
    %c0_35 = arith.constant 0 : index
    %c0_36 = arith.constant 0 : index
    %c0_37 = arith.constant 0 : index
    %56 = vector.load %arg14[%c0_35, %c0_36, %c0_37] : memref<1x1x128xf32, #tpu.memory_space<vmem>>, vector<1x1x128xf32>
    %57 = vector.shape_cast %56 : vector<1x1x128xf32> to vector<1x128xf32>
    %58 = vector.shape_cast %55 : vector<1x128xf32> to vector<1x1x128xf32>
    tpu.vector_store %arg14[%c0_35, %c0_36, %c0_37], %58 {strides = array<i32>} : memref<1x1x128xf32, #tpu.memory_space<vmem>>, vector<1x1x128xf32>,
    return
  }
  func.func @transform_0(%arg0: i32) -> (i32, i32) {
    %c0_i32 = arith.constant 0 : i32
    %c0_i32_0 = arith.constant 0 : i32
    return %arg0, %c0_i32 : i32, i32
  }
  func.func @transform_1(%arg0: i32) -> (i32, i32) {
    %c0_i32 = arith.constant 0 : i32
    %c0_i32_0 = arith.constant 0 : i32
    %c0_i32_1 = arith.constant 0 : i32
    return %c0_i32, %c0_i32_0 : i32, i32
  }
  func.func @transform_2(%arg0: i32) -> (i32, i32) {
    %c0_i32 = arith.constant 0 : i32
    %c0_i32_0 = arith.constant 0 : i32
    %c0_i32_1 = arith.constant 0 : i32
    return %c0_i32, %c0_i32_0 : i32, i32
  }
  func.func @transform_3(%arg0: i32) -> (i32, i32) {
    %c0_i32 = arith.constant 0 : i32
    %c0_i32_0 = arith.constant 0 : i32
    %c0_i32_1 = arith.constant 0 : i32
    return %c0_i32, %c0_i32_0 : i32, i32
  }
  func.func @transform_4(%arg0: i32) -> (i32, i32) {
    %c0_i32 = arith.constant 0 : i32
    %c0_i32_0 = arith.constant 0 : i32
    %c0_i32_1 = arith.constant 0 : i32
    return %c0_i32, %c0_i32_0 : i32, i32
  }
  func.func @transform_5(%arg0: i32) -> (i32, i32) {
    %c0_i32 = arith.constant 0 : i32
    %c0_i32_0 = arith.constant 0 : i32
    %c0_i32_1 = arith.constant 0 : i32
    return %c0_i32, %c0_i32_0 : i32, i32
  }
  func.func @transform_6(%arg0: i32) -> (i32, i32) {
    %c0_i32 = arith.constant 0 : i32
    %c0_i32_0 = arith.constant 0 : i32
    %c0_i32_1 = arith.constant 0 : i32
    return %c0_i32, %c0_i32_0 : i32, i32
  }
  func.func @transform_7(%arg0: i32) -> (i32, i32) {
    %c0_i32 = arith.constant 0 : i32
    %c0_i32_0 = arith.constant 0 : i32
    %c0_i32_1 = arith.constant 0 : i32
    return %c0_i32, %c0_i32_0 : i32, i32
  }
  func.func @transform_8(%arg0: i32) -> (i32, i32) {
    %c0_i32 = arith.constant 0 : i32
    %c0_i32_0 = arith.constant 0 : i32
    %c0_i32_1 = arith.constant 0 : i32
    return %c0_i32, %c0_i32_0 : i32, i32
  }
  func.func @transform_9(%arg0: i32) -> (i32, i32) {
    %c0_i32 = arith.constant 0 : i32
    %c0_i32_0 = arith.constant 0 : i32
    %c0_i32_1 = arith.constant 0 : i32
    return %c0_i32, %c0_i32_0 : i32, i32
  }
  func.func @transform_10(%arg0: i32) -> (i32, i32) {
    %c0_i32 = arith.constant 0 : i32
    %c0_i32_0 = arith.constant 0 : i32
    %c0_i32_1 = arith.constant 0 : i32
    return %c0_i32, %c0_i32_0 : i32, i32
  }
  func.func @transform_11(%arg0: i32) -> (i32, i32) {
    %c0_i32 = arith.constant 0 : i32
    %c0_i32_0 = arith.constant 0 : i32
    %c0_i32_1 = arith.constant 0 : i32
    return %c0_i32, %c0_i32_0 : i32, i32
  }
  func.func @transform_12(%arg0: i32) -> (i32, i32) {
    %c0_i32 = arith.constant 0 : i32
    %c0_i32_0 = arith.constant 0 : i32
    %c0_i32_1 = arith.constant 0 : i32
    return %c0_i32, %c0_i32_0 : i32, i32
  }
  func.func @transform_13(%arg0: i32) -> (i32, i32, i32) {
    %c0_i32 = arith.constant 0 : i32
    %c0_i32_0 = arith.constant 0 : i32
    %c0_i32_1 = arith.constant 0 : i32
    return %arg0, %c0_i32, %c0_i32_0 : i32, i32, i32
  }
}

</mosaic_0001>

<bundles_post_ra>
// kernel: tpu_custom_call.1
= control target key start
LH: loop header
LB: loop body
LE: loop exit
PB: predicated region body
PF: predicated region fallthrough
CT: control target
= control target key end

     0   :  { %s8252_s0 = inlined_call_operand.vmem [shape: f32[128,24], index: 0, kind: input, shape index: {}]   ;;  %s8253_s1 = inlined_call_operand.hbm [shape: bf16[24,768], index: 1, kind: input, shape index: {}]   ;;  %s8254_s2 = inlined_call_operand.vmem [shape: f32[1,768], index: 2, kind: input, shape index: {}]   ;;  %s8255_s3 = inlined_call_operand.hbm [shape: bf16[384,768], index: 3, kind: input, shape index: {}]   ;;  %s8256_s4 = inlined_call_operand.vmem [shape: f32[1,768], index: 4, kind: input, shape index: {}]   ;;  %s8257_s5 = inlined_call_operand.hbm [shape: bf16[384,768], index: 5, kind: input, shape index: {}]   ;;  %s8258_s6 = inlined_call_operand.vmem [shape: f32[1,768], index: 6, kind: input, shape index: {}]   ;;  %s8259_s7 = inlined_call_operand.hbm [shape: bf16[384,256], index: 7, kind: input, shape index: {}]   ;;  %s8260_s8 = inlined_call_operand.vmem [shape: f32[1,256], index: 8, kind: input, shape index: {}]   ;;  %s8261_s9 = inlined_call_operand.vmem [shape: bf16[256,128], index: 9, kind: input, shape index: {}]   ;;  %s8262_s10 = inlined_call_operand.vmem [shape: f32[1,128], index: 10, kind: input, shape index: {}]   ;;  %s8263_s11 = inlined_call_operand.vmem [shape: bf16[1,128], index: 11, kind: input, shape index: {}]   ;;  %s8264_s12 = inlined_call_operand.<no memory space> [shape: f32[1,1], index: 12, kind: input, shape index: {}]   ;;  %s8265_s13 = inlined_call_operand.hbm [shape: f32[1,1,128], index: 13, kind: output, shape index: {}]  }
   0x1   :  { %v18_v0 = vstv %s8264_s12 }
   0x2   :  { %19 = vst [vmem:[#allocation2] sm:$0x1] %v18_v0 }
   0x3   :  { %20 = vsyncpa [#allocation4], 0 }
   0x4   :  { %21 = vsyncpa [#allocation7], 0 }
   0x5   :  { %22 = vsyncpa [#allocation10], 0 }
   0x6   :  { %23 = vsyncpa [#allocation5], 0  ;;  %s6746_s27 = smov [#allocation6]   ;;  %s6747_s29 = smov [#allocation3]  }
   0x7   :  { %s45_s28 = sshll.u32 %s6746_s27, 4  ;;  %s31_s30 = sshll.u32 %s6747_s29, 4  ;;  %s46_s28 = int_to_ptr.vmem [resolvable:$true] %s45_s28  ;;  %s6831_s30 = int_to_ptr.vmem [resolvable:$true] %s31_s30 }
   0x8   :  { %s6628_s16 = scalar_lea.hbm %s8255_s3, 18432 }
   0x9   :  { %p6629_p0 = scmp.ne.s32.totalorder %s8255_s3, %s6628_s16  ;;  %p6632_p1 = scmp.lt.u32.totalorder %s6628_s16, %s8255_s3 }
   0xb   :  { %p6634_p2 = pnand %p6632_p1, %p6629_p0 }
   0xd   :  { %6637 = shalt.err (!%p6634_p2)
}
   0xe   :  { %s6638_s20 = scalar_lea.vmem %s46_s28, 18432  ;;  %p6643_p4 = scmp.lt.s32.totalorder %s46_s28, %s46_s28 }
   0xf   :  { %p6639_p3 = scmp.ne.s32.totalorder %s46_s28, %s6638_s20  ;;  %p6644_p5 = scmp.lt.s32.totalorder %s6638_s20, %s6638_s20 }
  0x11   :  { %p6645_p6 = por %p6644_p5, %p6643_p4 }
  0x13   :  { %p6646_p7 = pnand %p6645_p6, %p6639_p3 }
  0x15   :  { %6649 = shalt.err (!%p6646_p7)
}
  0x16   :  { %s6748_s21 = smov 384   ;;  %s6749_s22 = smov 24  }
  0x17   :  { %51 = dma.hbm_to_vmem [thread:$0]  %s8255_s3, 18432, %s46_s28, [#allocation7], %s6748_s21, %s6748_s21, %s6749_s22  }
  0x18   :  { %s6650_s27 = scalar_lea.hbm %s8253_s1, 1152 }
  0x19   :  { %p6651_p8 = scmp.ne.s32.totalorder %s8253_s1, %s6650_s27  ;;  %p6654_p9 = scmp.lt.u32.totalorder %s6650_s27, %s8253_s1 }
  0x1b   :  { %p6656_p10 = pnand %p6654_p9, %p6651_p8 }
  0x1d   :  { %6659 = shalt.err (!%p6656_p10)
}
  0x1e   :  { %s6660_s17 = scalar_lea.vmem %s6831_s30, 1152  ;;  %p6665_p12 = scmp.lt.s32.totalorder %s6831_s30, %s6831_s30 }
  0x1f   :  { %p6661_p11 = scmp.ne.s32.totalorder %s6831_s30, %s6660_s17  ;;  %p6666_p13 = scmp.lt.s32.totalorder %s6660_s17, %s6660_s17 }
  0x21   :  { %p6667_p0 = por %p6666_p13, %p6665_p12 }
  0x23   :  { %p6668_p1 = pnand %p6667_p0, %p6661_p11 }
  0x25   :  { %6671 = shalt.err (!%p6668_p1)
}
  0x26   :  { %37 = dma.hbm_to_vmem [thread:$0]  %s8253_s1, 1152, %s6831_s30, [#allocation4], %s6748_s21, %s6748_s21, %s6749_s22  }
  0x27   :  { %s6750_s18 = smov [#allocation8]   ;;  %s6751_s19 = smov [#allocation9]  }
  0x28   :  { %s59_s12 = sshll.u32 %s6750_s18, 4  ;;  %s73_s20 = sshll.u32 %s6751_s19, 4  ;;  %s60_s12 = int_to_ptr.vmem [resolvable:$true] %s59_s12  ;;  %s6868_s20 = int_to_ptr.vmem [resolvable:$true] %s73_s20 }
  0x29   :  { %s6672_s25 = scalar_lea.hbm %s8257_s5, 18432 }
  0x2a   :  { %p6673_p2 = scmp.ne.s32.totalorder %s8257_s5, %s6672_s25  ;;  %p6676_p3 = scmp.lt.u32.totalorder %s6672_s25, %s8257_s5 }
  0x2c   :  { %p6678_p4 = pnand %p6676_p3, %p6673_p2 }
  0x2e   :  { %6681 = shalt.err (!%p6678_p4)
}
  0x2f   :  { %s6682_s1 = scalar_lea.vmem %s60_s12, 18432  ;;  %p6687_p6 = scmp.lt.s32.totalorder %s60_s12, %s60_s12 }
  0x30   :  { %p6683_p5 = scmp.ne.s32.totalorder %s60_s12, %s6682_s1  ;;  %p6688_p7 = scmp.lt.s32.totalorder %s6682_s1, %s6682_s1 }
  0x32   :  { %p6689_p8 = por %p6688_p7, %p6687_p6 }
  0x34   :  { %p6690_p9 = pnand %p6689_p8, %p6683_p5 }
  0x36   :  { %6693 = shalt.err (!%p6690_p9)
}
  0x37   :  { %65 = dma.hbm_to_vmem [thread:$0]  %s8257_s5, 18432, %s60_s12, [#allocation7], %s6748_s21, %s6748_s21, %s6749_s22  }
  0x38   :  { %s6694_s3 = scalar_lea.hbm %s8259_s7, 6144 }
  0x39   :  { %p6695_p10 = scmp.ne.s32.totalorder %s8259_s7, %s6694_s3  ;;  %p6698_p11 = scmp.lt.u32.totalorder %s6694_s3, %s8259_s7 }
  0x3b   :  { %p6700_p12 = pnand %p6698_p11, %p6695_p10 }
  0x3d   :  { %6703 = shalt.err (!%p6700_p12)
}
  0x3e   :  { %s6704_s24 = scalar_lea.vmem %s6868_s20, 6144  ;;  %p6709_p0 = scmp.lt.s32.totalorder %s6868_s20, %s6868_s20 }
  0x3f   :  { %p6705_p13 = scmp.ne.s32.totalorder %s6868_s20, %s6704_s24  ;;  %p6710_p1 = scmp.lt.s32.totalorder %s6704_s24, %s6704_s24 }
  0x41   :  { %p6711_p2 = por %p6710_p1, %p6709_p0 }
  0x43   :  { %p6712_p3 = pnand %p6711_p2, %p6705_p13 }
  0x45   :  { %6715 = shalt.err (!%p6712_p3)
}
  0x46   :  { %s6752_s5 = smov 128   ;;  %s6753_s21 = smov 8  }
  0x47   :  { %79 = dma.hbm_to_vmem [thread:$0]  %s8259_s7, 6144, %s6868_s20, [#allocation10], %s6752_s5, %s6752_s5, %s6753_s21  }
  0x48   :  { %6738 = dma.done.wait [#allocation4], 1152  }
  0x49   :  { %6739 = vsyncadd [#allocation4], 4294966144 }
  0x4a   :  { %6740 = dma.done.wait [#allocation7], 36864  }
  0x4b   :  { %6741 = vsyncadd [#allocation7], 4294930432 }
  0x4c   :  { %6742 = dma.done.wait [#allocation10], 6144  }
  0x4d   :  { %6743 = vsyncadd [#allocation10], 4294961152  ;;  %v8266_v1 = vmov 0   ;;  %v6093_v2 = vld [vmem:[#allocation3 + $0x4] ss:$24 sps:$4 sm:$0xff]   ;;  %v133_v6 = vld [vmem:[#allocation3 + $0x30] sm:$0xff] }
  0x4e   :  { %289 = vmatprep.mubr.bf16.mxu0 %v8266_v1  ;;  %402 = vmatprep.mubr.bf16.mxu1 %v8266_v1  ;;  %v6095_v3 = vld [vmem:[#allocation3 + $0xc] ss:$24 sps:$4 sm:$0xff]   ;;  %v6097_v4 = vld [vmem:[#allocation3] ss:$24 sps:$4 sm:$0xff]   ;;  %vm238_vm0 = vcmask 1043456   ;;  %v5154_v7 = vcombine.high %v133_v6, %v133_v6  ;;  %v5153_v9 = vcombine.low %v133_v6, %v133_v6  ;;  %vm213_vm1 = vcmask 195584  }
  0x4f   :  { %6092 = vset.pattern.permute.xlu0 %v8266_v1  ;;  %257 = vmatprep.subr.bf16.mxu0 %v6093_v2  ;;  %v6098_v5 = vld [vmem:[#allocation3 + $0x8] ss:$24 sps:$4 sm:$0xff]   ;;  %v134_v8 = vld [vmem:[#allocation3 + $0x38] sm:$0xff]  ;;  %v6105_v15 = vld [vmem:[#allocation3 + $0x14] ss:$24 sps:$4 sm:$0xff]   ;;  %vm6756_vm2 = vmmov 0  }
  0x50   :  { %370 = vmatprep.subr.bf16.mxu1 %v6095_v3  ;;  %v103_v10 = vld [vmem:[%s8252_s0] sm:$0xff]  ;;  %258 = vmatpush1.bf16.msra.mxu0 %v6097_v4  ;;  %v5156_v11 = vcombine.high %v134_v8, %v134_v8  ;;  %v5155_v12 = vcombine.low %v134_v8, %v134_v8  ;;  %v104_v13 = vld [vmem:[%s8252_s0 + $0x8] sm:$0xff]  ;;  %v240_v14 = vsel %vm238_vm0, %v5153_v9, 0  ;;  %v105_v22 = vld [vmem:[%s8252_s0 + $0x10] sm:$0xff]  ;;  %s6757_s12 = smov [#allocation11]  }
  0x51   :  { %371 = vmatpush1.bf16.msra.mxu1 %v6098_v5  ;;  %5159 = vmatprep.subr.msk.bf16.mxu0 %vm238_vm0, %v5154_v7  ;;  %v6915_v17 = vpack.c.bf16 %v104_v13, %v103_v10  ;;  %v6103_v18 = vld [vmem:[#allocation3 + $0x10] ss:$24 sps:$4 sm:$0xff]   ;;  %v135_v19 = vld [vmem:[#allocation3 + $0x40] sm:$0xff]  ;;  %v106_v23 = vld [vmem:[%s8252_s0 + $0x18] sm:$0xff]  ;;  %s5136_s7 = sshll.u32 %s6757_s12, 4  ;;  %s5137_s7 = int_to_ptr.vmem [resolvable:$true] %s5136_s7 }
  0x52   :  { %5168 = vmatprep.subr.msk.bf16.mxu1 %vm238_vm0, %v5156_v11  ;;  %v246_v16 = vsel %vm238_vm0, %v5155_v12, 0  ;;  %v5158_v20 = vcombine.high %v135_v19, %v135_v19  ;;  %v5157_v21 = vcombine.low %v135_v19, %v135_v19  ;;  %v120_v25 = vpack.c.bf16 %v106_v23, %v105_v22  ;;  %v107_v26 = vld [vmem:[%s8252_s0 + $0x20] sm:$0xff]  ;;  %v108_v27 = vld [vmem:[%s8252_s0 + $0x28] sm:$0xff]  ;;  %v109_v29 = vld [vmem:[%s8252_s0 + $0x30] sm:$0xff]  ;;  %s6716_s20 = scalar_lea.vmem %s5137_s7, 16  ;;  %s6720_s25 = scalar_lea.vmem %s5137_s7, 32 }
  0x53   :  { %v121_v28 = vpack.c.bf16 %v108_v27, %v107_v26  ;;  %v110_v30 = vld [vmem:[%s8252_s0 + $0x38] sm:$0xff]  ;;  %v111_v32 = vld [vmem:[%s8252_s0 + $0x40] sm:$0xff]  ;;  %v112_v33 = vld [vmem:[%s8252_s0 + $0x48] sm:$0xff]  ;;  %p6717_p4 = scmp.ne.s32.totalorder %s5137_s7, %s6716_s20  ;;  %p6721_p5 = scmp.lt.s32.totalorder %s5137_s7, %s5137_s7 }
  0x54   :  { %260 = vmatpush1.bf16.msra.mxu0 %v240_v14  ;;  %v252_v24 = vsel %vm238_vm0, %v5157_v21, 0  ;;  %v122_v31 = vpack.c.bf16 %v110_v30, %v109_v29  ;;  %v123_v34 = vpack.c.bf16 %v112_v33, %v111_v32  ;;  %v113_v35 = vld [vmem:[%s8252_s0 + $0x50] sm:$0xff]  ;;  %v114_v36 = vld [vmem:[%s8252_s0 + $0x58] sm:$0xff]  ;;  %v115_v38 = vld [vmem:[%s8252_s0 + $0x60] sm:$0xff]  ;;  %p6722_p6 = scmp.lt.s32.totalorder %s6720_s25, %s6716_s20 }
  0x55   :  { %373 = vmatpush1.bf16.msra.mxu1 %v246_v16  ;;  %483 = vmatprep.subr.bf16.mxu0 %v6105_v15  ;;  %v124_v37 = vpack.c.bf16 %v114_v36, %v113_v35  ;;  %v116_v39 = vld [vmem:[%s8252_s0 + $0x68] sm:$0xff]  ;;  %v117_v41 = vld [vmem:[%s8252_s0 + $0x70] sm:$0xff]  ;;  %v118_v42 = vld [vmem:[%s8252_s0 + $0x78] sm:$0xff] }
  0x56   :  { %v125_v40 = vpack.c.bf16 %v116_v39, %v115_v38  ;;  %v6991_v43 = vpack.c.bf16 %v118_v42, %v117_v41  ;;  %v6110_v44 = vld [vmem:[#allocation6 + $0x4] ss:$24 sps:$4 sm:$0xff]   ;;  %v6108_v46 = vld [vmem:[#allocation6] ss:$24 sps:$4 sm:$0xff]   ;;  %v6116_v48 = vld [vmem:[#allocation6 + $0x34] ss:$24 sps:$4 sm:$0xff]   ;;  %p6723_p7 = por %p6722_p6, %p6721_p5 }
  0x57   :  { %5160 = vmatmul.mubr.msk.bf16.vlgmr.msra.gmra.mrb[0].mxu0 %vm213_vm1, %v6915_v17  ;;  %v6113_v45 = vld [vmem:[#allocation6 + $0xc] ss:$24 sps:$4 sm:$0xff]   ;;  %v6111_v47 = vld [vmem:[#allocation6 + $0x8] ss:$24 sps:$4 sm:$0xff]   ;;  %1660 = vmatprep.subr.bf16.mxu1 %v6110_v44  ;;  %v6119_v49 = vld [vmem:[#allocation6 + $0x3c] ss:$24 sps:$4 sm:$0xff]  }
  0x58   :  { %5169 = vmatmul.mubr.msk.bf16.vlgmr.msra.gmra.mrb[0].mxu1 %vm213_vm1, %v6915_v17  ;;  %484 = vmatpush1.bf16.msra.mxu0 %v6103_v18  ;;  %v6114_v50 = vld [vmem:[#allocation6 + $0x30] ss:$24 sps:$4 sm:$0xff]   ;;  %v6122_v52 = vld [vmem:[#allocation6 + $0x64] ss:$24 sps:$4 sm:$0xff]   ;;  %v6120_v54 = vld [vmem:[#allocation6 + $0x60] ss:$24 sps:$4 sm:$0xff]   ;;  %p6724_p8 = pnand %p6723_p7, %p6717_p4 }
  0x59   :  { %299 = vmatprep.mubr.bf16.mxu0 %v8266_v1  ;;  %412 = vmatprep.mubr.bf16.mxu1 %v8266_v1  ;;  %v6117_v51 = vld [vmem:[#allocation6 + $0x38] ss:$24 sps:$4 sm:$0xff]   ;;  %v6125_v53 = vld [vmem:[#allocation6 + $0x6c] ss:$24 sps:$4 sm:$0xff]   ;;  %v6123_v55 = vld [vmem:[#allocation6 + $0x68] ss:$24 sps:$4 sm:$0xff]  }
  0x5a   :  { %5177 = vmatprep.subr.msk.bf16.mxu0 %vm238_vm0, %v5158_v20  ;;  %1661 = vmatpush1.bf16.msra.mxu1 %v6108_v46  ;;  %v6128_v56 = vld [vmem:[#allocation6 + $0x94] ss:$24 sps:$4 sm:$0xff]   ;;  %v6126_v58 = vld [vmem:[#allocation6 + $0x90] ss:$24 sps:$4 sm:$0xff]   ;;  %v6134_v60 = vld [vmem:[#allocation6 + $0xc4] ss:$24 sps:$4 sm:$0xff]  }
  0x5b   :  { %1662 = vmatprep.subr.bf16.mxu1 %v6116_v48  ;;  %v6131_v57 = vld [vmem:[#allocation6 + $0x9c] ss:$24 sps:$4 sm:$0xff]   ;;  %v6129_v59 = vld [vmem:[#allocation6 + $0x98] ss:$24 sps:$4 sm:$0xff]   ;;  %v6137_v61 = vld [vmem:[#allocation6 + $0xcc] ss:$24 sps:$4 sm:$0xff]  }
  0x5c   :  { %486 = vmatpush1.bf16.msra.mxu0 %v252_v24  ;;  %v6132_v62 = vld [vmem:[#allocation6 + $0xc0] ss:$24 sps:$4 sm:$0xff]   ;;  %v6140_v0 = vld [vmem:[#allocation6 + $0xf4] ss:$24 sps:$4 sm:$0xff]   ;;  %v6138_v3 = vld [vmem:[#allocation6 + $0xf0] ss:$24 sps:$4 sm:$0xff]  }
  0x5d   :  { %1886 = vmatprep.subr.bf16.mxu0 %v6113_v45  ;;  %v6135_v63 = vld [vmem:[#allocation6 + $0xc8] ss:$24 sps:$4 sm:$0xff]   ;;  %v6143_v2 = vld [vmem:[#allocation6 + $0xfc] ss:$24 sps:$4 sm:$0xff]   ;;  %v6141_v4 = vld [vmem:[#allocation6 + $0xf8] ss:$24 sps:$4 sm:$0xff]  }
  0x5e   :  { %1663 = vmatpush1.bf16.msra.mxu1 %v6114_v50  ;;  %v6146_v5 = vld [vmem:[#allocation6 + $0x124] ss:$24 sps:$4 sm:$0xff]   ;;  %v6144_v7 = vld [vmem:[#allocation6 + $0x120] ss:$24 sps:$4 sm:$0xff]   ;;  %v6152_v9 = vld [vmem:[#allocation6 + $0x154] ss:$24 sps:$4 sm:$0xff]  }
  0x5f   :  { %5161 = vmatmul.mubr.msk.bf16.gmra.mrb[4].mxu0 %vm213_vm1, %v120_v25  ;;  %1664 = vmatprep.subr.bf16.mxu1 %v6122_v52  ;;  %v6149_v6 = vld [vmem:[#allocation6 + $0x12c] ss:$24 sps:$4 sm:$0xff]   ;;  %v6147_v8 = vld [vmem:[#allocation6 + $0x128] ss:$24 sps:$4 sm:$0xff]   ;;  %v6155_v10 = vld [vmem:[#allocation6 + $0x15c] ss:$24 sps:$4 sm:$0xff]  }
  0x60   :  { %5170 = vmatmul.mubr.msk.bf16.gmra.mrb[4].mxu1 %vm213_vm1, %v120_v25  ;;  %309 = vmatprep.mubr.bf16.mxu0 %v8266_v1  ;;  %v6150_v11 = vld [vmem:[#allocation6 + $0x150] ss:$24 sps:$4 sm:$0xff]   ;;  %v6158_v13 = vld [vmem:[#allocation6 + $0x184] ss:$24 sps:$4 sm:$0xff]   ;;  %v6156_v15 = vld [vmem:[#allocation6 + $0x180] ss:$24 sps:$4 sm:$0xff]  }
  0x61   :  { %422 = vmatprep.mubr.bf16.mxu1 %v8266_v1  ;;  %v6153_v12 = vld [vmem:[#allocation6 + $0x158] ss:$24 sps:$4 sm:$0xff]   ;;  %v6161_v14 = vld [vmem:[#allocation6 + $0x18c] ss:$24 sps:$4 sm:$0xff]   ;;  %v6159_v16 = vld [vmem:[#allocation6 + $0x188] ss:$24 sps:$4 sm:$0xff]  }
  0x62   :  { %1665 = vmatpush1.bf16.msra.mxu1 %v6120_v54  ;;  %v6167_v18 = vld [vmem:[#allocation6 + $0x1bc] ss:$24 sps:$4 sm:$0xff]   ;;  %v6162_v19 = vld [vmem:[#allocation6 + $0x1b0] ss:$24 sps:$4 sm:$0xff]   ;;  %v6173_v22 = vld [vmem:[#allocation6 + $0x1ec] ss:$24 sps:$4 sm:$0xff]  }
  0x63   :  { %1666 = vmatprep.subr.bf16.mxu1 %v6128_v56  ;;  %v6165_v20 = vld [vmem:[#allocation6 + $0x1b8] ss:$24 sps:$4 sm:$0xff]   ;;  %v6170_v21 = vld [vmem:[#allocation6 + $0x1e4] ss:$24 sps:$4 sm:$0xff]   ;;  %v6171_v24 = vld [vmem:[#allocation6 + $0x1e8] ss:$24 sps:$4 sm:$0xff]  }
  0x64   :  { %v6168_v23 = vld [vmem:[#allocation6 + $0x1e0] ss:$24 sps:$4 sm:$0xff]   ;;  %v6179_v26 = vld [vmem:[#allocation6 + $0x21c] ss:$24 sps:$4 sm:$0xff]   ;;  %v6174_v27 = vld [vmem:[#allocation6 + $0x210] ss:$24 sps:$4 sm:$0xff]  }
  0x65   :  { %v6182_v29 = vld [vmem:[#allocation6 + $0x244] ss:$24 sps:$4 sm:$0xff]   ;;  %v6183_v32 = vld [vmem:[#allocation6 + $0x248] ss:$24 sps:$4 sm:$0xff]   ;;  %v6188_v33 = vld [vmem:[#allocation6 + $0x274] ss:$24 sps:$4 sm:$0xff]  }
  0x66   :  { %1667 = vmatpush1.bf16.msra.mxu1 %v6126_v58  ;;  %v6185_v30 = vld [vmem:[#allocation6 + $0x24c] ss:$24 sps:$4 sm:$0xff]   ;;  %v6186_v35 = vld [vmem:[#allocation6 + $0x270] ss:$24 sps:$4 sm:$0xff]   ;;  %v6192_v39 = vld [vmem:[#allocation6 + $0x2a0] ss:$24 sps:$4 sm:$0xff]  }
  0x67   :  { %5162 = vmatmul.mubr.msk.bf16.gmra.mrb[8].mxu0 %vm213_vm1, %v121_v28  ;;  %1668 = vmatprep.subr.bf16.mxu1 %v6134_v60  ;;  %v6189_v36 = vld [vmem:[#allocation6 + $0x278] ss:$24 sps:$4 sm:$0xff]   ;;  %v6197_v38 = vld [vmem:[#allocation6 + $0x2ac] ss:$24 sps:$4 sm:$0xff]   ;;  %v6203_v42 = vld [vmem:[#allocation6 + $0x2dc] ss:$24 sps:$4 sm:$0xff]  }
  0x68   :  { %5171 = vmatmul.mubr.msk.bf16.gmra.mrb[8].mxu1 %vm213_vm1, %v121_v28  ;;  %319 = vmatprep.mubr.bf16.mxu0 %v8266_v1  ;;  %v6200_v41 = vld [vmem:[#allocation6 + $0x2d4] ss:$24 sps:$4 sm:$0xff]   ;;  %v6201_v44 = vld [vmem:[#allocation6 + $0x2d8] ss:$24 sps:$4 sm:$0xff]   ;;  %v6206_v45 = vld [vmem:[#allocation6 + $0x304] ss:$24 sps:$4 sm:$0xff]  }
  0x69   :  { %432 = vmatprep.mubr.bf16.mxu1 %v8266_v1  ;;  %v6221_v46 = vld [vmem:[#allocation6 + $0x30c] ss:$24 sps:$4 sm:$0xff]   ;;  %v7023_v50 = vld [vmem:[%s8254_s2] sm:$0x3f] }
  0x6a   :  { %1669 = vmatpush1.bf16.msra.mxu1 %v6132_v62 }
  0x6b   :  { %1670 = vmatprep.subr.bf16.mxu1 %v6140_v0 }
  0x6e   :  { %1671 = vmatpush1.bf16.msra.mxu1 %v6138_v3 }
  0x6f   :  { %5163 = vmatmul.mubr.msk.bf16.gmra.mrb[12].mxu0 %vm213_vm1, %v122_v31  ;;  %1672 = vmatprep.subr.bf16.mxu1 %v6146_v5 }
  0x70   :  { %5172 = vmatmul.mubr.msk.bf16.gmra.mrb[12].mxu1 %vm213_vm1, %v122_v31  ;;  %329 = vmatprep.mubr.bf16.mxu0 %v8266_v1 }
  0x71   :  { %442 = vmatprep.mubr.bf16.mxu1 %v8266_v1 }
  0x72   :  { %1673 = vmatpush1.bf16.msra.mxu1 %v6144_v7 }
  0x73   :  { %1674 = vmatprep.subr.bf16.mxu1 %v6152_v9 }
  0x76   :  { %1675 = vmatpush1.bf16.msra.mxu1 %v6150_v11 }
  0x77   :  { %5164 = vmatmul.mubr.msk.bf16.gmra.mrb[16].mxu0 %vm213_vm1, %v123_v34  ;;  %1676 = vmatprep.subr.bf16.mxu1 %v6158_v13 }
  0x78   :  { %5173 = vmatmul.mubr.msk.bf16.gmra.mrb[16].mxu1 %vm213_vm1, %v123_v34  ;;  %339 = vmatprep.mubr.bf16.mxu0 %v8266_v1 }
  0x79   :  { %452 = vmatprep.mubr.bf16.mxu1 %v8266_v1 }
  0x7a   :  { %1677 = vmatpush1.bf16.msra.mxu1 %v6156_v15 }
  0x7f   :  { %5165 = vmatmul.mubr.msk.bf16.gmra.mrb[20].mxu0 %vm213_vm1, %v124_v37 }
  0x80   :  { %5174 = vmatmul.mubr.msk.bf16.gmra.mrb[20].mxu1 %vm213_vm1, %v124_v37  ;;  %349 = vmatprep.mubr.bf16.mxu0 %v8266_v1 }
  0x81   :  { %462 = vmatprep.mubr.bf16.mxu1 %v8266_v1 }
  0x87   :  { %5166 = vmatmul.mubr.msk.bf16.gmra.mrb[24].mxu0 %vm213_vm1, %v125_v40 }
  0x88   :  { %5175 = vmatmul.mubr.msk.bf16.gmra.mrb[24].mxu1 %vm213_vm1, %v125_v40  ;;  %359 = vmatprep.mubr.bf16.mxu0 %v8266_v1 }
  0x89   :  { %472 = vmatprep.mubr.bf16.mxu1 %v8266_v1 }
  0x8f   :  { %5167 = vmatmul.mubr.msk.bf16.gmra.mrb[28].mxu0 %vm213_vm1, %v6991_v43 }
  0x90   :  { %5176 = vmatmul.mubr.msk.bf16.gmra.mrb[28].mxu1 %vm213_vm1, %v6991_v43  ;;  %515 = vmatprep.mubr.bf16.mxu0 %v8266_v1 }
  0x97   :  { %5178 = vmatmul.mubr.msk.bf16.vlgmr.msra.gmra.mrb[32].mxu0 %vm213_vm1, %v6915_v17  ;;  %v6164_v17 = vld [vmem:[#allocation6 + $0x1b4] ss:$24 sps:$4 sm:$0xff]  }
  0x98   :  { %525 = vmatprep.mubr.bf16.mxu0 %v8266_v1  ;;  %1887 = vmatpush1.bf16.msra.mxu0 %v6111_v47  ;;  %v138_v47 = vlaneseq }
  0x99   :  { %1888 = vmatprep.subr.bf16.mxu0 %v6119_v49  ;;  %1678 = vmatprep.subr.bf16.mxu1 %v6164_v17 }
  0x9a   :  { %1679 = vmatpush1.bf16.msra.mxu1 %v6162_v19  ;;  %v7015_v48 = vshrl.u32 %v138_v47, 7 }
  0x9b   :  { %1680 = vmatprep.subr.bf16.mxu1 %v6170_v21 }
  0x9c   :  { %1889 = vmatpush1.bf16.msra.mxu0 %v6117_v51  ;;  %v7018_v49 = vsub.s32 0, %v7015_v48  ;;  %v7026_v51 = vsub.s32 3, %v7015_v48 }
  0x9d   :  { %1890 = vmatprep.subr.bf16.mxu0 %v6125_v53 }
  0x9e   :  { %1681 = vmatpush1.bf16.msra.mxu1 %v6168_v23  ;;  %8284 = vst [vmem:[#allocation16_spill] sm:$0xff] %v7018_v49  ;;  %8285 = vst [vmem:[#allocation17_spill] sm:$0xff] %v7026_v51  ;;  %v7030_v52 = vrot.slane %v7023_v50, %v7018_v49  ;;  %v7034_v53 = vrot.slane %v7023_v50, %v7026_v51 }
  0x9f   :  { %5179 = vmatmul.mubr.msk.bf16.gmra.mrb[36].mxu0 %vm213_vm1, %v120_v25  ;;  %v6176_v25 = vld [vmem:[#allocation6 + $0x214] ss:$24 sps:$4 sm:$0xff]  }
  0xa0   :  { %535 = vmatprep.mubr.bf16.mxu0 %v8266_v1  ;;  %1891 = vmatpush1.bf16.msra.mxu0 %v6123_v55 }
  0xa1   :  { %1892 = vmatprep.subr.bf16.mxu0 %v6131_v57  ;;  %1682 = vmatprep.subr.bf16.mxu1 %v6176_v25 }
  0xa2   :  { %1683 = vmatpush1.bf16.msra.mxu1 %v6174_v27 }
  0xa3   :  { %1684 = vmatprep.subr.bf16.mxu1 %v6182_v29 }
  0xa4   :  { %1893 = vmatpush1.bf16.msra.mxu0 %v6129_v59 }
  0xa5   :  { %1894 = vmatprep.subr.bf16.mxu0 %v6137_v61 }
  0xa7   :  { %5180 = vmatmul.mubr.msk.bf16.gmra.mrb[40].mxu0 %vm213_vm1, %v121_v28  ;;  %v6177_v28 = vld [vmem:[#allocation6 + $0x218] ss:$24 sps:$4 sm:$0xff]  }
  0xa8   :  { %545 = vmatprep.mubr.bf16.mxu0 %v8266_v1  ;;  %1895 = vmatpush1.bf16.msra.mxu0 %v6135_v63 }
  0xa9   :  { %1896 = vmatprep.subr.bf16.mxu0 %v6143_v2 }
  0xac   :  { %1897 = vmatpush1.bf16.msra.mxu0 %v6141_v4 }
  0xad   :  { %1898 = vmatprep.subr.bf16.mxu0 %v6149_v6 }
  0xaf   :  { %5181 = vmatmul.mubr.msk.bf16.gmra.mrb[44].mxu0 %vm213_vm1, %v122_v31  ;;  %v6180_v31 = vld [vmem:[#allocation6 + $0x240] ss:$24 sps:$4 sm:$0xff]  }
  0xb0   :  { %555 = vmatprep.mubr.bf16.mxu0 %v8266_v1  ;;  %1899 = vmatpush1.bf16.msra.mxu0 %v6147_v8 }
  0xb1   :  { %1900 = vmatprep.subr.bf16.mxu0 %v6155_v10  ;;  %1685 = vmatpush1.bf16.msra.mxu1 %v6180_v31 }
  0xb2   :  { %1686 = vmatprep.subr.bf16.mxu1 %v6188_v33 }
  0xb4   :  { %1901 = vmatpush1.bf16.msra.mxu0 %v6153_v12 }
  0xb5   :  { %1902 = vmatprep.subr.bf16.mxu0 %v6161_v14  ;;  %1687 = vmatpush1.bf16.msra.mxu1 %v6186_v35 }
  0xb7   :  { %5182 = vmatmul.mubr.msk.bf16.gmra.mrb[48].mxu0 %vm213_vm1, %v123_v34  ;;  %v6191_v34 = vld [vmem:[#allocation6 + $0x27c] ss:$24 sps:$4 sm:$0xff]  }
  0xb8   :  { %565 = vmatprep.mubr.bf16.mxu0 %v8266_v1  ;;  %1903 = vmatpush1.bf16.msra.mxu0 %v6159_v16 }
  0xb9   :  { %1904 = vmatprep.subr.bf16.mxu0 %v6167_v18 }
  0xbc   :  { %1905 = vmatpush1.bf16.msra.mxu0 %v6165_v20 }
  0xbd   :  { %1906 = vmatprep.subr.bf16.mxu0 %v6173_v22 }
  0xbf   :  { %5183 = vmatmul.mubr.msk.bf16.gmra.mrb[52].mxu0 %vm213_vm1, %v124_v37  ;;  %v6194_v37 = vld [vmem:[#allocation6 + $0x2a4] ss:$24 sps:$4 sm:$0xff]  }
  0xc0   :  { %575 = vmatprep.mubr.bf16.mxu0 %v8266_v1  ;;  %1907 = vmatpush1.bf16.msra.mxu0 %v6171_v24 }
  0xc1   :  { %1908 = vmatprep.subr.bf16.mxu0 %v6179_v26  ;;  %1688 = vmatprep.subr.bf16.mxu1 %v6194_v37 }
  0xc2   :  { %1689 = vmatpush1.bf16.msra.mxu1 %v6192_v39 }
  0xc3   :  { %1690 = vmatprep.subr.bf16.mxu1 %v6200_v41 }
  0xc4   :  { %1909 = vmatpush1.bf16.msra.mxu0 %v6177_v28 }
  0xc5   :  { %1910 = vmatprep.subr.bf16.mxu0 %v6185_v30 }
  0xc7   :  { %5184 = vmatmul.mubr.msk.bf16.gmra.mrb[56].mxu0 %vm213_vm1, %v125_v40  ;;  %v6195_v40 = vld [vmem:[#allocation6 + $0x2a8] ss:$24 sps:$4 sm:$0xff]  }
  0xc8   :  { %585 = vmatprep.mubr.bf16.mxu0 %v8266_v1  ;;  %1911 = vmatpush1.bf16.msra.mxu0 %v6183_v32 }
  0xc9   :  { %1912 = vmatprep.subr.bf16.mxu0 %v6191_v34 }
  0xcc   :  { %1913 = vmatpush1.bf16.msra.mxu0 %v6189_v36 }
  0xcd   :  { %1914 = vmatprep.subr.bf16.mxu0 %v6197_v38 }
  0xcf   :  { %5185 = vmatmul.mubr.msk.bf16.gmra.mrb[60].mxu0 %vm213_vm1, %v6991_v43  ;;  %v6198_v43 = vld [vmem:[#allocation6 + $0x2d0] ss:$24 sps:$4 sm:$0xff]  }
  0xd0   :  { %1915 = vmatpush1.bf16.msra.mxu0 %v6195_v40  ;;  %1691 = vmatpush1.bf16.msra.mxu1 %v6198_v43 }
  0xd1   :  { %1916 = vmatprep.subr.bf16.mxu0 %v6203_v42  ;;  %1773 = vmatprep.subr.bf16.mxu1 %v6206_v45 }
  0xd4   :  { %1917 = vmatpush1.bf16.msra.mxu0 %v6201_v44 }
  0xd5   :  { %1999 = vmatprep.subr.bf16.mxu0 %v6221_v46 }
 0x12a   :  { %v291_v54 = vpop.f32.mrb[0].mxu0 }
 0x12b   :  { %v7036_v55 = vpop.f32.mrb[0].mxu1  ;;  %v292_v56 = vadd.f32 %v291_v54, %v7030_v52  ;;  %v7039_v57 = vpop.f32.mrb[1].mxu0 }
 0x12c   :  { %v406_v58 = vpop.f32.mrb[1].mxu1  ;;  %v295_v60 = vpop.f32.mrb[2].mxu0 }
 0x12d   :  { %v407_v59 = vadd.f32 %v406_v58, %v7034_v53  ;;  %v7042_v61 = vpop.f32.mrb[2].mxu1  ;;  %v596_v62 = vmax.f32 %v292_v56, 0.0  ;;  %v296_v63 = vadd.f32 %v295_v60, %v7030_v52  ;;  %v7045_v0 = vpop.f32.mrb[3].mxu0 }
 0x12e   :  { %v410_v2 = vpop.f32.mrb[3].mxu1 }
 0x12f   :  { %v599_v3 = vmax.f32 %v407_v59, 0.0  ;;  %v411_v4 = vadd.f32 %v410_v2, %v7034_v53  ;;  %v602_v5 = vmax.f32 %v296_v63, 0.0 }
 0x131   :  { %v692_v6 = vmax.f32 %v596_v62, %v599_v3  ;;  %v605_v7 = vmax.f32 %v411_v4, 0.0 }
 0x132   :  { %v301_v9 = vpop.f32.mrb[4].mxu0 }
 0x133   :  { %v695_v8 = vmax.f32 %v602_v5, %v605_v7  ;;  %v7048_v10 = vpop.f32.mrb[4].mxu1  ;;  %v302_v11 = vadd.f32 %v301_v9, %v7030_v52  ;;  %v7051_v12 = vpop.f32.mrb[5].mxu0 }
 0x134   :  { %v416_v13 = vpop.f32.mrb[5].mxu1  ;;  %v305_v16 = vpop.f32.mrb[6].mxu0 }
 0x135   :  { %v7053_v14 = vpack.c.bf16 %v695_v8, %v692_v6  ;;  %v417_v15 = vadd.f32 %v416_v13, %v7034_v53  ;;  %v7056_v17 = vpop.f32.mrb[6].mxu1  ;;  %v608_v18 = vmax.f32 %v302_v11, 0.0  ;;  %v306_v19 = vadd.f32 %v305_v16, %v7030_v52  ;;  %v7059_v20 = vpop.f32.mrb[7].mxu0 }
 0x136   :  { %v420_v21 = vpop.f32.mrb[7].mxu1 }
 0x137   :  { %v611_v22 = vmax.f32 %v417_v15, 0.0  ;;  %v421_v23 = vadd.f32 %v420_v21, %v7034_v53  ;;  %v614_v24 = vmax.f32 %v306_v19, 0.0 }
 0x139   :  { %v698_v25 = vmax.f32 %v608_v18, %v611_v22  ;;  %v617_v26 = vmax.f32 %v421_v23, 0.0 }
 0x13a   :  { %v311_v28 = vpop.f32.mrb[8].mxu0 }
 0x13b   :  { %v701_v27 = vmax.f32 %v614_v24, %v617_v26  ;;  %v7062_v29 = vpop.f32.mrb[8].mxu1  ;;  %v312_v30 = vadd.f32 %v311_v28, %v7030_v52  ;;  %v7065_v31 = vpop.f32.mrb[9].mxu0 }
 0x13c   :  { %v426_v32 = vpop.f32.mrb[9].mxu1  ;;  %v315_v34 = vpop.f32.mrb[10].mxu0 }
 0x13d   :  { %v427_v33 = vadd.f32 %v426_v32, %v7034_v53  ;;  %v7068_v35 = vpop.f32.mrb[10].mxu1  ;;  %v7070_v36 = vpack.c.bf16 %v701_v27, %v698_v25  ;;  %v620_v37 = vmax.f32 %v312_v30, 0.0  ;;  %v316_v38 = vadd.f32 %v315_v34, %v7030_v52  ;;  %v7073_v39 = vpop.f32.mrb[11].mxu0 }
 0x13e   :  { %v430_v40 = vpop.f32.mrb[11].mxu1 }
 0x13f   :  { %v623_v41 = vmax.f32 %v427_v33, 0.0  ;;  %v431_v42 = vadd.f32 %v430_v40, %v7034_v53  ;;  %v626_v43 = vmax.f32 %v316_v38, 0.0 }
 0x141   :  { %v704_v44 = vmax.f32 %v620_v37, %v623_v41  ;;  %v629_v45 = vmax.f32 %v431_v42, 0.0 }
 0x142   :  { %v321_v47 = vpop.f32.mrb[12].mxu0 }
 0x143   :  { %v707_v46 = vmax.f32 %v626_v43, %v629_v45  ;;  %v7076_v54 = vpop.f32.mrb[12].mxu1  ;;  %v322_v56 = vadd.f32 %v321_v47, %v7030_v52  ;;  %v7079_v58 = vpop.f32.mrb[13].mxu0 }
 0x144   :  { %v436_v59 = vpop.f32.mrb[13].mxu1  ;;  %v325_v62 = vpop.f32.mrb[14].mxu0 }
 0x145   :  { %v437_v60 = vadd.f32 %v436_v59, %v7034_v53  ;;  %v7082_v63 = vpop.f32.mrb[14].mxu1  ;;  %v7084_v2 = vpack.c.bf16 %v707_v46, %v704_v44  ;;  %v632_v3 = vmax.f32 %v322_v56, 0.0  ;;  %v326_v4 = vadd.f32 %v325_v62, %v7030_v52  ;;  %v7087_v5 = vpop.f32.mrb[15].mxu0 }
 0x146   :  { %v440_v6 = vpop.f32.mrb[15].mxu1 }
 0x147   :  { %v635_v7 = vmax.f32 %v437_v60, 0.0  ;;  %v441_v8 = vadd.f32 %v440_v6, %v7034_v53  ;;  %v638_v9 = vmax.f32 %v326_v4, 0.0 }
 0x149   :  { %v710_v11 = vmax.f32 %v632_v3, %v635_v7  ;;  %v641_v13 = vmax.f32 %v441_v8, 0.0 }
 0x14a   :  { %v331_v16 = vpop.f32.mrb[16].mxu0 }
 0x14b   :  { %v713_v15 = vmax.f32 %v638_v9, %v641_v13  ;;  %v7090_v18 = vpop.f32.mrb[16].mxu1  ;;  %v332_v19 = vadd.f32 %v331_v16, %v7030_v52  ;;  %v7093_v21 = vpop.f32.mrb[17].mxu0 }
 0x14c   :  { %v446_v22 = vpop.f32.mrb[17].mxu1  ;;  %v335_v24 = vpop.f32.mrb[18].mxu0 }
 0x14d   :  { %v447_v23 = vadd.f32 %v446_v22, %v7034_v53  ;;  %v7096_v25 = vpop.f32.mrb[18].mxu1  ;;  %v7098_v26 = vpack.c.bf16 %v713_v15, %v710_v11  ;;  %v644_v27 = vmax.f32 %v332_v19, 0.0  ;;  %v336_v28 = vadd.f32 %v335_v24, %v7030_v52  ;;  %v7101_v30 = vpop.f32.mrb[19].mxu0 }
 0x14e   :  { %v450_v32 = vpop.f32.mrb[19].mxu1 }
 0x14f   :  { %v647_v33 = vmax.f32 %v447_v23, 0.0  ;;  %v451_v34 = vadd.f32 %v450_v32, %v7034_v53  ;;  %v650_v37 = vmax.f32 %v336_v28, 0.0 }
 0x151   :  { %v716_v38 = vmax.f32 %v644_v27, %v647_v33  ;;  %v653_v40 = vmax.f32 %v451_v34, 0.0 }
 0x152   :  { %v341_v42 = vpop.f32.mrb[20].mxu0 }
 0x153   :  { %v719_v41 = vmax.f32 %v650_v37, %v653_v40  ;;  %v7104_v43 = vpop.f32.mrb[20].mxu1  ;;  %v342_v44 = vadd.f32 %v341_v42, %v7030_v52  ;;  %v7107_v45 = vpop.f32.mrb[21].mxu0 }
 0x154   :  { %v456_v46 = vpop.f32.mrb[21].mxu1  ;;  %v345_v56 = vpop.f32.mrb[22].mxu0 }
 0x155   :  { %v457_v47 = vadd.f32 %v456_v46, %v7034_v53  ;;  %v7110_v59 = vpop.f32.mrb[22].mxu1  ;;  %v7112_v60 = vpack.c.bf16 %v719_v41, %v716_v38  ;;  %v656_v62 = vmax.f32 %v342_v44, 0.0  ;;  %v346_v3 = vadd.f32 %v345_v56, %v7030_v52  ;;  %v7115_v4 = vpop.f32.mrb[23].mxu0 }
 0x156   :  { %v460_v6 = vpop.f32.mrb[23].mxu1  ;;  %v7133_v46 = vsub.s32 2, %v7015_v48 }
 0x157   :  { %v659_v7 = vmax.f32 %v457_v47, 0.0  ;;  %v461_v8 = vadd.f32 %v460_v6, %v7034_v53  ;;  %v662_v9 = vmax.f32 %v346_v3, 0.0 }
 0x158   :  { %8286 = vst [vmem:[#allocation18_spill] sm:$0xff] %v7133_v46 }
 0x159   :  { %v722_v11 = vmax.f32 %v656_v62, %v659_v7  ;;  %v665_v13 = vmax.f32 %v461_v8, 0.0  ;;  %v7136_v62 = vsub.s32 1, %v7015_v48 }
 0x15a   :  { %v351_v16 = vpop.f32.mrb[24].mxu0 }
 0x15b   :  { %v725_v15 = vmax.f32 %v662_v9, %v665_v13  ;;  %v7118_v19 = vpop.f32.mrb[24].mxu1  ;;  %v352_v22 = vadd.f32 %v351_v16, %v7030_v52  ;;  %v7121_v23 = vpop.f32.mrb[25].mxu0  ;;  %8287 = vst [vmem:[#allocation19_spill] sm:$0xff] %v7136_v62  ;;  %v7144_v13 = vsub.s32 4, %v7015_v48 }
 0x15c   :  { %v466_v24 = vpop.f32.mrb[25].mxu1  ;;  %v355_v28 = vpop.f32.mrb[26].mxu0 }
 0x15d   :  { %v467_v27 = vadd.f32 %v466_v24, %v7034_v53  ;;  %v7124_v32 = vpop.f32.mrb[26].mxu1  ;;  %v7126_v33 = vpack.c.bf16 %v725_v15, %v722_v11  ;;  %v668_v34 = vmax.f32 %v352_v22, 0.0  ;;  %v356_v37 = vadd.f32 %v355_v28, %v7030_v52  ;;  %v7129_v38 = vpop.f32.mrb[27].mxu0  ;;  %8288 = vst [vmem:[#allocation20_spill] sm:$0xff] %v7144_v13 }
 0x15e   :  { %v470_v40 = vpop.f32.mrb[27].mxu1  ;;  %v7148_v15 = vrot.slane %v7023_v50, %v7133_v46 }
 0x15f   :  { %v671_v41 = vmax.f32 %v467_v27, 0.0  ;;  %v471_v42 = vadd.f32 %v470_v40, %v7034_v53  ;;  %v674_v44 = vmax.f32 %v356_v37, 0.0  ;;  %v7154_v27 = vsub.s32 5, %v7015_v48 }
 0x160   :  { %v7168_v48 = vrot.slane %v7023_v50, %v7144_v13 }
 0x161   :  { %v728_v47 = vmax.f32 %v668_v34, %v671_v41  ;;  %v677_v56 = vmax.f32 %v471_v42, 0.0  ;;  %8289 = vst [vmem:[#allocation21_spill] sm:$0xff] %v7154_v27  ;;  %v7160_v34 = vrot.slane %v7023_v50, %v7136_v62 }
 0x162   :  { %v361_v6 = vpop.f32.mrb[28].mxu0 }
 0x163   :  { %v731_v3 = vmax.f32 %v674_v44, %v677_v56  ;;  %v7138_v7 = vpop.f32.mrb[28].mxu1  ;;  %v362_v8 = vadd.f32 %v361_v6, %v7030_v52  ;;  %v7141_v9 = vpop.f32.mrb[29].mxu0 }
 0x164   :  { %v476_v11 = vpop.f32.mrb[29].mxu1  ;;  %v365_v22 = vpop.f32.mrb[30].mxu0 }
 0x165   :  { %v477_v16 = vadd.f32 %v476_v11, %v7034_v53  ;;  %v7151_v24 = vpop.f32.mrb[30].mxu1  ;;  %v7156_v28 = vpack.c.bf16 %v731_v3, %v728_v47  ;;  %v680_v37 = vmax.f32 %v362_v8, 0.0  ;;  %v366_v40 = vadd.f32 %v365_v22, %v7030_v52  ;;  %v7163_v41 = vpop.f32.mrb[31].mxu0 }
 0x166   :  { %v480_v42 = vpop.f32.mrb[31].mxu1  ;;  %v405_v47 = vadd.f32 %v7036_v55, %v7148_v15  ;;  %v7174_v8 = vrot.slane %v7023_v50, %v7154_v27  ;;  %v294_v52 = vadd.f32 %v7039_v57, %v7160_v34  ;;  %v409_v55 = vadd.f32 %v7042_v61, %v7148_v15 }
 0x167   :  { %v683_v44 = vmax.f32 %v477_v16, 0.0  ;;  %v481_v56 = vadd.f32 %v480_v42, %v7034_v53  ;;  %v686_v6 = vmax.f32 %v366_v40, 0.0  ;;  %v298_v53 = vadd.f32 %v7045_v0, %v7160_v34 }
 0x168   :  { %v598_v1 = vmax.f32 %v405_v47, 0.0  ;;  %v604_v47 = vmax.f32 %v409_v55, 0.0  ;;  %v415_v61 = vadd.f32 %v7048_v10, %v7148_v15  ;;  %v6204_v55 = vld [vmem:[#allocation6 + $0x300] ss:$24 sps:$4 sm:$0xff]  }
 0x169   :  { %v734_v3 = vmax.f32 %v680_v37, %v683_v44  ;;  %v689_v11 = vmax.f32 %v481_v56, 0.0  ;;  %v597_v56 = vmax.f32 %v294_v52, 0.0  ;;  %v603_v13 = vmax.f32 %v298_v53, 0.0 }
 0x16a   :  { %v517_v22 = vpop.f32.mrb[32].mxu0 }
 0x16b   :  { %v737_v16 = vmax.f32 %v686_v6, %v689_v11  ;;  %v518_v40 = vadd.f32 %v517_v22, %v7168_v48  ;;  %v519_v42 = vpop.f32.mrb[33].mxu0 }
 0x16c   :  { %v520_v37 = vadd.f32 %v519_v42, %v7174_v8  ;;  %v521_v44 = vpop.f32.mrb[34].mxu0 }
 0x16d   :  { %v7184_v50 = vpack.c.bf16 %v737_v16, %v734_v3  ;;  %v600_v27 = vmax.f32 %v518_v40, 0.0  ;;  %v522_v57 = vadd.f32 %v521_v44, %v7168_v48  ;;  %v523_v6 = vpop.f32.mrb[35].mxu0  ;;  %v304_v3 = vadd.f32 %v7051_v12, %v7160_v34 }
 0x16e   :  { %v601_v11 = vmax.f32 %v520_v37, 0.0  ;;  %v524_v0 = vadd.f32 %v523_v6, %v7174_v8  ;;  %v308_v37 = vadd.f32 %v7059_v20, %v7160_v34  ;;  %v6224_v6 = vld [vmem:[#allocation6 + $0x33c] ss:$24 sps:$4 sm:$0xff]  }
 0x16f   :  { %v693_v22 = vmax.f32 %v597_v56, %v600_v27  ;;  %v606_v46 = vmax.f32 %v522_v57, 0.0  ;;  %v6219_v56 = vld [vmem:[#allocation6 + $0x308] ss:$24 sps:$4 sm:$0xff]   ;;  %v610_v57 = vmax.f32 %v415_v61, 0.0 }
 0x170   :  { %v694_v62 = vmax.f32 %v598_v1, %v601_v11  ;;  %v607_v42 = vmax.f32 %v524_v0, 0.0  ;;  %v419_v1 = vadd.f32 %v7056_v17, %v7148_v15  ;;  %v609_v11 = vmax.f32 %v304_v3, 0.0  ;;  %v6207_v3 = vld [vmem:[#allocation6 + $0x330] ss:$24 sps:$4 sm:$0xff]  }
 0x171   :  { %v696_v52 = vmax.f32 %v603_v13, %v606_v46  ;;  %v6209_v13 = vld [vmem:[#allocation6 + $0x334] ss:$24 sps:$4 sm:$0xff]   ;;  %v615_v17 = vmax.f32 %v308_v37, 0.0 }
 0x172   :  { %v697_v16 = vmax.f32 %v604_v47, %v607_v42  ;;  %v527_v40 = vpop.f32.mrb[36].mxu0 }
 0x173   :  { %v528_v44 = vadd.f32 %v527_v40, %v7168_v48  ;;  %v529_v53 = vpop.f32.mrb[37].mxu0  ;;  %v7195_v27 = vpack.c.bf16 %v696_v52, %v693_v22  ;;  %v6222_v52 = vld [vmem:[#allocation6 + $0x338] ss:$24 sps:$4 sm:$0xff]   ;;  %v425_v40 = vadd.f32 %v7062_v29, %v7148_v15 }
 0x174   :  { %v7199_v10 = vpack.c.bf16 %v697_v16, %v694_v62  ;;  %v530_v12 = vadd.f32 %v529_v53, %v7174_v8  ;;  %v531_v46 = vpop.f32.mrb[38].mxu0  ;;  %v616_v16 = vmax.f32 %v419_v1, 0.0  ;;  %v6210_v29 = vld [vmem:[#allocation6 + $0x360] ss:$24 sps:$4 sm:$0xff]  }
 0x175   :  { %v612_v20 = vmax.f32 %v528_v44, 0.0  ;;  %v532_v0 = vadd.f32 %v531_v46, %v7168_v48  ;;  %v533_v47 = vpop.f32.mrb[39].mxu0  ;;  %1692 = vmatprep.mubr.bf16.mxu1 %v7195_v27  ;;  %1918 = vmatprep.mubr.bf16.mxu0 %v7195_v27  ;;  %v6230_v46 = vld [vmem:[#allocation6 + $0x36c] ss:$24 sps:$4 sm:$0xff]  }
 0x176   :  { %v613_v22 = vmax.f32 %v530_v12, 0.0  ;;  %v534_v61 = vadd.f32 %v533_v47, %v7174_v8  ;;  %1693 = vmatmul.mubr.bf16.vlgmr.msra.gmra.mrb[32].mxu1 %v7053_v14  ;;  %1919 = vmatmul.mubr.bf16.vlgmr.msra.gmra.mrb[64].mxu0 %v7053_v14  ;;  %v6212_v12 = vld [vmem:[#allocation6 + $0x364] ss:$24 sps:$4 sm:$0xff]   ;;  %v314_v47 = vadd.f32 %v7065_v31, %v7160_v34 }
 0x177   :  { %v699_v62 = vmax.f32 %v609_v11, %v612_v20  ;;  %v618_v42 = vmax.f32 %v532_v0, 0.0  ;;  %1774 = vmatpush1.bf16.msra.mxu1 %v6204_v55  ;;  %2000 = vmatpush1.bf16.msra.mxu0 %v6219_v56  ;;  %v318_v55 = vadd.f32 %v7073_v39, %v7160_v34  ;;  %v6233_v39 = vld [vmem:[#allocation6 + $0x39c] ss:$24 sps:$4 sm:$0xff]  }
 0x178   :  { %v700_v44 = vmax.f32 %v610_v57, %v613_v22  ;;  %v619_v53 = vmax.f32 %v534_v61, 0.0  ;;  %1775 = vmatprep.subr.bf16.mxu1 %v6209_v13  ;;  %2001 = vmatprep.subr.bf16.mxu0 %v6224_v6  ;;  %v6228_v57 = vld [vmem:[#allocation6 + $0x368] ss:$24 sps:$4 sm:$0xff]   ;;  %v622_v13 = vmax.f32 %v425_v40, 0.0  ;;  %v429_v6 = vadd.f32 %v7068_v35, %v7148_v15  ;;  %v6215_v61 = vld [vmem:[#allocation6 + $0x394] ss:$24 sps:$4 sm:$0xff]  }
 0x179   :  { %v702_v37 = vmax.f32 %v615_v17, %v618_v42  ;;  %v621_v42 = vmax.f32 %v314_v47, 0.0  ;;  %v627_v40 = vmax.f32 %v318_v55, 0.0 }
 0x17a   :  { %v703_v11 = vmax.f32 %v616_v16, %v619_v53  ;;  %v537_v20 = vpop.f32.mrb[40].mxu0  ;;  %v628_v47 = vmax.f32 %v429_v6, 0.0 }
 0x17b   :  { %v538_v56 = vadd.f32 %v537_v20, %v7168_v48  ;;  %v539_v1 = vpop.f32.mrb[41].mxu0  ;;  %v7215_v0 = vpack.c.bf16 %v702_v37, %v699_v62  ;;  %1776 = vmatpush1.bf16.msra.mxu1 %v6207_v3  ;;  %2002 = vmatpush1.bf16.msra.mxu0 %v6222_v52  ;;  %v435_v37 = vadd.f32 %v7076_v54, %v7148_v15  ;;  %v6216_v54 = vld [vmem:[#allocation6 + $0x3c0] ss:$24 sps:$4 sm:$0xff]  }
 0x17c   :  { %v540_v31 = vadd.f32 %v539_v1, %v7174_v8  ;;  %v541_v22 = vpop.f32.mrb[42].mxu0  ;;  %1777 = vmatprep.subr.bf16.mxu1 %v6212_v12  ;;  %2003 = vmatprep.subr.bf16.mxu0 %v6230_v46  ;;  %v7220_v17 = vpack.c.bf16 %v703_v11, %v700_v44  ;;  %v6213_v12 = vld [vmem:[#allocation6 + $0x390] ss:$24 sps:$4 sm:$0xff]   ;;  %v6239_v1 = vld [vmem:[#allocation6 + $0x3cc] ss:$24 sps:$4 sm:$0xff]  }
 0x17d   :  { %v624_v62 = vmax.f32 %v538_v56, 0.0  ;;  %v542_v3 = vadd.f32 %v541_v22, %v7168_v48  ;;  %v543_v16 = vpop.f32.mrb[43].mxu0  ;;  %1702 = vmatprep.mubr.bf16.mxu1 %v7215_v0  ;;  %1928 = vmatprep.mubr.bf16.mxu0 %v7215_v0  ;;  %v6231_v46 = vld [vmem:[#allocation6 + $0x398] ss:$24 sps:$4 sm:$0xff]   ;;  %v6218_v56 = vld [vmem:[#allocation6 + $0x3c4] ss:$24 sps:$4 sm:$0xff]  }
 0x17e   :  { %v625_v52 = vmax.f32 %v540_v31, 0.0  ;;  %v544_v35 = vadd.f32 %v543_v16, %v7174_v8  ;;  %1703 = vmatmul.mubr.bf16.gmra.mrb[36].mxu1 %v7070_v36  ;;  %1929 = vmatmul.mubr.bf16.gmra.mrb[68].mxu0 %v7070_v36  ;;  %v324_v31 = vadd.f32 %v7079_v58, %v7160_v34  ;;  %v6227_v16 = vld [vmem:[#allocation6 + $0x3f4] ss:$24 sps:$4 sm:$0xff]  }
 0x17f   :  { %v705_v53 = vmax.f32 %v621_v42, %v624_v62  ;;  %v630_v44 = vmax.f32 %v542_v3, 0.0  ;;  %1778 = vmatpush1.bf16.msra.mxu1 %v6210_v29  ;;  %2004 = vmatpush1.bf16.msra.mxu0 %v6228_v57  ;;  %v328_v29 = vadd.f32 %v7087_v5, %v7160_v34  ;;  %v6242_v5 = vld [vmem:[#allocation6 + $0x3fc] ss:$24 sps:$4 sm:$0xff]  }
 0x180   :  { %v706_v11 = vmax.f32 %v622_v13, %v625_v52  ;;  %v631_v20 = vmax.f32 %v544_v35, 0.0  ;;  %1779 = vmatprep.subr.bf16.mxu1 %v6215_v61  ;;  %2005 = vmatprep.subr.bf16.mxu0 %v6233_v39  ;;  %v6237_v13 = vld [vmem:[#allocation6 + $0x3c8] ss:$24 sps:$4 sm:$0xff]   ;;  %v634_v61 = vmax.f32 %v435_v37, 0.0  ;;  %v439_v39 = vadd.f32 %v7082_v63, %v7148_v15 }
 0x181   :  { %v708_v55 = vmax.f32 %v627_v40, %v630_v44  ;;  %v633_v35 = vmax.f32 %v324_v31, 0.0 }
 0x182   :  { %v709_v22 = vmax.f32 %v628_v47, %v631_v20  ;;  %v547_v42 = vpop.f32.mrb[44].mxu0  ;;  %v6240_v20 = vld [vmem:[#allocation6 + $0x3f8] ss:$24 sps:$4 sm:$0xff]  }
 0x183   :  { %v548_v57 = vadd.f32 %v547_v42, %v7168_v48  ;;  %v549_v6 = vpop.f32.mrb[45].mxu0  ;;  %v7235_v62 = vpack.c.bf16 %v708_v55, %v705_v53  ;;  %1780 = vmatpush1.bf16.msra.mxu1 %v6213_v12  ;;  %2006 = vmatpush1.bf16.msra.mxu0 %v6231_v46  ;;  %v639_v46 = vmax.f32 %v328_v29, 0.0  ;;  %v6248_v42 = vld [vmem:[#allocation6 + $0x42c] ss:$24 sps:$4 sm:$0xff]  }
 0x184   :  { %v550_v58 = vadd.f32 %v549_v6, %v7174_v8  ;;  %v551_v3 = vpop.f32.mrb[46].mxu0  ;;  %1781 = vmatprep.subr.bf16.mxu1 %v6218_v56  ;;  %2007 = vmatprep.subr.bf16.mxu0 %v6239_v1  ;;  %v7240_v52 = vpack.c.bf16 %v709_v22, %v706_v11  ;;  %v6225_v11 = vld [vmem:[#allocation6 + $0x3f0] ss:$24 sps:$4 sm:$0xff]   ;;  %v640_v56 = vmax.f32 %v439_v39, 0.0  ;;  %v445_v1 = vadd.f32 %v7090_v18, %v7148_v15  ;;  %v6236_v22 = vld [vmem:[#allocation6 + $0x424] ss:$24 sps:$4 sm:$0xff]  }
 0x185   :  { %v636_v40 = vmax.f32 %v548_v57, 0.0  ;;  %v552_v53 = vadd.f32 %v551_v3, %v7168_v48  ;;  %v553_v44 = vpop.f32.mrb[47].mxu0  ;;  %1712 = vmatprep.mubr.bf16.mxu1 %v7235_v62  ;;  %1938 = vmatprep.mubr.bf16.mxu0 %v7235_v62  ;;  %v334_v57 = vadd.f32 %v7093_v21, %v7160_v34  ;;  %v6234_v18 = vld [vmem:[#allocation6 + $0x420] ss:$24 sps:$4 sm:$0xff]  }
 0x186   :  { %v637_v12 = vmax.f32 %v550_v58, 0.0  ;;  %v554_v63 = vadd.f32 %v553_v44, %v7174_v8  ;;  %1713 = vmatmul.mubr.bf16.gmra.mrb[40].mxu1 %v7084_v2  ;;  %1939 = vmatmul.mubr.bf16.gmra.mrb[72].mxu0 %v7084_v2 }
 0x187   :  { %v711_v47 = vmax.f32 %v633_v35, %v636_v40  ;;  %v642_v37 = vmax.f32 %v552_v53, 0.0  ;;  %1782 = vmatpush1.bf16.msra.mxu1 %v6216_v54  ;;  %2008 = vmatpush1.bf16.msra.mxu0 %v6237_v13  ;;  %v338_v54 = vadd.f32 %v7101_v30, %v7160_v34  ;;  %v6245_v40 = vld [vmem:[#allocation6 + $0x454] ss:$24 sps:$4 sm:$0xff]   ;;  %v645_v44 = vmax.f32 %v334_v57, 0.0 }
 0x188   :  { %v712_v31 = vmax.f32 %v634_v61, %v637_v12  ;;  %v643_v55 = vmax.f32 %v554_v63, 0.0  ;;  %1783 = vmatprep.subr.bf16.mxu1 %v6227_v16  ;;  %2009 = vmatprep.subr.bf16.mxu0 %v6242_v5  ;;  %v6246_v61 = vld [vmem:[#allocation6 + $0x428] ss:$24 sps:$4 sm:$0xff]   ;;  %v646_v16 = vmax.f32 %v445_v1, 0.0  ;;  %v449_v5 = vadd.f32 %v7096_v25, %v7148_v15  ;;  %v6251_v30 = vld [vmem:[#allocation6 + $0x45c] ss:$24 sps:$4 sm:$0xff]  }
 0x189   :  { %v714_v29 = vmax.f32 %v639_v46, %v642_v37  ;;  %v651_v37 = vmax.f32 %v338_v54, 0.0  ;;  %v6249_v1 = vld [vmem:[#allocation6 + $0x458] ss:$24 sps:$4 sm:$0xff]   ;;  %v6254_v57 = vld [vmem:[#allocation6 + $0x14] ss:$24 sps:$4 sm:$0xff]  }
 0x18a   :  { %v715_v6 = vmax.f32 %v640_v56, %v643_v55  ;;  %v557_v58 = vpop.f32.mrb[48].mxu0  ;;  %v6243_v56 = vld [vmem:[#allocation6 + $0x450] ss:$24 sps:$4 sm:$0xff]   ;;  %v455_v55 = vadd.f32 %v7104_v43, %v7148_v15 }
 0x18b   :  { %v558_v13 = vadd.f32 %v557_v58, %v7168_v48  ;;  %v559_v39 = vpop.f32.mrb[49].mxu0  ;;  %v7255_v3 = vpack.c.bf16 %v714_v29, %v711_v47  ;;  %1784 = vmatpush1.bf16.msra.mxu1 %v6225_v11  ;;  %2010 = vmatpush1.bf16.msra.mxu0 %v6240_v20  ;;  %v344_v29 = vadd.f32 %v7107_v45, %v7160_v34 }
 0x18c   :  { %v560_v21 = vadd.f32 %v559_v39, %v7174_v8  ;;  %v561_v35 = vpop.f32.mrb[50].mxu0  ;;  %1785 = vmatprep.subr.bf16.mxu1 %v6236_v22  ;;  %2011 = vmatprep.subr.bf16.mxu0 %v6248_v42  ;;  %v7260_v53 = vpack.c.bf16 %v715_v6, %v712_v31  ;;  %v652_v31 = vmax.f32 %v449_v5, 0.0  ;;  %v658_v43 = vmax.f32 %v455_v55, 0.0 }
 0x18d   :  { %v648_v12 = vmax.f32 %v558_v13, 0.0  ;;  %v562_v63 = vadd.f32 %v561_v35, %v7168_v48  ;;  %v563_v46 = vpop.f32.mrb[51].mxu0  ;;  %1722 = vmatprep.mubr.bf16.mxu1 %v7255_v3  ;;  %1948 = vmatprep.mubr.bf16.mxu0 %v7255_v3  ;;  %v348_v13 = vadd.f32 %v7115_v4, %v7160_v34  ;;  %v657_v35 = vmax.f32 %v344_v29, 0.0 }
 0x18e   :  { %v649_v47 = vmax.f32 %v560_v21, 0.0  ;;  %v564_v25 = vadd.f32 %v563_v46, %v7174_v8  ;;  %1723 = vmatmul.mubr.bf16.gmra.mrb[44].mxu1 %v7098_v26  ;;  %1949 = vmatmul.mubr.bf16.gmra.mrb[76].mxu0 %v7098_v26  ;;  %v358_v55 = vadd.f32 %v7129_v38, %v7160_v34 }
 0x18f   :  { %v717_v11 = vmax.f32 %v645_v44, %v648_v12  ;;  %v654_v20 = vmax.f32 %v562_v63, 0.0  ;;  %1786 = vmatpush1.bf16.msra.mxu1 %v6234_v18  ;;  %2012 = vmatpush1.bf16.msra.mxu0 %v6246_v61 }
 0x190   :  { %v718_v22 = vmax.f32 %v646_v16, %v649_v47  ;;  %v655_v42 = vmax.f32 %v564_v25, 0.0  ;;  %1787 = vmatprep.subr.bf16.mxu1 %v6245_v40  ;;  %2013 = vmatprep.subr.bf16.mxu0 %v6251_v30  ;;  %v459_v16 = vadd.f32 %v7110_v59, %v7148_v15  ;;  %v663_v59 = vmax.f32 %v348_v13, 0.0 }
 0x191   :  { %v720_v6 = vmax.f32 %v651_v37, %v654_v20  ;;  %v465_v25 = vadd.f32 %v7118_v19, %v7148_v15  ;;  %v354_v20 = vadd.f32 %v7121_v23, %v7160_v34  ;;  %v469_v19 = vadd.f32 %v7124_v32, %v7148_v15 }
 0x192   :  { %v721_v58 = vmax.f32 %v652_v31, %v655_v42  ;;  %v567_v54 = vpop.f32.mrb[52].mxu0  ;;  %v664_v47 = vmax.f32 %v459_v16, 0.0  ;;  %v675_v32 = vmax.f32 %v358_v55, 0.0 }
 0x193   :  { %v568_v39 = vadd.f32 %v567_v54, %v7168_v48  ;;  %v569_v18 = vpop.f32.mrb[53].mxu0  ;;  %v7275_v61 = vpack.c.bf16 %v720_v6, %v717_v11  ;;  %1788 = vmatpush1.bf16.msra.mxu1 %v6243_v56  ;;  %2014 = vmatpush1.bf16.msra.mxu0 %v6249_v1  ;;  %v670_v29 = vmax.f32 %v465_v25, 0.0  ;;  %v669_v23 = vmax.f32 %v354_v20, 0.0 }
 0x194   :  { %v570_v5 = vadd.f32 %v569_v18, %v7174_v8  ;;  %v571_v45 = vpop.f32.mrb[54].mxu0  ;;  %2112 = vmatprep.subr.bf16.mxu1 %v6254_v57  ;;  %v7280_v21 = vpack.c.bf16 %v721_v58, %v718_v22 }
 0x195   :  { %v660_v40 = vmax.f32 %v568_v39, 0.0  ;;  %v572_v4 = vadd.f32 %v571_v45, %v7168_v48  ;;  %v573_v30 = vpop.f32.mrb[55].mxu0  ;;  %1732 = vmatprep.mubr.bf16.mxu1 %v7275_v61  ;;  %1958 = vmatprep.mubr.bf16.mxu0 %v7275_v61  ;;  %v676_v45 = vmax.f32 %v469_v19, 0.0 }
 0x196   :  { %v661_v44 = vmax.f32 %v570_v5, 0.0  ;;  %v574_v12 = vadd.f32 %v573_v30, %v7174_v8  ;;  %1733 = vmatmul.mubr.bf16.gmra.mrb[48].mxu1 %v7112_v60  ;;  %1959 = vmatmul.mubr.bf16.gmra.mrb[80].mxu0 %v7112_v60  ;;  %v364_v30 = vadd.f32 %v7141_v9, %v7160_v34 }
 0x197   :  { %v723_v63 = vmax.f32 %v657_v35, %v660_v40  ;;  %v666_v46 = vmax.f32 %v572_v4, 0.0  ;;  %v475_v35 = vadd.f32 %v7138_v7, %v7148_v15  ;;  %v479_v7 = vadd.f32 %v7151_v24, %v7148_v15 }
 0x198   :  { %v724_v37 = vmax.f32 %v658_v43, %v661_v44  ;;  %v667_v11 = vmax.f32 %v574_v12, 0.0  ;;  %v681_v9 = vmax.f32 %v364_v30, 0.0  ;;  %v6270_v30 = vld [vmem:[#allocation6 + $0x130] ss:$24 sps:$4 sm:$0xff]  }
 0x199   :  { %v726_v56 = vmax.f32 %v663_v59, %v666_v46 }
 0x19a   :  { %v727_v1 = vmax.f32 %v664_v47, %v667_v11  ;;  %v577_v31 = vpop.f32.mrb[56].mxu0 }
 0x19b   :  { %v578_v22 = vadd.f32 %v577_v31, %v7168_v48  ;;  %v579_v42 = vpop.f32.mrb[57].mxu0  ;;  %v7295_v57 = vpack.c.bf16 %v726_v56, %v723_v63  ;;  %v368_v63 = vadd.f32 %v7163_v41, %v7160_v34 }
 0x19c   :  { %v580_v6 = vadd.f32 %v579_v42, %v7174_v8  ;;  %v581_v58 = vpop.f32.mrb[58].mxu0  ;;  %v7300_v54 = vpack.c.bf16 %v727_v1, %v724_v37  ;;  %v682_v37 = vmax.f32 %v475_v35, 0.0  ;;  %v688_v42 = vmax.f32 %v479_v7, 0.0  ;;  %v6269_v35 = vld [vmem:[#allocation6 + $0x104] ss:$24 sps:$4 sm:$0xff]  }
 0x19d   :  { %v672_v13 = vmax.f32 %v578_v22, 0.0  ;;  %v582_v39 = vadd.f32 %v581_v58, %v7168_v48  ;;  %v583_v18 = vpop.f32.mrb[59].mxu0  ;;  %1742 = vmatprep.mubr.bf16.mxu1 %v7295_v57  ;;  %1968 = vmatprep.mubr.bf16.mxu0 %v7295_v57  ;;  %v687_v15 = vmax.f32 %v368_v63, 0.0  ;;  %v6276_v63 = vld [vmem:[#allocation6 + $0x190] ss:$24 sps:$4 sm:$0xff]  }
 0x19e   :  { %v673_v38 = vmax.f32 %v580_v6, 0.0  ;;  %v584_v43 = vadd.f32 %v583_v18, %v7174_v8  ;;  %1743 = vmatmul.mubr.bf16.gmra.mrb[52].mxu1 %v7126_v33  ;;  %1969 = vmatmul.mubr.bf16.gmra.mrb[84].mxu0 %v7126_v33  ;;  %v6255_v18 = vld [vmem:[#allocation6 + $0x40] ss:$24 sps:$4 sm:$0xff]   ;;  %v6282_v7 = vld [vmem:[#allocation6 + $0x1f0] ss:$24 sps:$4 sm:$0xff]  }
 0x19f   :  { %v729_v16 = vmax.f32 %v669_v23, %v672_v13  ;;  %v678_v5 = vmax.f32 %v582_v39, 0.0  ;;  %v6252_v13 = vld [vmem:[#allocation6 + $0x10] ss:$24 sps:$4 sm:$0xff]   ;;  %v6257_v39 = vld [vmem:[#allocation6 + $0x44] ss:$24 sps:$4 sm:$0xff]  }
 0x1a0   :  { %v730_v40 = vmax.f32 %v670_v29, %v673_v38  ;;  %v679_v4 = vmax.f32 %v584_v43, 0.0  ;;  %v6260_v38 = vld [vmem:[#allocation6 + $0x74] ss:$24 sps:$4 sm:$0xff]   ;;  %v6258_v43 = vld [vmem:[#allocation6 + $0x70] ss:$24 sps:$4 sm:$0xff]  }
 0x1a1   :  { %v732_v44 = vmax.f32 %v675_v32, %v678_v5  ;;  %v6263_v32 = vld [vmem:[#allocation6 + $0xa4] ss:$24 sps:$4 sm:$0xff]   ;;  %v6266_v5 = vld [vmem:[#allocation6 + $0xd4] ss:$24 sps:$4 sm:$0xff]  }
 0x1a2   :  { %v733_v12 = vmax.f32 %v676_v45, %v679_v4  ;;  %v587_v59 = vpop.f32.mrb[60].mxu0  ;;  %v6264_v45 = vld [vmem:[#allocation6 + $0xd0] ss:$24 sps:$4 sm:$0xff]   ;;  %v6272_v4 = vld [vmem:[#allocation6 + $0x134] ss:$24 sps:$4 sm:$0xff]  }
 0x1a3   :  { %v588_v46 = vadd.f32 %v587_v59, %v7168_v48  ;;  %v589_v47 = vpop.f32.mrb[61].mxu0  ;;  %v7315_v25 = vpack.c.bf16 %v732_v44, %v729_v16  ;;  %v6261_v16 = vld [vmem:[#allocation6 + $0xa0] ss:$24 sps:$4 sm:$0xff]   ;;  %v6275_v44 = vld [vmem:[#allocation6 + $0x164] ss:$24 sps:$4 sm:$0xff]  }
 0x1a4   :  { %v590_v11 = vadd.f32 %v589_v47, %v7174_v8  ;;  %v591_v20 = vpop.f32.mrb[62].mxu0  ;;  %v7320_v56 = vpack.c.bf16 %v733_v12, %v730_v40  ;;  %v6267_v40 = vld [vmem:[#allocation6 + $0x100] ss:$24 sps:$4 sm:$0xff]   ;;  %v6278_v59 = vld [vmem:[#allocation6 + $0x194] ss:$24 sps:$4 sm:$0xff]  }
 0x1a5   :  { %v684_v1 = vmax.f32 %v588_v46, 0.0  ;;  %v592_v31 = vadd.f32 %v591_v20, %v7168_v48  ;;  %v593_v55 = vpop.f32.mrb[63].mxu0  ;;  %1752 = vmatprep.mubr.bf16.mxu1 %v7315_v25  ;;  %1978 = vmatprep.mubr.bf16.mxu0 %v7315_v25  ;;  %v6273_v12 = vld [vmem:[#allocation6 + $0x160] ss:$24 sps:$4 sm:$0xff]   ;;  %v6281_v46 = vld [vmem:[#allocation6 + $0x1c4] ss:$24 sps:$4 sm:$0xff]  }
 0x1a6   :  { %v685_v34 = vmax.f32 %v590_v11, 0.0  ;;  %v594_v41 = vadd.f32 %v593_v55, %v7174_v8  ;;  %1753 = vmatmul.mubr.bf16.gmra.mrb[56].mxu1 %v7156_v28  ;;  %1979 = vmatmul.mubr.bf16.gmra.mrb[88].mxu0 %v7156_v28  ;;  %v8290_v8 = vmov 0   ;;  %v6279_v47 = vld [vmem:[#allocation6 + $0x1c0] ss:$24 sps:$4 sm:$0xff]   ;;  %v6287_v11 = vld [vmem:[#allocation6 + $0x224] ss:$24 sps:$4 sm:$0xff]  }
 0x1a7   :  { %v735_v24 = vmax.f32 %v681_v9, %v684_v1  ;;  %v690_v22 = vmax.f32 %v592_v31, 0.0  ;;  %v6285_v20 = vld [vmem:[#allocation6 + $0x220] ss:$24 sps:$4 sm:$0xff]   ;;  %v6290_v9 = vld [vmem:[#allocation6 + $0x254] ss:$24 sps:$4 sm:$0xff]  }
 0x1a8   :  { %v736_v29 = vmax.f32 %v682_v37, %v685_v34  ;;  %v691_v19 = vmax.f32 %v594_v41, 0.0  ;;  %v6284_v37 = vld [vmem:[#allocation6 + $0x1f4] ss:$24 sps:$4 sm:$0xff]   ;;  %v6288_v1 = vld [vmem:[#allocation6 + $0x250] ss:$24 sps:$4 sm:$0xff]  }
 0x1a9   :  { %v738_v6 = vmax.f32 %v687_v15, %v690_v22  ;;  %v6293_v31 = vld [vmem:[#allocation6 + $0x284] ss:$24 sps:$4 sm:$0xff]   ;;  %v6291_v55 = vld [vmem:[#allocation6 + $0x280] ss:$24 sps:$4 sm:$0xff]   ;;  %v6296_v34 = vld [vmem:[#allocation6 + $0x2b4] ss:$24 sps:$4 sm:$0xff]  }
 0x1aa   :  { %v739_v48 = vmax.f32 %v688_v42, %v691_v19  ;;  %v6294_v41 = vld [vmem:[#allocation6 + $0x2b0] ss:$24 sps:$4 sm:$0xff]   ;;  %v6299_v15 = vld [vmem:[#allocation6 + $0x2e4] ss:$24 sps:$4 sm:$0xff]   ;;  %v6302_v22 = vld [vmem:[#allocation6 + $0x314] ss:$24 sps:$4 sm:$0xff]  }
 0x1ab   :  { %v7328_v58 = vpack.c.bf16 %v738_v6, %v735_v24  ;;  %v6297_v24 = vld [vmem:[#allocation6 + $0x2e0] ss:$24 sps:$4 sm:$0xff]   ;;  %v6300_v42 = vld [vmem:[#allocation6 + $0x310] ss:$24 sps:$4 sm:$0xff]   ;;  %v6308_v6 = vld [vmem:[#allocation6 + $0x374] ss:$24 sps:$4 sm:$0xff]  }
 0x1ac   :  { %v7330_v23 = vpack.c.bf16 %v739_v48, %v736_v29  ;;  %v6305_v29 = vld [vmem:[#allocation6 + $0x344] ss:$24 sps:$4 sm:$0xff]   ;;  %v6303_v19 = vld [vmem:[#allocation6 + $0x340] ss:$24 sps:$4 sm:$0xff]   ;;  %v6306_v48 = vld [vmem:[#allocation6 + $0x370] ss:$24 sps:$4 sm:$0xff]  }
 0x1ad   :  { %1762 = vmatprep.mubr.bf16.mxu1 %v7328_v58  ;;  %1988 = vmatprep.mubr.bf16.mxu0 %v7328_v58 }
 0x1ae   :  { %1763 = vmatmul.mubr.bf16.gmra.mrb[60].mxu1 %v7184_v50  ;;  %1989 = vmatmul.mubr.bf16.gmra.mrb[92].mxu0 %v7184_v50 }
 0x1af   :  { %1805 = vmatprep.mubr.bf16.mxu1 %v8290_v8  ;;  %2031 = vmatprep.mubr.bf16.mxu0 %v8290_v8 }
 0x1b6   :  { %1806 = vmatmul.mubr.bf16.vlgmr.msra.gmra.mrb[32].mxu1 %v7199_v10  ;;  %2032 = vmatmul.mubr.bf16.vlgmr.msra.gmra.mrb[64].mxu0 %v7199_v10 }
 0x1b7   :  { %2113 = vmatpush1.bf16.msra.mxu1 %v6252_v13  ;;  %1815 = vmatprep.mubr.bf16.mxu1 %v8290_v8  ;;  %v6311_v13 = vld [vmem:[#allocation6 + $0x3a4] ss:$24 sps:$4 sm:$0xff]  }
 0x1b8   :  { %2114 = vmatprep.subr.bf16.mxu1 %v6257_v39  ;;  %2041 = vmatprep.mubr.bf16.mxu0 %v8290_v8  ;;  %v6314_v39 = vld [vmem:[#allocation6 + $0x3d4] ss:$24 sps:$4 sm:$0xff]  }
 0x1bb   :  { %2115 = vmatpush1.bf16.msra.mxu1 %v6255_v18  ;;  %v6315_v18 = vld [vmem:[#allocation6 + $0x400] ss:$24 sps:$4 sm:$0xff]  }
 0x1bc   :  { %2116 = vmatprep.subr.bf16.mxu1 %v6260_v38  ;;  %v6320_v38 = vld [vmem:[#allocation6 + $0x434] ss:$24 sps:$4 sm:$0xff]  }
 0x1be   :  { %1816 = vmatmul.mubr.bf16.gmra.mrb[36].mxu1 %v7220_v17  ;;  %2042 = vmatmul.mubr.bf16.gmra.mrb[68].mxu0 %v7220_v17 }
 0x1bf   :  { %2117 = vmatpush1.bf16.msra.mxu1 %v6258_v43  ;;  %1825 = vmatprep.mubr.bf16.mxu1 %v8290_v8  ;;  %v6321_v43 = vld [vmem:[#allocation6 + $0x460] ss:$24 sps:$4 sm:$0xff]  }
 0x1c0   :  { %2118 = vmatprep.subr.bf16.mxu1 %v6263_v32  ;;  %2051 = vmatprep.mubr.bf16.mxu0 %v8290_v8  ;;  %v6342_v32 = vld [vmem:[#allocation8 + $0x90] ss:$24 sps:$4 sm:$0xff]  }
 0x1c3   :  { %2119 = vmatpush1.bf16.msra.mxu1 %v6261_v16  ;;  %v6345_v16 = vld [vmem:[#allocation8 + $0x98] ss:$24 sps:$4 sm:$0xff]  }
 0x1c4   :  { %2120 = vmatprep.subr.bf16.mxu1 %v6266_v5  ;;  %v6350_v5 = vld [vmem:[#allocation8 + $0xc4] ss:$24 sps:$4 sm:$0xff]  }
 0x1c6   :  { %1826 = vmatmul.mubr.bf16.gmra.mrb[40].mxu1 %v7240_v52  ;;  %2052 = vmatmul.mubr.bf16.gmra.mrb[72].mxu0 %v7240_v52 }
 0x1c7   :  { %2121 = vmatpush1.bf16.msra.mxu1 %v6264_v45  ;;  %1835 = vmatprep.mubr.bf16.mxu1 %v8290_v8  ;;  %v6348_v45 = vld [vmem:[#allocation8 + $0xc0] ss:$24 sps:$4 sm:$0xff]  }
 0x1c8   :  { %2122 = vmatprep.subr.bf16.mxu1 %v6269_v35  ;;  %2061 = vmatprep.mubr.bf16.mxu0 %v8290_v8  ;;  %v6351_v35 = vld [vmem:[#allocation8 + $0xc8] ss:$24 sps:$4 sm:$0xff]  }
 0x1cb   :  { %2123 = vmatpush1.bf16.msra.mxu1 %v6267_v40  ;;  %v6356_v40 = vld [vmem:[#allocation8 + $0xf4] ss:$24 sps:$4 sm:$0xff]  }
 0x1cc   :  { %2124 = vmatprep.subr.bf16.mxu1 %v6272_v4  ;;  %v6359_v4 = vld [vmem:[#allocation8 + $0xfc] ss:$24 sps:$4 sm:$0xff]  }
 0x1ce   :  { %1836 = vmatmul.mubr.bf16.gmra.mrb[44].mxu1 %v7260_v53  ;;  %2062 = vmatmul.mubr.bf16.gmra.mrb[76].mxu0 %v7260_v53 }
 0x1cf   :  { %2125 = vmatpush1.bf16.msra.mxu1 %v6270_v30  ;;  %1845 = vmatprep.mubr.bf16.mxu1 %v8290_v8  ;;  %v6354_v30 = vld [vmem:[#allocation8 + $0xf0] ss:$24 sps:$4 sm:$0xff]  }
 0x1d0   :  { %2126 = vmatprep.subr.bf16.mxu1 %v6275_v44  ;;  %2071 = vmatprep.mubr.bf16.mxu0 %v8290_v8  ;;  %v6357_v44 = vld [vmem:[#allocation8 + $0xf8] ss:$24 sps:$4 sm:$0xff]  }
 0x1d3   :  { %2127 = vmatpush1.bf16.msra.mxu1 %v6273_v12  ;;  %v6362_v12 = vld [vmem:[#allocation8 + $0x124] ss:$24 sps:$4 sm:$0xff]  }
 0x1d4   :  { %2128 = vmatprep.subr.bf16.mxu1 %v6278_v59  ;;  %v6360_v59 = vld [vmem:[#allocation8 + $0x120] ss:$24 sps:$4 sm:$0xff]  }
 0x1d6   :  { %1846 = vmatmul.mubr.bf16.gmra.mrb[48].mxu1 %v7280_v21  ;;  %2072 = vmatmul.mubr.bf16.gmra.mrb[80].mxu0 %v7280_v21 }
 0x1d7   :  { %2129 = vmatpush1.bf16.msra.mxu1 %v6276_v63  ;;  %1855 = vmatprep.mubr.bf16.mxu1 %v8290_v8  ;;  %v6363_v63 = vld [vmem:[#allocation8 + $0x128] ss:$24 sps:$4 sm:$0xff]  }
 0x1d8   :  { %2130 = vmatprep.subr.bf16.mxu1 %v6281_v46  ;;  %2081 = vmatprep.mubr.bf16.mxu0 %v8290_v8  ;;  %v6368_v46 = vld [vmem:[#allocation8 + $0x154] ss:$24 sps:$4 sm:$0xff]  }
 0x1db   :  { %2131 = vmatpush1.bf16.msra.mxu1 %v6279_v47  ;;  %v6371_v47 = vld [vmem:[#allocation8 + $0x15c] ss:$24 sps:$4 sm:$0xff]  }
 0x1dc   :  { %2132 = vmatprep.subr.bf16.mxu1 %v6284_v37  ;;  %v6366_v37 = vld [vmem:[#allocation8 + $0x150] ss:$24 sps:$4 sm:$0xff]  }
 0x1de   :  { %1856 = vmatmul.mubr.bf16.gmra.mrb[52].mxu1 %v7300_v54  ;;  %2082 = vmatmul.mubr.bf16.gmra.mrb[84].mxu0 %v7300_v54 }
 0x1df   :  { %2133 = vmatpush1.bf16.msra.mxu1 %v6282_v7  ;;  %1865 = vmatprep.mubr.bf16.mxu1 %v8290_v8  ;;  %v6369_v7 = vld [vmem:[#allocation8 + $0x158] ss:$24 sps:$4 sm:$0xff]  }
 0x1e0   :  { %2134 = vmatprep.subr.bf16.mxu1 %v6287_v11  ;;  %2091 = vmatprep.mubr.bf16.mxu0 %v8290_v8  ;;  %v6374_v11 = vld [vmem:[#allocation8 + $0x184] ss:$24 sps:$4 sm:$0xff]  }
 0x1e3   :  { %2135 = vmatpush1.bf16.msra.mxu1 %v6285_v20  ;;  %v6372_v20 = vld [vmem:[#allocation8 + $0x180] ss:$24 sps:$4 sm:$0xff]  }
 0x1e4   :  { %2136 = vmatprep.subr.bf16.mxu1 %v6290_v9  ;;  %v6375_v9 = vld [vmem:[#allocation8 + $0x188] ss:$24 sps:$4 sm:$0xff]  }
 0x1e6   :  { %1866 = vmatmul.mubr.bf16.gmra.mrb[56].mxu1 %v7320_v56  ;;  %2092 = vmatmul.mubr.bf16.gmra.mrb[88].mxu0 %v7320_v56 }
 0x1e7   :  { %2137 = vmatpush1.bf16.msra.mxu1 %v6288_v1  ;;  %1875 = vmatprep.mubr.bf16.mxu1 %v8290_v8  ;;  %v6380_v1 = vld [vmem:[#allocation8 + $0x1b4] ss:$24 sps:$4 sm:$0xff]  }
 0x1e8   :  { %2138 = vmatprep.subr.bf16.mxu1 %v6293_v31  ;;  %2101 = vmatprep.mubr.bf16.mxu0 %v8290_v8  ;;  %v6383_v31 = vld [vmem:[#allocation8 + $0x1bc] ss:$24 sps:$4 sm:$0xff]  }
 0x1eb   :  { %2139 = vmatpush1.bf16.msra.mxu1 %v6291_v55  ;;  %v6378_v55 = vld [vmem:[#allocation8 + $0x1b0] ss:$24 sps:$4 sm:$0xff]  }
 0x1ec   :  { %2140 = vmatprep.subr.bf16.mxu1 %v6296_v34  ;;  %v6381_v34 = vld [vmem:[#allocation8 + $0x1b8] ss:$24 sps:$4 sm:$0xff]  }
 0x1ee   :  { %1876 = vmatmul.mubr.bf16.gmra.mrb[60].mxu1 %v7330_v23  ;;  %2102 = vmatmul.mubr.bf16.gmra.mrb[92].mxu0 %v7330_v23 }
 0x1ef   :  { %2141 = vmatpush1.bf16.msra.mxu1 %v6294_v41  ;;  %2144 = vmatprep.mubr.bf16.mxu1 %v7195_v27  ;;  %v6309_v27 = vld [vmem:[#allocation6 + $0x3a0] ss:$24 sps:$4 sm:$0xff]   ;;  %v6386_v41 = vld [vmem:[#allocation8 + $0x1e4] ss:$24 sps:$4 sm:$0xff]  }
 0x1f0   :  { %2142 = vmatprep.subr.bf16.mxu1 %v6299_v15  ;;  %v6384_v15 = vld [vmem:[#allocation8 + $0x1e0] ss:$24 sps:$4 sm:$0xff]  }
 0x1f3   :  { %2143 = vmatpush1.bf16.msra.mxu1 %v6297_v24  ;;  %v6387_v24 = vld [vmem:[#allocation8 + $0x1e8] ss:$24 sps:$4 sm:$0xff]  }
 0x1f4   :  { %2225 = vmatprep.subr.bf16.mxu1 %v6302_v22  ;;  %v6392_v22 = vld [vmem:[#allocation8 + $0x214] ss:$24 sps:$4 sm:$0xff]  }
 0x1f6   :  { %2145 = vmatmul.mubr.bf16.vlgmr.msra.gmra.mrb[64].mxu1 %v7053_v14  ;;  %v6312_v14 = vld [vmem:[#allocation6 + $0x3d0] ss:$24 sps:$4 sm:$0xff]  }
 0x1f7   :  { %2154 = vmatprep.mubr.bf16.mxu1 %v7215_v0  ;;  %2226 = vmatpush1.bf16.msra.mxu1 %v6300_v42  ;;  %v6317_v0 = vld [vmem:[#allocation6 + $0x404] ss:$24 sps:$4 sm:$0xff]  }
 0x1f8   :  { %2227 = vmatprep.subr.bf16.mxu1 %v6305_v29  ;;  %v6395_v42 = vld [vmem:[#allocation8 + $0x21c] ss:$24 sps:$4 sm:$0xff]   ;;  %v6390_v29 = vld [vmem:[#allocation8 + $0x210] ss:$24 sps:$4 sm:$0xff]  }
 0x1fb   :  { %2228 = vmatpush1.bf16.msra.mxu1 %v6303_v19  ;;  %v6393_v19 = vld [vmem:[#allocation8 + $0x218] ss:$24 sps:$4 sm:$0xff]  }
 0x1fc   :  { %2229 = vmatprep.subr.bf16.mxu1 %v6308_v6  ;;  %v6398_v6 = vld [vmem:[#allocation8 + $0x244] ss:$24 sps:$4 sm:$0xff]  }
 0x1fe   :  { %2155 = vmatmul.mubr.bf16.gmra.mrb[68].mxu1 %v7070_v36  ;;  %v6318_v36 = vld [vmem:[#allocation6 + $0x430] ss:$24 sps:$4 sm:$0xff]  }
 0x1ff   :  { %2164 = vmatprep.mubr.bf16.mxu1 %v7235_v62  ;;  %2230 = vmatpush1.bf16.msra.mxu1 %v6306_v48  ;;  %v6323_v62 = vld [vmem:[#allocation6 + $0x464] ss:$24 sps:$4 sm:$0xff]  }
 0x200   :  { %2231 = vmatprep.subr.bf16.mxu1 %v6311_v13  ;;  %v6401_v48 = vld [vmem:[#allocation8 + $0x24c] ss:$24 sps:$4 sm:$0xff]   ;;  %v6399_v13 = vld [vmem:[#allocation8 + $0x248] ss:$24 sps:$4 sm:$0xff]  }
 0x203   :  { %2232 = vmatpush1.bf16.msra.mxu1 %v6309_v27  ;;  %v7403_v27 = vld [vmem:[%s8256_s4] sm:$0x3f] }
 0x204   :  { %2233 = vmatprep.subr.bf16.mxu1 %v6314_v39  ;;  %v7407_v39 = vrot.slane %v7403_v27, %v7018_v49 }
 0x206   :  { %2165 = vmatmul.mubr.bf16.gmra.mrb[72].mxu1 %v7084_v2  ;;  %v6324_v2 = vld [vmem:[#allocation8] ss:$24 sps:$4 sm:$0xff]  }
 0x207   :  { %2174 = vmatprep.mubr.bf16.mxu1 %v7255_v3  ;;  %2234 = vmatpush1.bf16.msra.mxu1 %v6312_v14  ;;  %v6333_v3 = vld [vmem:[#allocation8 + $0x38] ss:$24 sps:$4 sm:$0xff]   ;;  %v7411_v14 = vrot.slane %v7403_v27, %v7026_v51 }
 0x208   :  { %2235 = vmatprep.subr.bf16.mxu1 %v6317_v0  ;;  %v6404_v0 = vld [vmem:[#allocation8 + $0x274] ss:$24 sps:$4 sm:$0xff]  }
 0x20b   :  { %2236 = vmatpush1.bf16.msra.mxu1 %v6315_v18  ;;  %v6407_v18 = vld [vmem:[#allocation8 + $0x27c] ss:$24 sps:$4 sm:$0xff]  }
 0x20c   :  { %2237 = vmatprep.subr.bf16.mxu1 %v6320_v38  ;;  %v6402_v38 = vld [vmem:[#allocation8 + $0x270] ss:$24 sps:$4 sm:$0xff]  }
 0x20e   :  { %2175 = vmatmul.mubr.bf16.gmra.mrb[76].mxu1 %v7098_v26  ;;  %v6326_v26 = vld [vmem:[#allocation8 + $0x4] ss:$24 sps:$4 sm:$0xff]  }
 0x20f   :  { %2184 = vmatprep.mubr.bf16.mxu1 %v7275_v61  ;;  %2238 = vmatpush1.bf16.msra.mxu1 %v6318_v36  ;;  %v6336_v61 = vld [vmem:[#allocation8 + $0x60] ss:$24 sps:$4 sm:$0xff]  }
 0x210   :  { %2239 = vmatprep.subr.bf16.mxu1 %v6323_v62  ;;  %3402 = vmatprep.subr.bf16.mxu0 %v6326_v26  ;;  %v6405_v36 = vld [vmem:[#allocation8 + $0x278] ss:$24 sps:$4 sm:$0xff]  }
 0x211   :  { %3403 = vmatpush1.bf16.msra.mxu0 %v6324_v2 }
 0x213   :  { %2240 = vmatpush1.bf16.msra.mxu1 %v6321_v43 }
 0x216   :  { %2185 = vmatmul.mubr.bf16.gmra.mrb[80].mxu1 %v7112_v60  ;;  %v6327_v60 = vld [vmem:[#allocation8 + $0x8] ss:$24 sps:$4 sm:$0xff]  }
 0x217   :  { %2194 = vmatprep.mubr.bf16.mxu1 %v7295_v57  ;;  %v6339_v57 = vld [vmem:[#allocation8 + $0x68] ss:$24 sps:$4 sm:$0xff]  }
 0x21e   :  { %2195 = vmatmul.mubr.bf16.gmra.mrb[84].mxu1 %v7126_v33  ;;  %v6329_v33 = vld [vmem:[#allocation8 + $0xc] ss:$24 sps:$4 sm:$0xff]  }
 0x21f   :  { %2204 = vmatprep.mubr.bf16.mxu1 %v7315_v25  ;;  %3628 = vmatprep.subr.bf16.mxu1 %v6329_v33  ;;  %v6344_v25 = vld [vmem:[#allocation8 + $0x94] ss:$24 sps:$4 sm:$0xff]  }
 0x226   :  { %2205 = vmatmul.mubr.bf16.gmra.mrb[88].mxu1 %v7156_v28  ;;  %v6332_v28 = vld [vmem:[#allocation8 + $0x34] ss:$24 sps:$4 sm:$0xff]  }
 0x227   :  { %2214 = vmatprep.mubr.bf16.mxu1 %v7328_v58  ;;  %3404 = vmatprep.subr.bf16.mxu0 %v6332_v28  ;;  %v6347_v58 = vld [vmem:[#allocation8 + $0x9c] ss:$24 sps:$4 sm:$0xff]  }
 0x22e   :  { %2215 = vmatmul.mubr.bf16.gmra.mrb[92].mxu1 %v7184_v50  ;;  %v6335_v50 = vld [vmem:[#allocation8 + $0x3c] ss:$24 sps:$4 sm:$0xff]  }
 0x22f   :  { %2257 = vmatprep.mubr.bf16.mxu1 %v8290_v8 }
 0x236   :  { %2258 = vmatmul.mubr.bf16.vlgmr.msra.gmra.mrb[64].mxu1 %v7199_v10  ;;  %v6330_v10 = vld [vmem:[#allocation8 + $0x30] ss:$24 sps:$4 sm:$0xff]  }
 0x237   :  { %2267 = vmatprep.mubr.bf16.mxu1 %v8290_v8  ;;  %3629 = vmatpush1.bf16.msra.mxu1 %v6327_v60 }
 0x238   :  { %3630 = vmatprep.subr.bf16.mxu1 %v6335_v50  ;;  %3405 = vmatpush1.bf16.msra.mxu0 %v6330_v10  ;;  %v6410_v10 = vld [vmem:[#allocation8 + $0x2a4] ss:$24 sps:$4 sm:$0xff]  }
 0x23b   :  { %3631 = vmatpush1.bf16.msra.mxu1 %v6333_v3  ;;  %v6413_v3 = vld [vmem:[#allocation8 + $0x2ac] ss:$24 sps:$4 sm:$0xff]  }
 0x23e   :  { %2268 = vmatmul.mubr.bf16.gmra.mrb[68].mxu1 %v7220_v17  ;;  %v6338_v17 = vld [vmem:[#allocation8 + $0x64] ss:$24 sps:$4 sm:$0xff]  }
 0x23f   :  { %2277 = vmatprep.mubr.bf16.mxu1 %v8290_v8  ;;  %3406 = vmatprep.subr.bf16.mxu0 %v6338_v17 }
 0x240   :  { %3407 = vmatpush1.bf16.msra.mxu0 %v6336_v61 }
 0x241   :  { %3408 = vmatprep.subr.bf16.mxu0 %v6344_v25  ;;  %v6408_v25 = vld [vmem:[#allocation8 + $0x2a0] ss:$24 sps:$4 sm:$0xff]  }
 0x244   :  { %3409 = vmatpush1.bf16.msra.mxu0 %v6342_v32 }
 0x245   :  { %3410 = vmatprep.subr.bf16.mxu0 %v6350_v5 }
 0x246   :  { %2278 = vmatmul.mubr.bf16.gmra.mrb[72].mxu1 %v7240_v52  ;;  %v6341_v52 = vld [vmem:[#allocation8 + $0x6c] ss:$24 sps:$4 sm:$0xff]  }
 0x247   :  { %2287 = vmatprep.mubr.bf16.mxu1 %v8290_v8  ;;  %3632 = vmatprep.subr.bf16.mxu1 %v6341_v52 }
 0x248   :  { %3633 = vmatpush1.bf16.msra.mxu1 %v6339_v57  ;;  %3411 = vmatpush1.bf16.msra.mxu0 %v6348_v45 }
 0x249   :  { %3634 = vmatprep.subr.bf16.mxu1 %v6347_v58  ;;  %3412 = vmatprep.subr.bf16.mxu0 %v6356_v40  ;;  %v6419_v40 = vld [vmem:[#allocation8 + $0x2dc] ss:$24 sps:$4 sm:$0xff]  }
 0x24c   :  { %3635 = vmatpush1.bf16.msra.mxu1 %v6345_v16  ;;  %3413 = vmatpush1.bf16.msra.mxu0 %v6354_v30  ;;  %v6411_v16 = vld [vmem:[#allocation8 + $0x2a8] ss:$24 sps:$4 sm:$0xff]   ;;  %v6417_v30 = vld [vmem:[#allocation8 + $0x2d8] ss:$24 sps:$4 sm:$0xff]  }
 0x24d   :  { %3414 = vmatprep.subr.bf16.mxu0 %v6362_v12 }
 0x24e   :  { %2288 = vmatmul.mubr.bf16.gmra.mrb[76].mxu1 %v7260_v53  ;;  %v6353_v53 = vld [vmem:[#allocation8 + $0xcc] ss:$24 sps:$4 sm:$0xff]  }
 0x24f   :  { %2297 = vmatprep.mubr.bf16.mxu1 %v8290_v8  ;;  %3636 = vmatprep.subr.bf16.mxu1 %v6353_v53 }
 0x250   :  { %3637 = vmatpush1.bf16.msra.mxu1 %v6351_v35  ;;  %3415 = vmatpush1.bf16.msra.mxu0 %v6360_v59  ;;  %v6416_v35 = vld [vmem:[#allocation8 + $0x2d4] ss:$24 sps:$4 sm:$0xff]  }
 0x251   :  { %3638 = vmatprep.subr.bf16.mxu1 %v6359_v4  ;;  %3416 = vmatprep.subr.bf16.mxu0 %v6368_v46  ;;  %v6414_v4 = vld [vmem:[#allocation8 + $0x2d0] ss:$24 sps:$4 sm:$0xff]  }
 0x254   :  { %3639 = vmatpush1.bf16.msra.mxu1 %v6357_v44  ;;  %3417 = vmatpush1.bf16.msra.mxu0 %v6366_v37 }
 0x255   :  { %3418 = vmatprep.subr.bf16.mxu0 %v6374_v11 }
 0x256   :  { %2298 = vmatmul.mubr.bf16.gmra.mrb[80].mxu1 %v7280_v21  ;;  %v6365_v21 = vld [vmem:[#allocation8 + $0x12c] ss:$24 sps:$4 sm:$0xff]  }
 0x257   :  { %2307 = vmatprep.mubr.bf16.mxu1 %v8290_v8  ;;  %3640 = vmatprep.subr.bf16.mxu1 %v6365_v21 }
 0x258   :  { %3641 = vmatpush1.bf16.msra.mxu1 %v6363_v63  ;;  %3419 = vmatpush1.bf16.msra.mxu0 %v6372_v20 }
 0x259   :  { %3642 = vmatprep.subr.bf16.mxu1 %v6371_v47  ;;  %3420 = vmatprep.subr.bf16.mxu0 %v6380_v1 }
 0x25c   :  { %3643 = vmatpush1.bf16.msra.mxu1 %v6369_v7  ;;  %3421 = vmatpush1.bf16.msra.mxu0 %v6378_v55 }
 0x25d   :  { %3422 = vmatprep.subr.bf16.mxu0 %v6386_v41 }
 0x25e   :  { %2308 = vmatmul.mubr.bf16.gmra.mrb[84].mxu1 %v7300_v54  ;;  %v6377_v54 = vld [vmem:[#allocation8 + $0x18c] ss:$24 sps:$4 sm:$0xff]  }
 0x25f   :  { %2317 = vmatprep.mubr.bf16.mxu1 %v8290_v8  ;;  %3644 = vmatprep.subr.bf16.mxu1 %v6377_v54 }
 0x260   :  { %3645 = vmatpush1.bf16.msra.mxu1 %v6375_v9  ;;  %3423 = vmatpush1.bf16.msra.mxu0 %v6384_v15 }
 0x261   :  { %3646 = vmatprep.subr.bf16.mxu1 %v6383_v31  ;;  %3424 = vmatprep.subr.bf16.mxu0 %v6392_v22 }
 0x264   :  { %3647 = vmatpush1.bf16.msra.mxu1 %v6381_v34  ;;  %3425 = vmatpush1.bf16.msra.mxu0 %v6390_v29 }
 0x265   :  { %3426 = vmatprep.subr.bf16.mxu0 %v6398_v6 }
 0x266   :  { %2318 = vmatmul.mubr.bf16.gmra.mrb[88].mxu1 %v7320_v56  ;;  %v6389_v56 = vld [vmem:[#allocation8 + $0x1ec] ss:$24 sps:$4 sm:$0xff]  }
 0x267   :  { %2327 = vmatprep.mubr.bf16.mxu1 %v8290_v8  ;;  %3648 = vmatprep.subr.bf16.mxu1 %v6389_v56 }
 0x268   :  { %3649 = vmatpush1.bf16.msra.mxu1 %v6387_v24 }
 0x269   :  { %3650 = vmatprep.subr.bf16.mxu1 %v6395_v42  ;;  %v6422_v42 = vld [vmem:[#allocation8 + $0x304] ss:$24 sps:$4 sm:$0xff]  }
 0x26c   :  { %3651 = vmatpush1.bf16.msra.mxu1 %v6393_v19 }
 0x26d   :  { %3652 = vmatprep.subr.bf16.mxu1 %v6401_v48 }
 0x26e   :  { %2328 = vmatmul.mubr.bf16.gmra.mrb[92].mxu1 %v7330_v23  ;;  %v6396_v23 = vld [vmem:[#allocation8 + $0x240] ss:$24 sps:$4 sm:$0xff]  }
 0x26f   :  { %3427 = vmatpush1.bf16.msra.mxu0 %v6396_v23 }
 0x270   :  { %3653 = vmatpush1.bf16.msra.mxu1 %v6399_v13  ;;  %3428 = vmatprep.subr.bf16.mxu0 %v6404_v0 }
 0x271   :  { %3654 = vmatprep.subr.bf16.mxu1 %v6407_v18 }
 0x273   :  { %3429 = vmatpush1.bf16.msra.mxu0 %v6402_v38 }
 0x274   :  { %3655 = vmatpush1.bf16.msra.mxu1 %v6405_v36  ;;  %3430 = vmatprep.subr.bf16.mxu0 %v6410_v10 }
 0x275   :  { %3656 = vmatprep.subr.bf16.mxu1 %v6413_v3 }
 0x277   :  { %3431 = vmatpush1.bf16.msra.mxu0 %v6408_v25 }
 0x278   :  { %3657 = vmatpush1.bf16.msra.mxu1 %v6411_v16  ;;  %3432 = vmatprep.subr.bf16.mxu0 %v6416_v35 }
 0x279   :  { %3658 = vmatprep.subr.bf16.mxu1 %v6419_v40 }
 0x27b   :  { %3433 = vmatpush1.bf16.msra.mxu0 %v6414_v4 }
 0x27c   :  { %3659 = vmatpush1.bf16.msra.mxu1 %v6417_v30  ;;  %3515 = vmatprep.subr.bf16.mxu0 %v6422_v42 }
 0x289   :  { %v1807_v62 = vpop.f32.mrb[32].mxu1  ;;  %v7413_v43 = vpop.f32.mrb[64].mxu0 }
 0x28a   :  { %v5632_v2 = vadd.f32 %v1807_v62, %v7407_v39  ;;  %v7416_v26 = vpop.f32.mrb[33].mxu1  ;;  %v2035_v60 = vpop.f32.mrb[65].mxu0 }
 0x28b   :  { %v5665_v33 = vadd.f32 %v2035_v60, %v7411_v14  ;;  %v1811_v28 = vpop.f32.mrb[34].mxu1  ;;  %v7419_v50 = vpop.f32.mrb[66].mxu0 }
 0x28c   :  { %v2338_v17 = vmax.f32 %v5632_v2, 0.0  ;;  %v5634_v52 = vadd.f32 %v1811_v28, %v7407_v39  ;;  %v7422_v61 = vpop.f32.mrb[35].mxu1  ;;  %v2039_v57 = vpop.f32.mrb[67].mxu0 }
 0x28d   :  { %v2341_v58 = vmax.f32 %v5665_v33, 0.0  ;;  %v5667_v32 = vadd.f32 %v2039_v57, %v7411_v14 }
 0x28e   :  { %v2344_v5 = vmax.f32 %v5634_v52, 0.0 }
 0x28f   :  { %v2434_v53 = vmax.f32 %v2338_v17, %v2341_v58  ;;  %v2347_v45 = vmax.f32 %v5667_v32, 0.0 }
 0x291   :  { %v2437_v44 = vmax.f32 %v2344_v5, %v2347_v45  ;;  %v1817_v12 = vpop.f32.mrb[36].mxu1  ;;  %v7425_v21 = vpop.f32.mrb[68].mxu0 }
 0x292   :  { %v5636_v59 = vadd.f32 %v1817_v12, %v7407_v39  ;;  %v7428_v63 = vpop.f32.mrb[37].mxu1  ;;  %v2045_v46 = vpop.f32.mrb[69].mxu0 }
 0x293   :  { %v7430_v47 = vpack.c.bf16 %v2437_v44, %v2434_v53  ;;  %v5669_v37 = vadd.f32 %v2045_v46, %v7411_v14  ;;  %v1821_v7 = vpop.f32.mrb[38].mxu1  ;;  %v7433_v11 = vpop.f32.mrb[70].mxu0 }
 0x294   :  { %v2350_v54 = vmax.f32 %v5636_v59, 0.0  ;;  %v5638_v20 = vadd.f32 %v1821_v7, %v7407_v39  ;;  %v7436_v9 = vpop.f32.mrb[39].mxu1  ;;  %v2049_v1 = vpop.f32.mrb[71].mxu0 }
 0x295   :  { %v2353_v31 = vmax.f32 %v5669_v37, 0.0  ;;  %v5671_v55 = vadd.f32 %v2049_v1, %v7411_v14 }
 0x296   :  { %v2356_v34 = vmax.f32 %v5638_v20, 0.0 }
 0x297   :  { %v2440_v41 = vmax.f32 %v2350_v54, %v2353_v31  ;;  %v2359_v56 = vmax.f32 %v5671_v55, 0.0 }
 0x299   :  { %v2443_v15 = vmax.f32 %v2356_v34, %v2359_v56  ;;  %v1827_v24 = vpop.f32.mrb[40].mxu1  ;;  %v7439_v22 = vpop.f32.mrb[72].mxu0 }
 0x29a   :  { %v5640_v29 = vadd.f32 %v1827_v24, %v7407_v39  ;;  %v7442_v19 = vpop.f32.mrb[41].mxu1  ;;  %v2055_v6 = vpop.f32.mrb[73].mxu0 }
 0x29b   :  { %v5673_v48 = vadd.f32 %v2055_v6, %v7411_v14  ;;  %v1831_v23 = vpop.f32.mrb[42].mxu1  ;;  %v7445_v13 = vpop.f32.mrb[74].mxu0  ;;  %v7447_v0 = vpack.c.bf16 %v2443_v15, %v2440_v41 }
 0x29c   :  { %v2362_v18 = vmax.f32 %v5640_v29, 0.0  ;;  %v5642_v38 = vadd.f32 %v1831_v23, %v7407_v39  ;;  %v7450_v36 = vpop.f32.mrb[43].mxu1  ;;  %v2059_v62 = vpop.f32.mrb[75].mxu0 }
 0x29d   :  { %v2365_v2 = vmax.f32 %v5673_v48, 0.0  ;;  %v5675_v60 = vadd.f32 %v2059_v62, %v7411_v14 }
 0x29e   :  { %v2368_v33 = vmax.f32 %v5642_v38, 0.0 }
 0x29f   :  { %v2446_v28 = vmax.f32 %v2362_v18, %v2365_v2  ;;  %v2371_v10 = vmax.f32 %v5675_v60, 0.0 }
 0x2a1   :  { %v2449_v3 = vmax.f32 %v2368_v33, %v2371_v10  ;;  %v1837_v17 = vpop.f32.mrb[44].mxu1  ;;  %v7453_v52 = vpop.f32.mrb[76].mxu0 }
 0x2a2   :  { %v5644_v57 = vadd.f32 %v1837_v17, %v7407_v39  ;;  %v7456_v25 = vpop.f32.mrb[45].mxu1  ;;  %v2065_v58 = vpop.f32.mrb[77].mxu0 }
 0x2a3   :  { %v5677_v32 = vadd.f32 %v2065_v58, %v7411_v14  ;;  %v1841_v16 = vpop.f32.mrb[46].mxu1  ;;  %v7459_v5 = vpop.f32.mrb[78].mxu0  ;;  %v7461_v53 = vpack.c.bf16 %v2449_v3, %v2446_v28 }
 0x2a4   :  { %v2374_v45 = vmax.f32 %v5644_v57, 0.0  ;;  %v5646_v35 = vadd.f32 %v1841_v16, %v7407_v39  ;;  %v7464_v40 = vpop.f32.mrb[47].mxu1  ;;  %v2069_v4 = vpop.f32.mrb[79].mxu0 }
 0x2a5   :  { %v2377_v30 = vmax.f32 %v5677_v32, 0.0  ;;  %v5679_v44 = vadd.f32 %v2069_v4, %v7411_v14  ;;  %v6437_v32 = vld [vmem:[#allocation8 + $0x30c] ss:$24 sps:$4 sm:$0xff]  }
 0x2a6   :  { %v2380_v12 = vmax.f32 %v5646_v35, 0.0  ;;  %3741 = vmatprep.subr.bf16.mxu1 %v6437_v32 }
 0x2a7   :  { %v2452_v59 = vmax.f32 %v2374_v45, %v2377_v30  ;;  %v2383_v46 = vmax.f32 %v5679_v44, 0.0 }
 0x2a9   :  { %v2455_v37 = vmax.f32 %v2380_v12, %v2383_v46  ;;  %v1847_v7 = vpop.f32.mrb[48].mxu1  ;;  %v7467_v54 = vpop.f32.mrb[80].mxu0 }
 0x2aa   :  { %v5648_v20 = vadd.f32 %v1847_v7, %v7407_v39  ;;  %v7470_v1 = vpop.f32.mrb[49].mxu1  ;;  %v2075_v31 = vpop.f32.mrb[81].mxu0 }
 0x2ab   :  { %v5681_v55 = vadd.f32 %v2075_v31, %v7411_v14  ;;  %v1851_v34 = vpop.f32.mrb[50].mxu1  ;;  %v7473_v41 = vpop.f32.mrb[82].mxu0  ;;  %v7475_v56 = vpack.c.bf16 %v2455_v37, %v2452_v59 }
 0x2ac   :  { %v2386_v15 = vmax.f32 %v5648_v20, 0.0  ;;  %v5650_v24 = vadd.f32 %v1851_v34, %v7407_v39  ;;  %v7478_v42 = vpop.f32.mrb[51].mxu1  ;;  %v2079_v29 = vpop.f32.mrb[83].mxu0 }
 0x2ad   :  { %v2389_v6 = vmax.f32 %v5681_v55, 0.0  ;;  %v5683_v48 = vadd.f32 %v2079_v29, %v7411_v14 }
 0x2ae   :  { %v2392_v23 = vmax.f32 %v5650_v24, 0.0 }
 0x2af   :  { %v2458_v18 = vmax.f32 %v2386_v15, %v2389_v6  ;;  %v2395_v38 = vmax.f32 %v5683_v48, 0.0 }
 0x2b1   :  { %v2461_v62 = vmax.f32 %v2392_v23, %v2395_v38  ;;  %v1857_v2 = vpop.f32.mrb[52].mxu1  ;;  %v7481_v60 = vpop.f32.mrb[84].mxu0 }
 0x2b2   :  { %v5652_v33 = vadd.f32 %v1857_v2, %v7407_v39  ;;  %v7484_v28 = vpop.f32.mrb[53].mxu1  ;;  %v2085_v10 = vpop.f32.mrb[85].mxu0 }
 0x2b3   :  { %v5685_v3 = vadd.f32 %v2085_v10, %v7411_v14  ;;  %v1861_v17 = vpop.f32.mrb[54].mxu1  ;;  %v7487_v57 = vpop.f32.mrb[86].mxu0  ;;  %v7489_v58 = vpack.c.bf16 %v2461_v62, %v2458_v18 }
 0x2b4   :  { %v2398_v16 = vmax.f32 %v5652_v33, 0.0  ;;  %v5654_v45 = vadd.f32 %v1861_v17, %v7407_v39  ;;  %v7492_v35 = vpop.f32.mrb[55].mxu1  ;;  %v2089_v4 = vpop.f32.mrb[87].mxu0 }
 0x2b5   :  { %v2401_v30 = vmax.f32 %v5685_v3, 0.0  ;;  %v5687_v44 = vadd.f32 %v2089_v4, %v7411_v14 }
 0x2b6   :  { %v2404_v12 = vmax.f32 %v5654_v45, 0.0 }
 0x2b7   :  { %v2464_v59 = vmax.f32 %v2398_v16, %v2401_v30  ;;  %v2407_v46 = vmax.f32 %v5687_v44, 0.0 }
 0x2b9   :  { %v2467_v37 = vmax.f32 %v2404_v12, %v2407_v46  ;;  %v1867_v7 = vpop.f32.mrb[56].mxu1  ;;  %v7495_v20 = vpop.f32.mrb[88].mxu0 }
 0x2ba   :  { %v5656_v31 = vadd.f32 %v1867_v7, %v7407_v39  ;;  %v7498_v55 = vpop.f32.mrb[57].mxu1  ;;  %v2095_v34 = vpop.f32.mrb[89].mxu0 }
 0x2bb   :  { %v5689_v15 = vadd.f32 %v2095_v34, %v7411_v14  ;;  %v1871_v24 = vpop.f32.mrb[58].mxu1  ;;  %v7501_v29 = vpop.f32.mrb[90].mxu0  ;;  %v7503_v6 = vpack.c.bf16 %v2467_v37, %v2464_v59 }
 0x2bc   :  { %v2410_v48 = vmax.f32 %v5656_v31, 0.0  ;;  %v5658_v23 = vadd.f32 %v1871_v24, %v7407_v39  ;;  %v7506_v18 = vpop.f32.mrb[59].mxu1  ;;  %v2099_v38 = vpop.f32.mrb[91].mxu0 }
 0x2bd   :  { %v2413_v62 = vmax.f32 %v5689_v15, 0.0  ;;  %v5691_v2 = vadd.f32 %v2099_v38, %v7411_v14 }
 0x2be   :  { %v2416_v33 = vmax.f32 %v5658_v23, 0.0 }
 0x2bf   :  { %v2470_v10 = vmax.f32 %v2410_v48, %v2413_v62  ;;  %v2419_v3 = vmax.f32 %v5691_v2, 0.0 }
 0x2c1   :  { %v2473_v17 = vmax.f32 %v2416_v33, %v2419_v3  ;;  %v1877_v32 = vpop.f32.mrb[60].mxu1  ;;  %v7509_v16 = vpop.f32.mrb[92].mxu0  ;;  %v8291_v33 = vld [vmem:[#allocation19_spill] sm:$0xff] }
 0x2c2   :  { %v5660_v45 = vadd.f32 %v1877_v32, %v7407_v39  ;;  %v7512_v4 = vpop.f32.mrb[61].mxu1  ;;  %v2105_v30 = vpop.f32.mrb[93].mxu0  ;;  %v7527_v3 = vrot.slane %v7403_v27, %v8291_v33 }
 0x2c3   :  { %v5693_v44 = vadd.f32 %v2105_v30, %v7411_v14  ;;  %v1881_v12 = vpop.f32.mrb[62].mxu1  ;;  %v7515_v59 = vpop.f32.mrb[94].mxu0  ;;  %v7517_v46 = vpack.c.bf16 %v2473_v17, %v2470_v10  ;;  %v8292_v10 = vld [vmem:[#allocation18_spill] sm:$0xff] }
 0x2c4   :  { %v2422_v37 = vmax.f32 %v5660_v45, 0.0  ;;  %v5662_v7 = vadd.f32 %v1881_v12, %v7407_v39  ;;  %v7520_v31 = vpop.f32.mrb[63].mxu1  ;;  %v2109_v34 = vpop.f32.mrb[95].mxu0  ;;  %v7531_v17 = vrot.slane %v7403_v27, %v8292_v10  ;;  %v8293_v39 = vld [vmem:[#allocation20_spill] sm:$0xff]  ;;  %v8294_v45 = vld [vmem:[#allocation21_spill] sm:$0xff]  ;;  %v5633_v30 = vadd.f32 %v7416_v26, %v7527_v3 }
 0x2c5   :  { %v2425_v15 = vmax.f32 %v5693_v44, 0.0  ;;  %v5695_v24 = vadd.f32 %v2109_v34, %v7411_v14  ;;  %v7535_v32 = vrot.slane %v7403_v27, %v8293_v39  ;;  %v7539_v14 = vrot.slane %v7403_v27, %v8294_v45 }
 0x2c6   :  { %v2428_v48 = vmax.f32 %v5662_v7, 0.0  ;;  %v5664_v44 = vadd.f32 %v7413_v43, %v7531_v17 }
 0x2c7   :  { %v2476_v23 = vmax.f32 %v2422_v37, %v2425_v15  ;;  %v2431_v38 = vmax.f32 %v5695_v24, 0.0  ;;  %v5635_v37 = vadd.f32 %v7422_v61, %v7527_v3  ;;  %v5666_v15 = vadd.f32 %v7419_v50, %v7531_v17 }
 0x2c8   :  { %v5637_v50 = vadd.f32 %v7428_v63, %v7527_v3 }
 0x2c9   :  { %v2479_v62 = vmax.f32 %v2428_v48, %v2431_v38  ;;  %v2339_v48 = vmax.f32 %v5633_v30, 0.0  ;;  %v2345_v39 = vmax.f32 %v5635_v37, 0.0  ;;  %v5668_v30 = vadd.f32 %v7425_v21, %v7531_v17 }
 0x2cb   :  { %v7523_v2 = vpack.c.bf16 %v2479_v62, %v2476_v23  ;;  %v2340_v62 = vmax.f32 %v5664_v44, 0.0  ;;  %v5639_v44 = vadd.f32 %v7436_v9, %v7527_v3 }
 0x309   :  { %v2259_v12 = vpop.f32.mrb[64].mxu1 }
 0x30a   :  { %v5696_v7 = vadd.f32 %v2259_v12, %v7535_v32  ;;  %v2261_v34 = vpop.f32.mrb[65].mxu1  ;;  %v2346_v12 = vmax.f32 %v5666_v15, 0.0  ;;  %v6420_v15 = vld [vmem:[#allocation8 + $0x300] ss:$24 sps:$4 sm:$0xff]  }
 0x30b   :  { %v5697_v24 = vadd.f32 %v2261_v34, %v7539_v14  ;;  %v2263_v27 = vpop.f32.mrb[66].mxu1 }
 0x30c   :  { %v2342_v23 = vmax.f32 %v5696_v7, 0.0  ;;  %v5698_v26 = vadd.f32 %v2263_v27, %v7535_v32  ;;  %v2265_v38 = vpop.f32.mrb[67].mxu1 }
 0x30d   :  { %v2343_v43 = vmax.f32 %v5697_v24, 0.0  ;;  %v5699_v45 = vadd.f32 %v2265_v38, %v7539_v14 }
 0x30e   :  { %v2435_v61 = vmax.f32 %v2339_v48, %v2342_v23  ;;  %v2348_v10 = vmax.f32 %v5698_v26, 0.0  ;;  %v6435_v23 = vld [vmem:[#allocation8 + $0x308] ss:$24 sps:$4 sm:$0xff]   ;;  %v2351_v26 = vmax.f32 %v5637_v50, 0.0 }
 0x30f   :  { %v2436_v33 = vmax.f32 %v2340_v62, %v2343_v43  ;;  %v2349_v51 = vmax.f32 %v5699_v45, 0.0  ;;  %v5670_v45 = vadd.f32 %v7433_v11, %v7531_v17  ;;  %v2352_v43 = vmax.f32 %v5668_v30, 0.0  ;;  %v6423_v50 = vld [vmem:[#allocation8 + $0x330] ss:$24 sps:$4 sm:$0xff]   ;;  %v6446_v30 = vld [vmem:[#allocation8 + $0x36c] ss:$24 sps:$4 sm:$0xff]  }
 0x310   :  { %v2438_v34 = vmax.f32 %v2345_v39, %v2348_v10  ;;  %v6440_v39 = vld [vmem:[#allocation8 + $0x33c] ss:$24 sps:$4 sm:$0xff]  }
 0x311   :  { %v2439_v7 = vmax.f32 %v2346_v12, %v2349_v51  ;;  %v2269_v27 = vpop.f32.mrb[68].mxu1  ;;  %v6425_v51 = vld [vmem:[#allocation8 + $0x334] ss:$24 sps:$4 sm:$0xff]  }
 0x312   :  { %v5700_v24 = vadd.f32 %v2269_v27, %v7535_v32  ;;  %v2271_v37 = vpop.f32.mrb[69].mxu1  ;;  %v7560_v48 = vpack.c.bf16 %v2438_v34, %v2435_v61  ;;  %v2358_v27 = vmax.f32 %v5670_v45, 0.0 }
 0x313   :  { %v7564_v63 = vpack.c.bf16 %v2439_v7, %v2436_v33  ;;  %v5701_v10 = vadd.f32 %v2271_v37, %v7539_v14  ;;  %v2273_v21 = vpop.f32.mrb[70].mxu1  ;;  %v2357_v33 = vmax.f32 %v5639_v44, 0.0  ;;  %v6438_v7 = vld [vmem:[#allocation8 + $0x338] ss:$24 sps:$4 sm:$0xff]   ;;  %v5672_v44 = vadd.f32 %v7439_v22, %v7531_v17 }
 0x314   :  { %v2354_v38 = vmax.f32 %v5700_v24, 0.0  ;;  %v5702_v9 = vadd.f32 %v2273_v21, %v7535_v32  ;;  %v2275_v62 = vpop.f32.mrb[71].mxu1  ;;  %3434 = vmatprep.mubr.bf16.mxu0 %v7560_v48  ;;  %3660 = vmatprep.mubr.bf16.mxu1 %v7560_v48  ;;  %v6428_v21 = vld [vmem:[#allocation8 + $0x364] ss:$24 sps:$4 sm:$0xff]  }
 0x315   :  { %v2355_v61 = vmax.f32 %v5701_v10, 0.0  ;;  %v5703_v11 = vadd.f32 %v2275_v62, %v7539_v14  ;;  %3435 = vmatmul.mubr.bf16.vlgmr.msra.gmra.mrb[96].mxu0 %v7430_v47  ;;  %3661 = vmatmul.mubr.bf16.vlgmr.msra.gmra.mrb[96].mxu1 %v7430_v47  ;;  %v5641_v10 = vadd.f32 %v7442_v19, %v7527_v3  ;;  %v5674_v19 = vadd.f32 %v7445_v13, %v7531_v17 }
 0x316   :  { %v2441_v12 = vmax.f32 %v2351_v26, %v2354_v38  ;;  %v2360_v34 = vmax.f32 %v5702_v9, 0.0  ;;  %3516 = vmatpush1.bf16.msra.mxu0 %v6420_v15  ;;  %3742 = vmatpush1.bf16.msra.mxu1 %v6435_v23  ;;  %v5643_v15 = vadd.f32 %v7450_v36, %v7527_v3 }
 0x317   :  { %v2442_v24 = vmax.f32 %v2352_v43, %v2355_v61  ;;  %v2361_v37 = vmax.f32 %v5703_v11, 0.0  ;;  %3517 = vmatprep.subr.bf16.mxu0 %v6425_v51  ;;  %3743 = vmatprep.subr.bf16.mxu1 %v6440_v39  ;;  %v6426_v51 = vld [vmem:[#allocation8 + $0x360] ss:$24 sps:$4 sm:$0xff]   ;;  %v6431_v61 = vld [vmem:[#allocation8 + $0x394] ss:$24 sps:$4 sm:$0xff]  }
 0x318   :  { %v2444_v62 = vmax.f32 %v2357_v33, %v2360_v34  ;;  %v6444_v39 = vld [vmem:[#allocation8 + $0x368] ss:$24 sps:$4 sm:$0xff]   ;;  %v6449_v11 = vld [vmem:[#allocation8 + $0x39c] ss:$24 sps:$4 sm:$0xff]   ;;  %v2363_v33 = vmax.f32 %v5641_v10, 0.0 }
 0x319   :  { %v2445_v26 = vmax.f32 %v2358_v27, %v2361_v37  ;;  %v2279_v38 = vpop.f32.mrb[72].mxu1  ;;  %v2369_v37 = vmax.f32 %v5643_v15, 0.0  ;;  %v6447_v10 = vld [vmem:[#allocation8 + $0x398] ss:$24 sps:$4 sm:$0xff]   ;;  %v5676_v15 = vadd.f32 %v7453_v52, %v7531_v17 }
 0x31a   :  { %v5704_v23 = vadd.f32 %v2279_v38, %v7535_v32  ;;  %v2281_v45 = vpop.f32.mrb[73].mxu1  ;;  %v7580_v9 = vpack.c.bf16 %v2444_v62, %v2441_v12  ;;  %3518 = vmatpush1.bf16.msra.mxu0 %v6423_v50  ;;  %3744 = vmatpush1.bf16.msra.mxu1 %v6438_v7  ;;  %v2364_v7 = vmax.f32 %v5672_v44, 0.0  ;;  %v2370_v62 = vmax.f32 %v5674_v19, 0.0  ;;  %v6455_v44 = vld [vmem:[#allocation8 + $0x3cc] ss:$24 sps:$4 sm:$0xff]  }
 0x31b   :  { %v5705_v43 = vadd.f32 %v2281_v45, %v7539_v14  ;;  %v2283_v22 = vpop.f32.mrb[74].mxu1  ;;  %3519 = vmatprep.subr.bf16.mxu0 %v6428_v21  ;;  %3745 = vmatprep.subr.bf16.mxu1 %v6446_v30  ;;  %v7585_v36 = vpack.c.bf16 %v2445_v26, %v2442_v24  ;;  %v6429_v30 = vld [vmem:[#allocation8 + $0x390] ss:$24 sps:$4 sm:$0xff]   ;;  %v5645_v45 = vadd.f32 %v7456_v25, %v7527_v3 }
 0x31c   :  { %v2366_v34 = vmax.f32 %v5704_v23, 0.0  ;;  %v5706_v12 = vadd.f32 %v2283_v22, %v7535_v32  ;;  %v2285_v50 = vpop.f32.mrb[75].mxu1  ;;  %3444 = vmatprep.mubr.bf16.mxu0 %v7580_v9  ;;  %3670 = vmatprep.mubr.bf16.mxu1 %v7580_v9  ;;  %v6434_v23 = vld [vmem:[#allocation8 + $0x3c4] ss:$24 sps:$4 sm:$0xff]   ;;  %v5678_v25 = vadd.f32 %v7459_v5, %v7531_v17 }
 0x31d   :  { %v2367_v13 = vmax.f32 %v5705_v43, 0.0  ;;  %v5707_v27 = vadd.f32 %v2285_v50, %v7539_v14  ;;  %3445 = vmatmul.mubr.bf16.gmra.mrb[100].mxu0 %v7447_v0  ;;  %3671 = vmatmul.mubr.bf16.gmra.mrb[100].mxu1 %v7447_v0  ;;  %v6443_v50 = vld [vmem:[#allocation8 + $0x3f4] ss:$24 sps:$4 sm:$0xff]  }
 0x31e   :  { %v2447_v24 = vmax.f32 %v2363_v33, %v2366_v34  ;;  %v2372_v21 = vmax.f32 %v5706_v12, 0.0  ;;  %3520 = vmatpush1.bf16.msra.mxu0 %v6426_v51  ;;  %3746 = vmatpush1.bf16.msra.mxu1 %v6444_v39  ;;  %v5647_v51 = vadd.f32 %v7464_v40, %v7527_v3 }
 0x31f   :  { %v2448_v26 = vmax.f32 %v2364_v7, %v2367_v13  ;;  %v2373_v38 = vmax.f32 %v5707_v27, 0.0  ;;  %3521 = vmatprep.subr.bf16.mxu0 %v6431_v61  ;;  %3747 = vmatprep.subr.bf16.mxu1 %v6449_v11  ;;  %v6432_v61 = vld [vmem:[#allocation8 + $0x3c0] ss:$24 sps:$4 sm:$0xff]   ;;  %v6458_v7 = vld [vmem:[#allocation8 + $0x3fc] ss:$24 sps:$4 sm:$0xff]   ;;  %v2375_v13 = vmax.f32 %v5645_v45, 0.0 }
 0x320   :  { %v2450_v43 = vmax.f32 %v2369_v37, %v2372_v21  ;;  %v6453_v11 = vld [vmem:[#allocation8 + $0x3c8] ss:$24 sps:$4 sm:$0xff]   ;;  %v2376_v21 = vmax.f32 %v5676_v15, 0.0  ;;  %v6464_v15 = vld [vmem:[#allocation8 + $0x42c] ss:$24 sps:$4 sm:$0xff]  }
 0x321   :  { %v2451_v22 = vmax.f32 %v2370_v62, %v2373_v38  ;;  %v2289_v33 = vpop.f32.mrb[76].mxu1  ;;  %v6441_v38 = vld [vmem:[#allocation8 + $0x3f0] ss:$24 sps:$4 sm:$0xff]  }
 0x322   :  { %v5708_v39 = vadd.f32 %v2289_v33, %v7535_v32  ;;  %v2291_v19 = vpop.f32.mrb[77].mxu1  ;;  %v7600_v34 = vpack.c.bf16 %v2450_v43, %v2447_v24  ;;  %3522 = vmatpush1.bf16.msra.mxu0 %v6429_v30  ;;  %3748 = vmatpush1.bf16.msra.mxu1 %v6447_v10  ;;  %v2381_v10 = vmax.f32 %v5647_v51, 0.0  ;;  %v5649_v33 = vadd.f32 %v7470_v1, %v7527_v3 }
 0x323   :  { %v5709_v12 = vadd.f32 %v2291_v19, %v7539_v14  ;;  %v2293_v52 = vpop.f32.mrb[78].mxu1  ;;  %3523 = vmatprep.subr.bf16.mxu0 %v6434_v23  ;;  %3749 = vmatprep.subr.bf16.mxu1 %v6455_v44  ;;  %v7605_v40 = vpack.c.bf16 %v2451_v22, %v2448_v26  ;;  %v6456_v23 = vld [vmem:[#allocation8 + $0x3f8] ss:$24 sps:$4 sm:$0xff]   ;;  %v2382_v44 = vmax.f32 %v5678_v25, 0.0  ;;  %v6452_v22 = vld [vmem:[#allocation8 + $0x424] ss:$24 sps:$4 sm:$0xff]   ;;  %v5680_v51 = vadd.f32 %v7467_v54, %v7531_v17 }
 0x324   :  { %v2378_v27 = vmax.f32 %v5708_v39, 0.0  ;;  %v5710_v37 = vadd.f32 %v2293_v52, %v7535_v32  ;;  %v2295_v24 = vpop.f32.mrb[79].mxu1  ;;  %3454 = vmatprep.mubr.bf16.mxu0 %v7600_v34  ;;  %3680 = vmatprep.mubr.bf16.mxu1 %v7600_v34  ;;  %v5682_v1 = vadd.f32 %v7473_v41, %v7531_v17 }
 0x325   :  { %v2379_v5 = vmax.f32 %v5709_v12, 0.0  ;;  %v5711_v30 = vadd.f32 %v2295_v24, %v7539_v14  ;;  %3455 = vmatmul.mubr.bf16.gmra.mrb[104].mxu0 %v7461_v53  ;;  %3681 = vmatmul.mubr.bf16.gmra.mrb[104].mxu1 %v7461_v53  ;;  %v2387_v24 = vmax.f32 %v5649_v33, 0.0  ;;  %v6470_v33 = vld [vmem:[#allocation8 + $0x14] ss:$24 sps:$4 sm:$0xff]  }
 0x326   :  { %v2453_v62 = vmax.f32 %v2375_v13, %v2378_v27  ;;  %v2384_v26 = vmax.f32 %v5710_v37, 0.0  ;;  %3524 = vmatpush1.bf16.msra.mxu0 %v6432_v61  ;;  %3750 = vmatpush1.bf16.msra.mxu1 %v6453_v11  ;;  %v5651_v61 = vadd.f32 %v7478_v42, %v7527_v3  ;;  %v6461_v27 = vld [vmem:[#allocation8 + $0x454] ss:$24 sps:$4 sm:$0xff]  }
 0x327   :  { %v2454_v45 = vmax.f32 %v2376_v21, %v2379_v5  ;;  %v2385_v43 = vmax.f32 %v5711_v30, 0.0  ;;  %3525 = vmatprep.subr.bf16.mxu0 %v6443_v50  ;;  %3751 = vmatprep.subr.bf16.mxu1 %v6458_v7  ;;  %v6450_v50 = vld [vmem:[#allocation8 + $0x420] ss:$24 sps:$4 sm:$0xff]   ;;  %v6467_v37 = vld [vmem:[#allocation8 + $0x45c] ss:$24 sps:$4 sm:$0xff]  }
 0x328   :  { %v2456_v39 = vmax.f32 %v2381_v10, %v2384_v26  ;;  %v6462_v7 = vld [vmem:[#allocation8 + $0x428] ss:$24 sps:$4 sm:$0xff]   ;;  %v2388_v10 = vmax.f32 %v5680_v51, 0.0  ;;  %v2393_v26 = vmax.f32 %v5651_v61, 0.0 }
 0x329   :  { %v2457_v19 = vmax.f32 %v2382_v44, %v2385_v43  ;;  %v2299_v12 = vpop.f32.mrb[80].mxu1  ;;  %v6459_v44 = vld [vmem:[#allocation8 + $0x450] ss:$24 sps:$4 sm:$0xff]   ;;  %v2394_v43 = vmax.f32 %v5682_v1, 0.0  ;;  %v5686_v1 = vadd.f32 %v7487_v57, %v7531_v17 }
 0x32a   :  { %v5712_v11 = vadd.f32 %v2299_v12, %v7535_v32  ;;  %v2301_v25 = vpop.f32.mrb[81].mxu1  ;;  %v7620_v52 = vpack.c.bf16 %v2456_v39, %v2453_v62  ;;  %3526 = vmatpush1.bf16.msra.mxu0 %v6441_v38  ;;  %3752 = vmatpush1.bf16.msra.mxu1 %v6456_v23  ;;  %v5653_v39 = vadd.f32 %v7484_v28, %v7527_v3 }
 0x32b   :  { %v5713_v13 = vadd.f32 %v2301_v25, %v7539_v14  ;;  %v2303_v54 = vpop.f32.mrb[82].mxu1  ;;  %3527 = vmatprep.subr.bf16.mxu0 %v6452_v22  ;;  %3753 = vmatprep.subr.bf16.mxu1 %v6464_v15  ;;  %v7625_v42 = vpack.c.bf16 %v2457_v19, %v2454_v45  ;;  %v6465_v45 = vld [vmem:[#allocation8 + $0x458] ss:$24 sps:$4 sm:$0xff]   ;;  %v5684_v19 = vadd.f32 %v7481_v60, %v7531_v17 }
 0x32c   :  { %v2390_v21 = vmax.f32 %v5712_v11, 0.0  ;;  %v5714_v5 = vadd.f32 %v2303_v54, %v7535_v32  ;;  %v2305_v30 = vpop.f32.mrb[83].mxu1  ;;  %3464 = vmatprep.mubr.bf16.mxu0 %v7620_v52  ;;  %3690 = vmatprep.mubr.bf16.mxu1 %v7620_v52  ;;  %v5655_v11 = vadd.f32 %v7492_v35, %v7527_v3  ;;  %v2399_v54 = vmax.f32 %v5653_v39, 0.0 }
 0x32d   :  { %v2391_v41 = vmax.f32 %v5713_v13, 0.0  ;;  %v5715_v62 = vadd.f32 %v2305_v30, %v7539_v14  ;;  %3465 = vmatmul.mubr.bf16.gmra.mrb[108].mxu0 %v7475_v56  ;;  %3691 = vmatmul.mubr.bf16.gmra.mrb[108].mxu1 %v7475_v56 }
 0x32e   :  { %v2459_v38 = vmax.f32 %v2387_v24, %v2390_v21  ;;  %v2396_v23 = vmax.f32 %v5714_v5, 0.0  ;;  %3528 = vmatpush1.bf16.msra.mxu0 %v6450_v50  ;;  %3754 = vmatpush1.bf16.msra.mxu1 %v6462_v7  ;;  %v2400_v24 = vmax.f32 %v5684_v19, 0.0  ;;  %v2405_v57 = vmax.f32 %v5655_v11, 0.0 }
 0x32f   :  { %v2460_v22 = vmax.f32 %v2388_v10, %v2391_v41  ;;  %v2397_v15 = vmax.f32 %v5715_v62, 0.0  ;;  %3529 = vmatprep.subr.bf16.mxu0 %v6461_v27  ;;  %3755 = vmatprep.subr.bf16.mxu1 %v6467_v37  ;;  %v2406_v41 = vmax.f32 %v5686_v1, 0.0 }
 0x330   :  { %v2462_v51 = vmax.f32 %v2393_v26, %v2396_v23 }
 0x331   :  { %v2463_v12 = vmax.f32 %v2394_v43, %v2397_v15  ;;  %v2309_v61 = vpop.f32.mrb[84].mxu1 }
 0x332   :  { %v5716_v25 = vadd.f32 %v2309_v61, %v7535_v32  ;;  %v2311_v50 = vpop.f32.mrb[85].mxu1  ;;  %v7640_v7 = vpack.c.bf16 %v2462_v51, %v2459_v38  ;;  %3530 = vmatpush1.bf16.msra.mxu0 %v6459_v44  ;;  %3756 = vmatpush1.bf16.msra.mxu1 %v6465_v45  ;;  %v5657_v38 = vadd.f32 %v7498_v55, %v7527_v3 }
 0x333   :  { %v5717_v28 = vadd.f32 %v2311_v50, %v7539_v14  ;;  %v2313_v13 = vpop.f32.mrb[86].mxu1  ;;  %3854 = vmatprep.subr.bf16.mxu0 %v6470_v33  ;;  %v7645_v60 = vpack.c.bf16 %v2463_v12, %v2460_v22  ;;  %v5688_v44 = vadd.f32 %v7495_v20, %v7531_v17  ;;  %v5659_v22 = vadd.f32 %v7506_v18, %v7527_v3 }
 0x334   :  { %v2402_v27 = vmax.f32 %v5716_v25, 0.0  ;;  %v5718_v35 = vadd.f32 %v2313_v13, %v7535_v32  ;;  %v2315_v37 = vpop.f32.mrb[87].mxu1  ;;  %3474 = vmatprep.mubr.bf16.mxu0 %v7640_v7  ;;  %3700 = vmatprep.mubr.bf16.mxu1 %v7640_v7  ;;  %v5690_v51 = vadd.f32 %v7501_v29, %v7531_v17  ;;  %v2411_v61 = vmax.f32 %v5657_v38, 0.0 }
 0x335   :  { %v2403_v21 = vmax.f32 %v5717_v28, 0.0  ;;  %v5719_v5 = vadd.f32 %v2315_v37, %v7539_v14  ;;  %3475 = vmatmul.mubr.bf16.gmra.mrb[112].mxu0 %v7489_v58  ;;  %3701 = vmatmul.mubr.bf16.gmra.mrb[112].mxu1 %v7489_v58  ;;  %v2412_v18 = vmax.f32 %v5688_v44, 0.0  ;;  %v2417_v29 = vmax.f32 %v5659_v22, 0.0 }
 0x336   :  { %v2465_v30 = vmax.f32 %v2399_v54, %v2402_v27  ;;  %v2408_v10 = vmax.f32 %v5718_v35, 0.0  ;;  %v2418_v54 = vmax.f32 %v5690_v51, 0.0  ;;  %v5661_v37 = vadd.f32 %v7512_v4, %v7527_v3 }
 0x337   :  { %v2466_v62 = vmax.f32 %v2400_v24, %v2403_v21  ;;  %v2409_v26 = vmax.f32 %v5719_v5, 0.0  ;;  %v5692_v21 = vadd.f32 %v7509_v16, %v7531_v17 }
 0x338   :  { %v2468_v23 = vmax.f32 %v2405_v57, %v2408_v10  ;;  %v2423_v44 = vmax.f32 %v5661_v37, 0.0  ;;  %v6486_v37 = vld [vmem:[#allocation8 + $0x130] ss:$24 sps:$4 sm:$0xff]  }
 0x339   :  { %v2469_v45 = vmax.f32 %v2406_v41, %v2409_v26  ;;  %v2319_v43 = vpop.f32.mrb[88].mxu1  ;;  %v5694_v26 = vadd.f32 %v7515_v59, %v7531_v17 }
 0x33a   :  { %v5720_v15 = vadd.f32 %v2319_v43, %v7535_v32  ;;  %v2321_v33 = vpop.f32.mrb[89].mxu1  ;;  %v7660_v39 = vpack.c.bf16 %v2468_v23, %v2465_v30  ;;  %v5663_v30 = vadd.f32 %v7520_v31, %v7527_v3  ;;  %v2424_v31 = vmax.f32 %v5692_v21, 0.0  ;;  %v6489_v21 = vld [vmem:[#allocation8 + $0x160] ss:$24 sps:$4 sm:$0xff]  }
 0x33b   :  { %v5721_v19 = vadd.f32 %v2321_v33, %v7539_v14  ;;  %v2323_v55 = vpop.f32.mrb[90].mxu1  ;;  %v7665_v12 = vpack.c.bf16 %v2469_v45, %v2466_v62  ;;  %v2430_v33 = vmax.f32 %v5694_v26, 0.0  ;;  %v6498_v26 = vld [vmem:[#allocation8 + $0x1f0] ss:$24 sps:$4 sm:$0xff]  }
 0x33c   :  { %v2414_v20 = vmax.f32 %v5720_v15, 0.0  ;;  %v5722_v11 = vadd.f32 %v2323_v55, %v7535_v32  ;;  %v2325_v25 = vpop.f32.mrb[91].mxu1  ;;  %3484 = vmatprep.mubr.bf16.mxu0 %v7660_v39  ;;  %3710 = vmatprep.mubr.bf16.mxu1 %v7660_v39  ;;  %v2429_v59 = vmax.f32 %v5663_v30, 0.0  ;;  %v6497_v30 = vld [vmem:[#allocation8 + $0x1c4] ss:$24 sps:$4 sm:$0xff]  }
 0x33d   :  { %v2415_v50 = vmax.f32 %v5721_v19, 0.0  ;;  %v5723_v1 = vadd.f32 %v2325_v25, %v7539_v14  ;;  %3485 = vmatmul.mubr.bf16.gmra.mrb[116].mxu0 %v7503_v6  ;;  %3711 = vmatmul.mubr.bf16.gmra.mrb[116].mxu1 %v7503_v6  ;;  %v6471_v25 = vld [vmem:[#allocation8 + $0x40] ss:$24 sps:$4 sm:$0xff]  }
 0x33e   :  { %v2471_v28 = vmax.f32 %v2411_v61, %v2414_v20  ;;  %v2420_v13 = vmax.f32 %v5722_v11, 0.0  ;;  %v6473_v11 = vld [vmem:[#allocation8 + $0x44] ss:$24 sps:$4 sm:$0xff]  }
 0x33f   :  { %v2472_v27 = vmax.f32 %v2412_v18, %v2415_v50  ;;  %v2421_v35 = vmax.f32 %v5723_v1, 0.0  ;;  %v6476_v18 = vld [vmem:[#allocation8 + $0x74] ss:$24 sps:$4 sm:$0xff]   ;;  %v6474_v50 = vld [vmem:[#allocation8 + $0x70] ss:$24 sps:$4 sm:$0xff]  }
 0x340   :  { %v2474_v24 = vmax.f32 %v2417_v29, %v2420_v13  ;;  %v6479_v1 = vld [vmem:[#allocation8 + $0xa4] ss:$24 sps:$4 sm:$0xff]   ;;  %v6477_v29 = vld [vmem:[#allocation8 + $0xa0] ss:$24 sps:$4 sm:$0xff]   ;;  %v6480_v13 = vld [vmem:[#allocation8 + $0xd0] ss:$24 sps:$4 sm:$0xff]  }
 0x341   :  { %v2475_v5 = vmax.f32 %v2418_v54, %v2421_v35  ;;  %v2329_v57 = vpop.f32.mrb[92].mxu1  ;;  %v6485_v54 = vld [vmem:[#allocation8 + $0x104] ss:$24 sps:$4 sm:$0xff]   ;;  %v6488_v35 = vld [vmem:[#allocation8 + $0x134] ss:$24 sps:$4 sm:$0xff]  }
 0x342   :  { %v5724_v10 = vadd.f32 %v2329_v57, %v7535_v32  ;;  %v2331_v41 = vpop.f32.mrb[93].mxu1  ;;  %v7680_v62 = vpack.c.bf16 %v2474_v24, %v2471_v28  ;;  %v6482_v28 = vld [vmem:[#allocation8 + $0xd4] ss:$24 sps:$4 sm:$0xff]   ;;  %v6491_v24 = vld [vmem:[#allocation8 + $0x164] ss:$24 sps:$4 sm:$0xff]  }
 0x343   :  { %v5725_v38 = vadd.f32 %v2331_v41, %v7539_v14  ;;  %v2333_v4 = vpop.f32.mrb[94].mxu1  ;;  %v7685_v23 = vpack.c.bf16 %v2475_v5, %v2472_v27  ;;  %v6483_v27 = vld [vmem:[#allocation8 + $0x100] ss:$24 sps:$4 sm:$0xff]   ;;  %v6494_v5 = vld [vmem:[#allocation8 + $0x194] ss:$24 sps:$4 sm:$0xff]  }
 0x344   :  { %v2426_v16 = vmax.f32 %v5724_v10, 0.0  ;;  %v5726_v45 = vadd.f32 %v2333_v4, %v7535_v32  ;;  %v2335_v43 = vpop.f32.mrb[95].mxu1  ;;  %3494 = vmatprep.mubr.bf16.mxu0 %v7680_v62  ;;  %3720 = vmatprep.mubr.bf16.mxu1 %v7680_v62  ;;  %v6492_v57 = vld [vmem:[#allocation8 + $0x190] ss:$24 sps:$4 sm:$0xff]   ;;  %v6495_v10 = vld [vmem:[#allocation8 + $0x1c0] ss:$24 sps:$4 sm:$0xff]  }
 0x345   :  { %v2427_v3 = vmax.f32 %v5725_v38, 0.0  ;;  %v5727_v22 = vadd.f32 %v2335_v43, %v7539_v14  ;;  %3495 = vmatmul.mubr.bf16.gmra.mrb[120].mxu0 %v7517_v46  ;;  %3721 = vmatmul.mubr.bf16.gmra.mrb[120].mxu1 %v7517_v46  ;;  %v6468_v14 = vld [vmem:[#allocation8 + $0x10] ss:$24 sps:$4 sm:$0xff]   ;;  %v6500_v41 = vld [vmem:[#allocation8 + $0x1f4] ss:$24 sps:$4 sm:$0xff]  }
 0x346   :  { %v2477_v17 = vmax.f32 %v2423_v44, %v2426_v16  ;;  %v2432_v15 = vmax.f32 %v5726_v45, 0.0  ;;  %v6503_v38 = vld [vmem:[#allocation8 + $0x224] ss:$24 sps:$4 sm:$0xff]   ;;  %v6501_v4 = vld [vmem:[#allocation8 + $0x220] ss:$24 sps:$4 sm:$0xff]  }
 0x347   :  { %v2478_v51 = vmax.f32 %v2424_v31, %v2427_v3  ;;  %v2433_v19 = vmax.f32 %v5727_v22, 0.0  ;;  %v6506_v44 = vld [vmem:[#allocation8 + $0x254] ss:$24 sps:$4 sm:$0xff]   ;;  %v6504_v16 = vld [vmem:[#allocation8 + $0x250] ss:$24 sps:$4 sm:$0xff]  }
 0x348   :  { %v2480_v32 = vmax.f32 %v2429_v59, %v2432_v15  ;;  %v6509_v45 = vld [vmem:[#allocation8 + $0x284] ss:$24 sps:$4 sm:$0xff]   ;;  %v6507_v43 = vld [vmem:[#allocation8 + $0x280] ss:$24 sps:$4 sm:$0xff]   ;;  %v6512_v31 = vld [vmem:[#allocation8 + $0x2b4] ss:$24 sps:$4 sm:$0xff]  }
 0x349   :  { %v2481_v55 = vmax.f32 %v2430_v33, %v2433_v19  ;;  %v6510_v3 = vld [vmem:[#allocation8 + $0x2b0] ss:$24 sps:$4 sm:$0xff]   ;;  %v6515_v22 = vld [vmem:[#allocation8 + $0x2e4] ss:$24 sps:$4 sm:$0xff]   ;;  %v6513_v59 = vld [vmem:[#allocation8 + $0x2e0] ss:$24 sps:$4 sm:$0xff]  }
 0x34a   :  { %v7693_v61 = vpack.c.bf16 %v2480_v32, %v2477_v17  ;;  %v6518_v17 = vld [vmem:[#allocation8 + $0x314] ss:$24 sps:$4 sm:$0xff]   ;;  %v6516_v15 = vld [vmem:[#allocation8 + $0x310] ss:$24 sps:$4 sm:$0xff]   ;;  %v6521_v33 = vld [vmem:[#allocation8 + $0x344] ss:$24 sps:$4 sm:$0xff]  }
 0x34b   :  { %v7695_v20 = vpack.c.bf16 %v2481_v55, %v2478_v51  ;;  %v6519_v51 = vld [vmem:[#allocation8 + $0x340] ss:$24 sps:$4 sm:$0xff]   ;;  %v6524_v19 = vld [vmem:[#allocation8 + $0x374] ss:$24 sps:$4 sm:$0xff]   ;;  %v6522_v32 = vld [vmem:[#allocation8 + $0x370] ss:$24 sps:$4 sm:$0xff]  }
 0x34c   :  { %3504 = vmatprep.mubr.bf16.mxu0 %v7693_v61  ;;  %3730 = vmatprep.mubr.bf16.mxu1 %v7693_v61  ;;  %v6527_v55 = vld [vmem:[#allocation8 + $0x3a4] ss:$24 sps:$4 sm:$0xff]  }
 0x34d   :  { %3505 = vmatmul.mubr.bf16.gmra.mrb[124].mxu0 %v7523_v2  ;;  %3731 = vmatmul.mubr.bf16.gmra.mrb[124].mxu1 %v7523_v2 }
 0x34e   :  { %3547 = vmatprep.mubr.bf16.mxu0 %v8290_v8  ;;  %3773 = vmatprep.mubr.bf16.mxu1 %v8290_v8 }
 0x355   :  { %3548 = vmatmul.mubr.bf16.vlgmr.msra.gmra.mrb[96].mxu0 %v7564_v63  ;;  %3774 = vmatmul.mubr.bf16.vlgmr.msra.gmra.mrb[96].mxu1 %v7564_v63 }
 0x356   :  { %3855 = vmatpush1.bf16.msra.mxu0 %v6468_v14  ;;  %3557 = vmatprep.mubr.bf16.mxu0 %v8290_v8  ;;  %v6530_v14 = vld [vmem:[#allocation8 + $0x3d4] ss:$24 sps:$4 sm:$0xff]  }
 0x357   :  { %3856 = vmatprep.subr.bf16.mxu0 %v6473_v11  ;;  %3783 = vmatprep.mubr.bf16.mxu1 %v8290_v8  ;;  %v6531_v11 = vld [vmem:[#allocation8 + $0x400] ss:$24 sps:$4 sm:$0xff]  }
 0x35a   :  { %3857 = vmatpush1.bf16.msra.mxu0 %v6471_v25  ;;  %v6536_v25 = vld [vmem:[#allocation8 + $0x434] ss:$24 sps:$4 sm:$0xff]  }
 0x35b   :  { %3858 = vmatprep.subr.bf16.mxu0 %v6476_v18  ;;  %v6537_v18 = vld [vmem:[#allocation8 + $0x460] ss:$24 sps:$4 sm:$0xff]  }
 0x35d   :  { %3558 = vmatmul.mubr.bf16.gmra.mrb[100].mxu0 %v7585_v36  ;;  %3784 = vmatmul.mubr.bf16.gmra.mrb[100].mxu1 %v7585_v36 }
 0x35e   :  { %3859 = vmatpush1.bf16.msra.mxu0 %v6474_v50  ;;  %3567 = vmatprep.mubr.bf16.mxu0 %v8290_v8  ;;  %v6566_v50 = vld [vmem:[#allocation9 + $0x84] ss:$8 sps:$4 sm:$0xff]  }
 0x35f   :  { %3860 = vmatprep.subr.bf16.mxu0 %v6479_v1  ;;  %3793 = vmatprep.mubr.bf16.mxu1 %v8290_v8  ;;  %v6564_v1 = vld [vmem:[#allocation9 + $0x80] ss:$8 sps:$4 sm:$0xff]  }
 0x362   :  { %3861 = vmatpush1.bf16.msra.mxu0 %v6477_v29  ;;  %v6569_v29 = vld [vmem:[#allocation9 + $0x94] ss:$8 sps:$4 sm:$0xff]  }
 0x363   :  { %3862 = vmatprep.subr.bf16.mxu0 %v6482_v28  ;;  %v6572_v28 = vld [vmem:[#allocation9 + $0xa4] ss:$8 sps:$4 sm:$0xff]  }
 0x365   :  { %3568 = vmatmul.mubr.bf16.gmra.mrb[104].mxu0 %v7605_v40  ;;  %3794 = vmatmul.mubr.bf16.gmra.mrb[104].mxu1 %v7605_v40 }
 0x366   :  { %3863 = vmatpush1.bf16.msra.mxu0 %v6480_v13  ;;  %3577 = vmatprep.mubr.bf16.mxu0 %v8290_v8  ;;  %v6570_v13 = vld [vmem:[#allocation9 + $0xa0] ss:$8 sps:$4 sm:$0xff]  }
 0x367   :  { %3864 = vmatprep.subr.bf16.mxu0 %v6485_v54  ;;  %3803 = vmatprep.mubr.bf16.mxu1 %v8290_v8  ;;  %v6575_v54 = vld [vmem:[#allocation9 + $0xb4] ss:$8 sps:$4 sm:$0xff]  }
 0x36a   :  { %3865 = vmatpush1.bf16.msra.mxu0 %v6483_v27  ;;  %v6573_v27 = vld [vmem:[#allocation9 + $0xb0] ss:$8 sps:$4 sm:$0xff]  }
 0x36b   :  { %3866 = vmatprep.subr.bf16.mxu0 %v6488_v35  ;;  %v6576_v35 = vld [vmem:[#allocation9 + $0xc0] ss:$8 sps:$4 sm:$0xff]  }
 0x36d   :  { %3578 = vmatmul.mubr.bf16.gmra.mrb[108].mxu0 %v7625_v42  ;;  %3804 = vmatmul.mubr.bf16.gmra.mrb[108].mxu1 %v7625_v42 }
 0x36e   :  { %3867 = vmatpush1.bf16.msra.mxu0 %v6486_v37  ;;  %3587 = vmatprep.mubr.bf16.mxu0 %v8290_v8  ;;  %v7768_v37 = vld [vmem:[%s8258_s6] sm:$0x3f] }
 0x36f   :  { %3868 = vmatprep.subr.bf16.mxu0 %v6491_v24  ;;  %3813 = vmatprep.mubr.bf16.mxu1 %v8290_v8  ;;  %v8295_v24 = vld [vmem:[#allocation17_spill] sm:$0xff] }
 0x372   :  { %3869 = vmatpush1.bf16.msra.mxu0 %v6489_v21  ;;  %v7776_v21 = vrot.slane %v7768_v37, %v8295_v24 }
 0x373   :  { %3870 = vmatprep.subr.bf16.mxu0 %v6494_v5  ;;  %v6581_v5 = vld [vmem:[#allocation9 + $0xd4] ss:$8 sps:$4 sm:$0xff]  }
 0x375   :  { %3588 = vmatmul.mubr.bf16.gmra.mrb[112].mxu0 %v7645_v60  ;;  %3814 = vmatmul.mubr.bf16.gmra.mrb[112].mxu1 %v7645_v60 }
 0x376   :  { %3871 = vmatpush1.bf16.msra.mxu0 %v6492_v57  ;;  %3597 = vmatprep.mubr.bf16.mxu0 %v8290_v8  ;;  %v6579_v57 = vld [vmem:[#allocation9 + $0xd0] ss:$8 sps:$4 sm:$0xff]  }
 0x377   :  { %3872 = vmatprep.subr.bf16.mxu0 %v6497_v30  ;;  %3823 = vmatprep.mubr.bf16.mxu1 %v8290_v8 }
 0x37a   :  { %3873 = vmatpush1.bf16.msra.mxu0 %v6495_v10 }
 0x37b   :  { %3874 = vmatprep.subr.bf16.mxu0 %v6500_v41 }
 0x37d   :  { %3598 = vmatmul.mubr.bf16.gmra.mrb[116].mxu0 %v7665_v12  ;;  %3824 = vmatmul.mubr.bf16.gmra.mrb[116].mxu1 %v7665_v12 }
 0x37e   :  { %3875 = vmatpush1.bf16.msra.mxu0 %v6498_v26  ;;  %3607 = vmatprep.mubr.bf16.mxu0 %v8290_v8 }
 0x37f   :  { %3876 = vmatprep.subr.bf16.mxu0 %v6503_v38  ;;  %3833 = vmatprep.mubr.bf16.mxu1 %v8290_v8 }
 0x382   :  { %3877 = vmatpush1.bf16.msra.mxu0 %v6501_v4 }
 0x383   :  { %3878 = vmatprep.subr.bf16.mxu0 %v6506_v44 }
 0x385   :  { %3608 = vmatmul.mubr.bf16.gmra.mrb[120].mxu0 %v7685_v23  ;;  %3834 = vmatmul.mubr.bf16.gmra.mrb[120].mxu1 %v7685_v23 }
 0x386   :  { %3879 = vmatpush1.bf16.msra.mxu0 %v6504_v16  ;;  %3617 = vmatprep.mubr.bf16.mxu0 %v8290_v8 }
 0x387   :  { %3880 = vmatprep.subr.bf16.mxu0 %v6509_v45  ;;  %3843 = vmatprep.mubr.bf16.mxu1 %v8290_v8  ;;  %v6584_v45 = vld [vmem:[#allocation9 + $0xe4] ss:$8 sps:$4 sm:$0xff]  }
 0x38a   :  { %3881 = vmatpush1.bf16.msra.mxu0 %v6507_v43 }
 0x38b   :  { %3882 = vmatprep.subr.bf16.mxu0 %v6512_v31 }
 0x38d   :  { %3618 = vmatmul.mubr.bf16.gmra.mrb[124].mxu0 %v7695_v20  ;;  %3844 = vmatmul.mubr.bf16.gmra.mrb[124].mxu1 %v7695_v20 }
 0x38e   :  { %3883 = vmatpush1.bf16.msra.mxu0 %v6510_v3  ;;  %3886 = vmatprep.mubr.bf16.mxu0 %v7560_v48  ;;  %v6525_v48 = vld [vmem:[#allocation8 + $0x3a0] ss:$24 sps:$4 sm:$0xff]  }
 0x38f   :  { %3884 = vmatprep.subr.bf16.mxu0 %v6515_v22 }
 0x392   :  { %3885 = vmatpush1.bf16.msra.mxu0 %v6513_v59  ;;  %v6582_v59 = vld [vmem:[#allocation9 + $0xe0] ss:$8 sps:$4 sm:$0xff]  }
 0x393   :  { %3967 = vmatprep.subr.bf16.mxu0 %v6518_v17 }
 0x395   :  { %3887 = vmatmul.mubr.bf16.vlgmr.msra.gmra.mrb[128].mxu0 %v7430_v47  ;;  %v6528_v47 = vld [vmem:[#allocation8 + $0x3d0] ss:$24 sps:$4 sm:$0xff]  }
 0x396   :  { %3896 = vmatprep.mubr.bf16.mxu0 %v7580_v9  ;;  %3968 = vmatpush1.bf16.msra.mxu0 %v6516_v15  ;;  %v6533_v9 = vld [vmem:[#allocation8 + $0x404] ss:$24 sps:$4 sm:$0xff]  }
 0x397   :  { %3969 = vmatprep.subr.bf16.mxu0 %v6521_v33 }
 0x39a   :  { %3970 = vmatpush1.bf16.msra.mxu0 %v6519_v51 }
 0x39b   :  { %3971 = vmatprep.subr.bf16.mxu0 %v6524_v19 }
 0x39d   :  { %3897 = vmatmul.mubr.bf16.gmra.mrb[132].mxu0 %v7447_v0  ;;  %v6534_v0 = vld [vmem:[#allocation8 + $0x430] ss:$24 sps:$4 sm:$0xff]  }
 0x39e   :  { %3906 = vmatprep.mubr.bf16.mxu0 %v7600_v34  ;;  %3972 = vmatpush1.bf16.msra.mxu0 %v6522_v32  ;;  %v6539_v34 = vld [vmem:[#allocation8 + $0x464] ss:$24 sps:$4 sm:$0xff]  }
 0x39f   :  { %3973 = vmatprep.subr.bf16.mxu0 %v6527_v55  ;;  %v6587_v32 = vld [vmem:[#allocation9 + $0xf4] ss:$8 sps:$4 sm:$0xff]   ;;  %v6585_v55 = vld [vmem:[#allocation9 + $0xf0] ss:$8 sps:$4 sm:$0xff]  }
 0x3a2   :  { %3974 = vmatpush1.bf16.msra.mxu0 %v6525_v48 }
 0x3a3   :  { %3975 = vmatprep.subr.bf16.mxu0 %v6530_v14 }
 0x3a5   :  { %3907 = vmatmul.mubr.bf16.gmra.mrb[136].mxu0 %v7461_v53  ;;  %v6540_v53 = vld [vmem:[#allocation9] ss:$8 sps:$4 sm:$0xff]  }
 0x3a6   :  { %3916 = vmatprep.mubr.bf16.mxu0 %v7620_v52  ;;  %3976 = vmatpush1.bf16.msra.mxu0 %v6528_v47  ;;  %v6552_v52 = vld [vmem:[#allocation9 + $0x40] ss:$8 sps:$4 sm:$0xff]  }
 0x3a7   :  { %3977 = vmatprep.subr.bf16.mxu0 %v6533_v9 }
 0x3aa   :  { %3978 = vmatpush1.bf16.msra.mxu0 %v6531_v11 }
 0x3ab   :  { %3979 = vmatprep.subr.bf16.mxu0 %v6536_v25 }
 0x3ad   :  { %3917 = vmatmul.mubr.bf16.gmra.mrb[140].mxu0 %v7475_v56  ;;  %v6542_v56 = vld [vmem:[#allocation9 + $0x4] ss:$8 sps:$4 sm:$0xff]  }
 0x3ae   :  { %3926 = vmatprep.mubr.bf16.mxu0 %v7640_v7  ;;  %3980 = vmatpush1.bf16.msra.mxu0 %v6534_v0  ;;  %v6557_v7 = vld [vmem:[#allocation9 + $0x54] ss:$8 sps:$4 sm:$0xff]  }
 0x3af   :  { %3981 = vmatprep.subr.bf16.mxu0 %v6539_v34  ;;  %4548 = vmatprep.subr.bf16.mxu1 %v6542_v56 }
 0x3b0   :  { %4549 = vmatpush1.bf16.msra.mxu1 %v6540_v53 }
 0x3b2   :  { %3982 = vmatpush1.bf16.msra.mxu0 %v6537_v18 }
 0x3b5   :  { %3927 = vmatmul.mubr.bf16.gmra.mrb[144].mxu0 %v7489_v58  ;;  %v6545_v58 = vld [vmem:[#allocation9 + $0x14] ss:$8 sps:$4 sm:$0xff]  }
 0x3b6   :  { %3936 = vmatprep.mubr.bf16.mxu0 %v7660_v39  ;;  %4550 = vmatprep.subr.bf16.mxu1 %v6545_v58  ;;  %v6560_v39 = vld [vmem:[#allocation9 + $0x64] ss:$8 sps:$4 sm:$0xff]  }
 0x3bd   :  { %3937 = vmatmul.mubr.bf16.gmra.mrb[148].mxu0 %v7503_v6  ;;  %v6543_v6 = vld [vmem:[#allocation9 + $0x10] ss:$8 sps:$4 sm:$0xff]  }
 0x3be   :  { %3946 = vmatprep.mubr.bf16.mxu0 %v7680_v62  ;;  %4551 = vmatpush1.bf16.msra.mxu1 %v6543_v6  ;;  %v6558_v62 = vld [vmem:[#allocation9 + $0x60] ss:$8 sps:$4 sm:$0xff]  }
 0x3c5   :  { %3947 = vmatmul.mubr.bf16.gmra.mrb[152].mxu0 %v7517_v46  ;;  %v6548_v46 = vld [vmem:[#allocation9 + $0x24] ss:$8 sps:$4 sm:$0xff]  }
 0x3c6   :  { %3956 = vmatprep.mubr.bf16.mxu0 %v7693_v61  ;;  %4552 = vmatprep.subr.bf16.mxu1 %v6548_v46  ;;  %v6563_v61 = vld [vmem:[#allocation9 + $0x74] ss:$8 sps:$4 sm:$0xff]  }
 0x3cd   :  { %3957 = vmatmul.mubr.bf16.gmra.mrb[156].mxu0 %v7523_v2  ;;  %v6546_v2 = vld [vmem:[#allocation9 + $0x20] ss:$8 sps:$4 sm:$0xff]  }
 0x3ce   :  { %3999 = vmatprep.mubr.bf16.mxu0 %v8290_v8  ;;  %4553 = vmatpush1.bf16.msra.mxu1 %v6546_v2 }
 0x3d5   :  { %4000 = vmatmul.mubr.bf16.vlgmr.msra.gmra.mrb[128].mxu0 %v7564_v63  ;;  %v6551_v63 = vld [vmem:[#allocation9 + $0x34] ss:$8 sps:$4 sm:$0xff]  }
 0x3d6   :  { %4009 = vmatprep.mubr.bf16.mxu0 %v8290_v8  ;;  %4554 = vmatprep.subr.bf16.mxu1 %v6551_v63 }
 0x3dd   :  { %4010 = vmatmul.mubr.bf16.gmra.mrb[132].mxu0 %v7585_v36  ;;  %v6549_v36 = vld [vmem:[#allocation9 + $0x30] ss:$8 sps:$4 sm:$0xff]  }
 0x3de   :  { %4019 = vmatprep.mubr.bf16.mxu0 %v8290_v8  ;;  %4555 = vmatpush1.bf16.msra.mxu1 %v6549_v36 }
 0x3e5   :  { %4020 = vmatmul.mubr.bf16.gmra.mrb[136].mxu0 %v7605_v40  ;;  %v6554_v40 = vld [vmem:[#allocation9 + $0x44] ss:$8 sps:$4 sm:$0xff]  }
 0x3e6   :  { %4029 = vmatprep.mubr.bf16.mxu0 %v8290_v8  ;;  %4556 = vmatprep.subr.bf16.mxu1 %v6554_v40 }
 0x3e7   :  { %4557 = vmatpush1.bf16.msra.mxu1 %v6552_v52 }
 0x3e8   :  { %4558 = vmatprep.subr.bf16.mxu1 %v6557_v7 }
 0x3ed   :  { %4030 = vmatmul.mubr.bf16.gmra.mrb[140].mxu0 %v7625_v42  ;;  %v6555_v42 = vld [vmem:[#allocation9 + $0x50] ss:$8 sps:$4 sm:$0xff]  }
 0x3ee   :  { %4039 = vmatprep.mubr.bf16.mxu0 %v8290_v8  ;;  %4559 = vmatpush1.bf16.msra.mxu1 %v6555_v42 }
 0x3ef   :  { %4560 = vmatprep.subr.bf16.mxu1 %v6560_v39 }
 0x3f2   :  { %4561 = vmatpush1.bf16.msra.mxu1 %v6558_v62  ;;  %v6590_v62 = vld [vmem:[#allocation9 + $0x104] ss:$8 sps:$4 sm:$0xff]  }
 0x3f3   :  { %4562 = vmatprep.subr.bf16.mxu1 %v6563_v61 }
 0x3f5   :  { %4040 = vmatmul.mubr.bf16.gmra.mrb[144].mxu0 %v7645_v60  ;;  %v6561_v60 = vld [vmem:[#allocation9 + $0x70] ss:$8 sps:$4 sm:$0xff]  }
 0x3f6   :  { %4049 = vmatprep.mubr.bf16.mxu0 %v8290_v8  ;;  %4563 = vmatpush1.bf16.msra.mxu1 %v6561_v60 }
 0x3f7   :  { %4564 = vmatprep.subr.bf16.mxu1 %v6566_v50 }
 0x3fa   :  { %4565 = vmatpush1.bf16.msra.mxu1 %v6564_v1 }
 0x3fb   :  { %4566 = vmatprep.subr.bf16.mxu1 %v6569_v29 }
 0x3fd   :  { %4050 = vmatmul.mubr.bf16.gmra.mrb[148].mxu0 %v7665_v12  ;;  %v6567_v12 = vld [vmem:[#allocation9 + $0x90] ss:$8 sps:$4 sm:$0xff]  }
 0x3fe   :  { %4059 = vmatprep.mubr.bf16.mxu0 %v8290_v8  ;;  %4567 = vmatpush1.bf16.msra.mxu1 %v6567_v12 }
 0x3ff   :  { %4568 = vmatprep.subr.bf16.mxu1 %v6572_v28 }
 0x402   :  { %4569 = vmatpush1.bf16.msra.mxu1 %v6570_v13 }
 0x403   :  { %4570 = vmatprep.subr.bf16.mxu1 %v6575_v54 }
 0x405   :  { %4060 = vmatmul.mubr.bf16.gmra.mrb[152].mxu0 %v7685_v23  ;;  %v6578_v23 = vld [vmem:[#allocation9 + $0xc4] ss:$8 sps:$4 sm:$0xff]  }
 0x406   :  { %4069 = vmatprep.mubr.bf16.mxu0 %v8290_v8  ;;  %4571 = vmatpush1.bf16.msra.mxu1 %v6573_v27  ;;  %v8301_v8 = vld [vmem:[#allocation19_spill] sm:$0xff] }
 0x407   :  { %4572 = vmatprep.subr.bf16.mxu1 %v6578_v23 }
 0x40a   :  { %4573 = vmatpush1.bf16.msra.mxu1 %v6576_v35 }
 0x40b   :  { %4574 = vmatprep.subr.bf16.mxu1 %v6581_v5 }
 0x40d   :  { %4070 = vmatmul.mubr.bf16.gmra.mrb[156].mxu0 %v7695_v20  ;;  %v7772_v20 = vrot.slane %v7768_v37, %v7018_v49 }
 0x40e   :  { %4575 = vmatpush1.bf16.msra.mxu1 %v6579_v57 }
 0x40f   :  { %4576 = vmatprep.subr.bf16.mxu1 %v6584_v45 }
 0x412   :  { %4577 = vmatpush1.bf16.msra.mxu1 %v6582_v59 }
 0x413   :  { %4578 = vmatprep.subr.bf16.mxu1 %v6587_v32 }
 0x416   :  { %4579 = vmatpush1.bf16.msra.mxu1 %v6585_v55 }
 0x417   :  { %4661 = vmatprep.subr.bf16.mxu1 %v6590_v62 }
 0x428   :  { %v3549_v30 = vpop.f32.mrb[96].mxu0  ;;  %v7778_v10 = vpop.f32.mrb[96].mxu1 }
 0x429   :  { %v5728_v41 = vadd.f32 %v3549_v30, %v7772_v20  ;;  %v7781_v26 = vpop.f32.mrb[97].mxu0  ;;  %v3777_v38 = vpop.f32.mrb[97].mxu1 }
 0x42a   :  { %v5761_v4 = vadd.f32 %v3777_v38, %v7776_v21  ;;  %v3553_v44 = vpop.f32.mrb[98].mxu0  ;;  %v7784_v16 = vpop.f32.mrb[98].mxu1 }
 0x42b   :  { %v4080_v43 = vmax.f32 %v5728_v41, 0.0  ;;  %v5730_v31 = vadd.f32 %v3553_v44, %v7772_v20  ;;  %v7787_v3 = vpop.f32.mrb[99].mxu0  ;;  %v3781_v22 = vpop.f32.mrb[99].mxu1 }
 0x42c   :  { %v4083_v17 = vmax.f32 %v5761_v4, 0.0  ;;  %v5763_v15 = vadd.f32 %v3781_v22, %v7776_v21 }
 0x42d   :  { %v4086_v33 = vmax.f32 %v5730_v31, 0.0 }
 0x42e   :  { %v7790_v51 = vmax.f32 %v4080_v43, %v4083_v17  ;;  %v4089_v19 = vmax.f32 %v5763_v15, 0.0 }
 0x430   :  { %v7792_v48 = vmax.f32 %v4086_v33, %v4089_v19  ;;  %v3559_v14 = vpop.f32.mrb[100].mxu0  ;;  %v7794_v47 = vpop.f32.mrb[100].mxu1 }
 0x431   :  { %v5732_v9 = vadd.f32 %v3559_v14, %v7772_v20  ;;  %v7797_v11 = vpop.f32.mrb[101].mxu0  ;;  %v3787_v25 = vpop.f32.mrb[101].mxu1 }
 0x432   :  { %v5765_v34 = vadd.f32 %v3787_v25, %v7776_v21  ;;  %v3563_v18 = vpop.f32.mrb[102].mxu0  ;;  %v7802_v53 = vpop.f32.mrb[102].mxu1 }
 0x433   :  { %v4092_v56 = vmax.f32 %v5732_v9, 0.0  ;;  %v5734_v58 = vadd.f32 %v3563_v18, %v7772_v20  ;;  %v7805_v6 = vpop.f32.mrb[103].mxu0  ;;  %v3791_v46 = vpop.f32.mrb[103].mxu1 }
 0x434   :  { %v4095_v2 = vmax.f32 %v5765_v34, 0.0  ;;  %v5767_v63 = vadd.f32 %v3791_v46, %v7776_v21 }
 0x435   :  { %v4098_v36 = vmax.f32 %v5734_v58, 0.0 }
 0x436   :  { %v7808_v40 = vmax.f32 %v4092_v56, %v4095_v2  ;;  %v4101_v52 = vmax.f32 %v5767_v63, 0.0 }
 0x438   :  { %v7810_v7 = vmax.f32 %v4098_v36, %v4101_v52  ;;  %v3569_v42 = vpop.f32.mrb[104].mxu0  ;;  %v7812_v39 = vpop.f32.mrb[104].mxu1 }
 0x439   :  { %v5736_v61 = vadd.f32 %v3569_v42, %v7772_v20  ;;  %v7815_v60 = vpop.f32.mrb[105].mxu0  ;;  %v3797_v50 = vpop.f32.mrb[105].mxu1 }
 0x43a   :  { %v5769_v1 = vadd.f32 %v3797_v50, %v7776_v21  ;;  %v3573_v29 = vpop.f32.mrb[106].mxu0  ;;  %v7818_v12 = vpop.f32.mrb[106].mxu1 }
 0x43b   :  { %v4104_v13 = vmax.f32 %v5736_v61, 0.0  ;;  %v5738_v54 = vadd.f32 %v3573_v29, %v7772_v20  ;;  %v7823_v27 = vpop.f32.mrb[107].mxu0  ;;  %v3801_v23 = vpop.f32.mrb[107].mxu1 }
 0x43c   :  { %v4107_v35 = vmax.f32 %v5769_v1, 0.0  ;;  %v5771_v24 = vadd.f32 %v3801_v23, %v7776_v21 }
 0x43d   :  { %v4110_v5 = vmax.f32 %v5738_v54, 0.0 }
 0x43e   :  { %v7826_v57 = vmax.f32 %v4104_v13, %v4107_v35  ;;  %v4113_v30 = vmax.f32 %v5771_v24, 0.0 }
 0x440   :  { %v7828_v41 = vmax.f32 %v4110_v5, %v4113_v30  ;;  %v3579_v38 = vpop.f32.mrb[108].mxu0  ;;  %v7830_v4 = vpop.f32.mrb[108].mxu1 }
 0x441   :  { %v5740_v44 = vadd.f32 %v3579_v38, %v7772_v20  ;;  %v7833_v45 = vpop.f32.mrb[109].mxu0  ;;  %v3807_v43 = vpop.f32.mrb[109].mxu1 }
 0x442   :  { %v5773_v31 = vadd.f32 %v3807_v43, %v7776_v21  ;;  %v3583_v22 = vpop.f32.mrb[110].mxu0  ;;  %v7836_v59 = vpop.f32.mrb[110].mxu1 }
 0x443   :  { %v4116_v15 = vmax.f32 %v5740_v44, 0.0  ;;  %v5742_v33 = vadd.f32 %v3583_v22, %v7772_v20  ;;  %v7841_v19 = vpop.f32.mrb[111].mxu0  ;;  %v3811_v32 = vpop.f32.mrb[111].mxu1 }
 0x444   :  { %v4119_v55 = vmax.f32 %v5773_v31, 0.0  ;;  %v5775_v14 = vadd.f32 %v3811_v32, %v7776_v21 }
 0x445   :  { %v4122_v9 = vmax.f32 %v5742_v33, 0.0 }
 0x446   :  { %v7844_v25 = vmax.f32 %v4116_v15, %v4119_v55  ;;  %v4125_v34 = vmax.f32 %v5775_v14, 0.0 }
 0x448   :  { %v7846_v18 = vmax.f32 %v4122_v9, %v4125_v34  ;;  %v3589_v56 = vpop.f32.mrb[112].mxu0  ;;  %v7848_v58 = vpop.f32.mrb[112].mxu1 }
 0x449   :  { %v5744_v46 = vadd.f32 %v3589_v56, %v7772_v20  ;;  %v7851_v2 = vpop.f32.mrb[113].mxu0  ;;  %v3817_v63 = vpop.f32.mrb[113].mxu1 }
 0x44a   :  { %v5777_v36 = vadd.f32 %v3817_v63, %v7776_v21  ;;  %v3593_v52 = vpop.f32.mrb[114].mxu0  ;;  %v7854_v42 = vpop.f32.mrb[114].mxu1 }
 0x44b   :  { %v4128_v61 = vmax.f32 %v5744_v46, 0.0  ;;  %v5746_v50 = vadd.f32 %v3593_v52, %v7772_v20  ;;  %v7859_v1 = vpop.f32.mrb[115].mxu0  ;;  %v3821_v29 = vpop.f32.mrb[115].mxu1 }
 0x44c   :  { %v4131_v13 = vmax.f32 %v5777_v36, 0.0  ;;  %v5779_v54 = vadd.f32 %v3821_v29, %v7776_v21 }
 0x44d   :  { %v4134_v23 = vmax.f32 %v5746_v50, 0.0 }
 0x44e   :  { %v7862_v35 = vmax.f32 %v4128_v61, %v4131_v13  ;;  %v4137_v24 = vmax.f32 %v5779_v54, 0.0 }
 0x450   :  { %v7864_v5 = vmax.f32 %v4134_v23, %v4137_v24  ;;  %v3599_v30 = vpop.f32.mrb[116].mxu0  ;;  %v7866_v38 = vpop.f32.mrb[116].mxu1 }
 0x451   :  { %v5748_v44 = vadd.f32 %v3599_v30, %v7772_v20  ;;  %v7869_v43 = vpop.f32.mrb[117].mxu0  ;;  %v3827_v31 = vpop.f32.mrb[117].mxu1 }
 0x452   :  { %v5781_v22 = vadd.f32 %v3827_v31, %v7776_v21  ;;  %v3603_v15 = vpop.f32.mrb[118].mxu0  ;;  %v7872_v33 = vpop.f32.mrb[118].mxu1 }
 0x453   :  { %v4140_v55 = vmax.f32 %v5748_v44, 0.0  ;;  %v5750_v14 = vadd.f32 %v3603_v15, %v7772_v20  ;;  %v7877_v9 = vpop.f32.mrb[119].mxu0  ;;  %v3831_v34 = vpop.f32.mrb[119].mxu1 }
 0x454   :  { %v4143_v56 = vmax.f32 %v5781_v22, 0.0  ;;  %v5783_v46 = vadd.f32 %v3831_v34, %v7776_v21 }
 0x455   :  { %v4146_v63 = vmax.f32 %v5750_v14, 0.0 }
 0x456   :  { %v7880_v36 = vmax.f32 %v4140_v55, %v4143_v56  ;;  %v4149_v52 = vmax.f32 %v5783_v46, 0.0 }
 0x458   :  { %v7882_v61 = vmax.f32 %v4146_v63, %v4149_v52  ;;  %v3609_v50 = vpop.f32.mrb[120].mxu0  ;;  %v7884_v29 = vpop.f32.mrb[120].mxu1 }
 0x459   :  { %v5752_v13 = vadd.f32 %v3609_v50, %v7772_v20  ;;  %v7887_v54 = vpop.f32.mrb[121].mxu0  ;;  %v3837_v23 = vpop.f32.mrb[121].mxu1 }
 0x45a   :  { %v5785_v24 = vadd.f32 %v3837_v23, %v7776_v21  ;;  %v3613_v30 = vpop.f32.mrb[122].mxu0  ;;  %v7890_v44 = vpop.f32.mrb[122].mxu1 }
 0x45b   :  { %v4152_v22 = vmax.f32 %v5752_v13, 0.0  ;;  %v5754_v15 = vadd.f32 %v3613_v30, %v7772_v20  ;;  %v7895_v55 = vpop.f32.mrb[123].mxu0  ;;  %v3841_v14 = vpop.f32.mrb[123].mxu1 }
 0x45c   :  { %v4155_v34 = vmax.f32 %v5785_v24, 0.0  ;;  %v5787_v56 = vadd.f32 %v3841_v14, %v7776_v21 }
 0x45d   :  { %v4158_v46 = vmax.f32 %v5754_v15, 0.0 }
 0x45e   :  { %v7898_v63 = vmax.f32 %v4152_v22, %v4155_v34  ;;  %v4161_v52 = vmax.f32 %v5787_v56, 0.0 }
 0x460   :  { %8296 = vst [vmem:[#allocation17_spill] sm:$0xff] %v7898_v63  ;;  %v7900_v50 = vmax.f32 %v4158_v46, %v4161_v52  ;;  %v3619_v23 = vpop.f32.mrb[124].mxu0  ;;  %v7902_v32 = vpop.f32.mrb[124].mxu1 }
 0x461   :  { %v5756_v31 = vadd.f32 %v3619_v23, %v7772_v20  ;;  %v7905_v13 = vpop.f32.mrb[125].mxu0  ;;  %v3847_v30 = vpop.f32.mrb[125].mxu1 }
 0x462   :  { %8297 = vst [vmem:[#allocation22_spill] sm:$0xff] %v7900_v50  ;;  %v5789_v62 = vadd.f32 %v3847_v30, %v7776_v21  ;;  %v3623_v17 = vpop.f32.mrb[126].mxu0  ;;  %v7908_v24 = vpop.f32.mrb[126].mxu1  ;;  %v6615_v50 = vld [vmem:[%s8261_s9 + $0x8] sm:$0xff]  }
 0x463   :  { %8298 = vst [vmem:[#allocation23_spill] sm:$0xff] %v7908_v24  ;;  %v4164_v15 = vmax.f32 %v5756_v31, 0.0  ;;  %v5758_v14 = vadd.f32 %v3623_v17, %v7772_v20  ;;  %v7913_v34 = vpop.f32.mrb[127].mxu0  ;;  %v3851_v56 = vpop.f32.mrb[127].mxu1  ;;  %v7924_v31 = vrot.slane %v7768_v37, %v8301_v8  ;;  %v8302_v20 = vld [vmem:[#allocation18_spill] sm:$0xff] }
 0x464   :  { %v4167_v46 = vmax.f32 %v5789_v62, 0.0  ;;  %v5791_v52 = vadd.f32 %v3851_v56, %v7776_v21  ;;  %v7928_v17 = vrot.slane %v7768_v37, %v8302_v20  ;;  %v8303_v62 = vld [vmem:[#allocation20_spill] sm:$0xff] }
 0x465   :  { %v4170_v23 = vmax.f32 %v5758_v14, 0.0  ;;  %v7932_v21 = vrot.slane %v7768_v37, %v8303_v62 }
 0x466   :  { %v7916_v28 = vmax.f32 %v4164_v15, %v4167_v46  ;;  %v4173_v0 = vmax.f32 %v5791_v52, 0.0  ;;  %v8304_v15 = vld [vmem:[#allocation21_spill] sm:$0xff]  ;;  %v5760_v56 = vadd.f32 %v7778_v10, %v7928_v17  ;;  %v5731_v52 = vadd.f32 %v7787_v3, %v7924_v31  ;;  %v6612_v3 = vld [vmem:[%s8261_s9 + $0x40] sm:$0xff]  }
 0x467   :  { %v7936_v14 = vrot.slane %v7768_v37, %v8304_v15  ;;  %v5762_v62 = vadd.f32 %v7784_v16, %v7928_v17  ;;  %v6613_v16 = vld [vmem:[%s8261_s9] sm:$0xff]   ;;  %5539 = vmatprep.subr.bf16.mxu0 %v6612_v3  ;;  %v5764_v24 = vadd.f32 %v7794_v47, %v7928_v17 }
 0x468   :  { %8299 = vst [vmem:[#allocation24_spill] sm:$0xff] %v7916_v28  ;;  %v7918_v30 = vmax.f32 %v4170_v23, %v4173_v0  ;;  %v5729_v0 = vadd.f32 %v7781_v26, %v7924_v31  ;;  %v4082_v28 = vmax.f32 %v5760_v56, 0.0  ;;  %5540 = vmatpush3.bf16.msra.mxu0 %v6613_v16 }
 0x46a   :  { %8300 = vst [vmem:[#allocation25_spill] sm:$0xff] %v7918_v30  ;;  %v4081_v15 = vmax.f32 %v5729_v0, 0.0  ;;  %v6614_v0 = vld [vmem:[%s8261_s9 + $0x48] sm:$0xff]  }
 0x46b   :  { %5541 = vmatprep.subr.bf16.mxu0 %v6614_v0  ;;  %v6593_v0 = vld [vmem:[#allocation9 + $0x114] ss:$8 sps:$4 sm:$0xff]  }
 0x46c   :  { %5542 = vmatpush3.bf16.msra.mxu0 %v6615_v50 }
 0x4a8   :  { %v4001_v46 = vpop.f32.mrb[128].mxu0 }
 0x4a9   :  { %v5792_v23 = vadd.f32 %v4001_v46, %v7932_v21  ;;  %v4003_v20 = vpop.f32.mrb[129].mxu0  ;;  %v4087_v46 = vmax.f32 %v5731_v52, 0.0 }
 0x4aa   :  { %v5793_v49 = vadd.f32 %v4003_v20, %v7936_v14  ;;  %v4005_v37 = vpop.f32.mrb[130].mxu0 }
 0x4ab   :  { %v4084_v22 = vmax.f32 %v5792_v23, 0.0  ;;  %v5794_v26 = vadd.f32 %v4005_v37, %v7932_v21  ;;  %v4007_v8 = vpop.f32.mrb[131].mxu0  ;;  %v4088_v37 = vmax.f32 %v5762_v62, 0.0 }
 0x4ac   :  { %v4085_v10 = vmax.f32 %v5793_v49, 0.0  ;;  %v5795_v30 = vadd.f32 %v4007_v8, %v7936_v14  ;;  %v5733_v8 = vadd.f32 %v7797_v11, %v7924_v31  ;;  %v5735_v11 = vadd.f32 %v7805_v6, %v7924_v31 }
 0x4ad   :  { %v4177_v23 = vmax.f32 %v4081_v15, %v4084_v22  ;;  %v4090_v20 = vmax.f32 %v5794_v26, 0.0  ;;  %v6588_v26 = vld [vmem:[#allocation9 + $0x100] ss:$8 sps:$4 sm:$0xff]  }
 0x4ae   :  { %v7959_v56 = vmax.f32 %v4082_v28, %v4085_v10  ;;  %v4091_v49 = vmax.f32 %v5795_v30, 0.0  ;;  %v6616_v28 = vld [vmem:[%s8261_s9 + $0x50] sm:$0xff]   ;;  %v5766_v10 = vadd.f32 %v7802_v53, %v7928_v17 }
 0x4af   :  { %v4180_v63 = vmax.f32 %v4087_v46, %v4090_v20  ;;  %v4093_v46 = vmax.f32 %v5733_v8, 0.0  ;;  %5543 = vmatprep.subr.bf16.mxu0 %v6616_v28  ;;  %v6618_v8 = vld [vmem:[%s8261_s9 + $0x58] sm:$0xff]  }
 0x4b0   :  { %v7968_v52 = vmax.f32 %v4088_v37, %v4091_v49  ;;  %v4011_v22 = vpop.f32.mrb[132].mxu0  ;;  %v6619_v28 = vld [vmem:[%s8261_s9 + $0x18] sm:$0xff]  }
 0x4b1   :  { %v5796_v30 = vadd.f32 %v4011_v22, %v7932_v21  ;;  %v4013_v62 = vpop.f32.mrb[133].mxu0  ;;  %v4225_v15 = vpack.c.bf16 %v4180_v63, %v4177_v23  ;;  %v6617_v63 = vld [vmem:[%s8261_s9 + $0x10] sm:$0xff]   ;;  %v4094_v23 = vmax.f32 %v5764_v24, 0.0  ;;  %v8305_v22 = vpack.c.bf16 %v7792_v48, %v7790_v51 }
 0x4b2   :  { %v5797_v3 = vadd.f32 %v4013_v62, %v7936_v14  ;;  %v4015_v16 = vpop.f32.mrb[134].mxu0  ;;  %v5737_v51 = vadd.f32 %v7815_v60, %v7924_v31  ;;  %5544 = vmatpush3.bf16.msra.mxu0 %v6617_v63  ;;  %v5739_v60 = vadd.f32 %v7823_v27, %v7924_v31 }
 0x4b3   :  { %v4096_v20 = vmax.f32 %v5796_v30, 0.0  ;;  %v5798_v37 = vadd.f32 %v4015_v16, %v7932_v21  ;;  %v4017_v6 = vpop.f32.mrb[135].mxu0  ;;  %4580 = vmatprep.mubr.bf16.mxu1 %v4225_v15  ;;  %v4099_v30 = vmax.f32 %v5735_v11, 0.0  ;;  %v6591_v15 = vld [vmem:[#allocation9 + $0x110] ss:$8 sps:$4 sm:$0xff]   ;;  %v4100_v16 = vmax.f32 %v5766_v10, 0.0  ;;  %5545 = vmatprep.subr.bf16.mxu0 %v6618_v8 }
 0x4b4   :  { %v4097_v53 = vmax.f32 %v5797_v3, 0.0  ;;  %v5799_v49 = vadd.f32 %v4017_v6, %v7936_v14  ;;  %4581 = vmatmul.mubr.bf16.vlgmr.msra.gmra.mrb[128].mxu1 %v8305_v22  ;;  %v6596_v3 = vld [vmem:[#allocation9 + $0x124] ss:$8 sps:$4 sm:$0xff]   ;;  %v5768_v11 = vadd.f32 %v7812_v39, %v7928_v17  ;;  %v6594_v6 = vld [vmem:[#allocation9 + $0x120] ss:$8 sps:$4 sm:$0xff]   ;;  %v5770_v39 = vadd.f32 %v7818_v12, %v7928_v17 }
 0x4b5   :  { %v4183_v62 = vmax.f32 %v4093_v46, %v4096_v20  ;;  %v4102_v50 = vmax.f32 %v5798_v37, 0.0  ;;  %4662 = vmatpush1.bf16.msra.mxu1 %v6588_v26  ;;  %v4105_v22 = vmax.f32 %v5737_v51, 0.0 }
 0x4b6   :  { %v7992_v47 = vmax.f32 %v4094_v23, %v4097_v53  ;;  %v4103_v24 = vmax.f32 %v5799_v49, 0.0  ;;  %4663 = vmatprep.subr.bf16.mxu1 %v6593_v0  ;;  %v6620_v0 = vld [vmem:[%s8261_s9 + $0x60] sm:$0xff]   ;;  %5546 = vmatpush3.bf16.msra.mxu0 %v6619_v28  ;;  %v4106_v12 = vmax.f32 %v5768_v11, 0.0 }
 0x4b7   :  { %v4186_v48 = vmax.f32 %v4099_v30, %v4102_v50  ;;  %v6599_v53 = vld [vmem:[#allocation9 + $0x134] ss:$8 sps:$4 sm:$0xff]   ;;  %5547 = vmatprep.subr.bf16.mxu0 %v6620_v0  ;;  %v6597_v28 = vld [vmem:[#allocation9 + $0x130] ss:$8 sps:$4 sm:$0xff]  }
 0x4b8   :  { %v8001_v26 = vmax.f32 %v4100_v16, %v4103_v24  ;;  %v4021_v10 = vpop.f32.mrb[136].mxu0  ;;  %v8306_v16 = vpack.c.bf16 %v7810_v7, %v7808_v40  ;;  %v6622_v24 = vld [vmem:[%s8261_s9 + $0x68] sm:$0xff]   ;;  %v5741_v40 = vadd.f32 %v7833_v45, %v7924_v31  ;;  %v5743_v45 = vadd.f32 %v7841_v19, %v7924_v31 }
 0x4b9   :  { %v5800_v46 = vadd.f32 %v4021_v10, %v7932_v21  ;;  %v4023_v20 = vpop.f32.mrb[137].mxu0  ;;  %v4228_v37 = vpack.c.bf16 %v4186_v48, %v4183_v62  ;;  %4664 = vmatpush1.bf16.msra.mxu1 %v6591_v15  ;;  %v6621_v62 = vld [vmem:[%s8261_s9 + $0x20] sm:$0xff]   ;;  %v4112_v10 = vmax.f32 %v5770_v39, 0.0  ;;  %v6623_v0 = vld [vmem:[%s8261_s9 + $0x28] sm:$0xff]   ;;  %v6624_v39 = vld [vmem:[%s8261_s9 + $0x70] sm:$0xff]  }
 0x4ba   :  { %v5801_v63 = vadd.f32 %v4023_v20, %v7936_v14  ;;  %v4025_v23 = vpop.f32.mrb[138].mxu0  ;;  %4665 = vmatprep.subr.bf16.mxu1 %v6596_v3  ;;  %v4229_v49 = vpack.c.bf16 %v8001_v26, %v7992_v47  ;;  %v4111_v3 = vmax.f32 %v5739_v60, 0.0  ;;  %v6602_v20 = vld [vmem:[#allocation9 + $0x144] ss:$8 sps:$4 sm:$0xff]   ;;  %5548 = vmatpush3.bf16.msra.mxu0 %v6621_v62  ;;  %v5772_v60 = vadd.f32 %v7830_v4, %v7928_v17  ;;  %v4296_v47 = vld [vmem:[%s8260_s8] sm:$0x3] }
 0x4bb   :  { %v4108_v8 = vmax.f32 %v5800_v46, 0.0  ;;  %v5802_v27 = vadd.f32 %v4025_v23, %v7932_v21  ;;  %v4027_v30 = vpop.f32.mrb[139].mxu0  ;;  %4590 = vmatprep.mubr.bf16.mxu1 %v4228_v37  ;;  %5549 = vmatprep.subr.bf16.mxu0 %v6622_v24  ;;  %v5774_v4 = vadd.f32 %v7836_v59, %v7928_v17  ;;  %v8320_v26 = vld [vmem:[#allocation16_spill] sm:$0xff] }
 0x4bc   :  { %v4109_v50 = vmax.f32 %v5801_v63, 0.0  ;;  %v5803_v15 = vadd.f32 %v4027_v30, %v7936_v14  ;;  %4591 = vmatmul.mubr.bf16.gmra.mrb[132].mxu1 %v8306_v16  ;;  %v6605_v30 = vld [vmem:[#allocation9 + $0x154] ss:$8 sps:$4 sm:$0xff]   ;;  %v6625_v16 = vld [vmem:[%s8261_s9 + $0x30] sm:$0xff]   ;;  %v4118_v59 = vmax.f32 %v5772_v60, 0.0  ;;  %v5745_v60 = vadd.f32 %v7851_v2, %v7924_v31 }
 0x4bd   :  { %v4189_v51 = vmax.f32 %v4105_v22, %v4108_v8  ;;  %v4114_v48 = vmax.f32 %v5802_v27, 0.0  ;;  %4666 = vmatpush1.bf16.msra.mxu1 %v6594_v6  ;;  %v6600_v22 = vld [vmem:[#allocation9 + $0x140] ss:$8 sps:$4 sm:$0xff]   ;;  %v5778_v2 = vadd.f32 %v7854_v42, %v7928_v17  ;;  %v8308_v42 = vpack.c.bf16 %v7846_v18, %v7844_v25 }
 0x4be   :  { %v8025_v46 = vmax.f32 %v4106_v12, %v4109_v50  ;;  %v4115_v11 = vmax.f32 %v5803_v15, 0.0  ;;  %4667 = vmatprep.subr.bf16.mxu1 %v6599_v53  ;;  %v4117_v12 = vmax.f32 %v5741_v40, 0.0  ;;  %5550 = vmatpush3.bf16.msra.mxu0 %v6623_v0  ;;  %v6608_v0 = vld [vmem:[#allocation9 + $0x164] ss:$8 sps:$4 sm:$0xff]   ;;  %v5751_v18 = vadd.f32 %v7877_v9, %v7924_v31 }
 0x4bf   :  { %v4192_v7 = vmax.f32 %v4111_v3, %v4114_v48  ;;  %5551 = vmatprep.subr.bf16.mxu0 %v6624_v39  ;;  %v4123_v48 = vmax.f32 %v5743_v45, 0.0  ;;  %v5747_v45 = vadd.f32 %v7859_v1, %v7924_v31 }
 0x4c0   :  { %v8034_v37 = vmax.f32 %v4112_v10, %v4115_v11  ;;  %v4031_v6 = vpop.f32.mrb[140].mxu0  ;;  %v6603_v11 = vld [vmem:[#allocation9 + $0x150] ss:$8 sps:$4 sm:$0xff]  }
 0x4c1   :  { %v5804_v63 = vadd.f32 %v4031_v6, %v7932_v21  ;;  %v4033_v23 = vpop.f32.mrb[141].mxu0  ;;  %v4231_v53 = vpack.c.bf16 %v4192_v7, %v4189_v51  ;;  %4668 = vmatpush1.bf16.msra.mxu1 %v6597_v28  ;;  %v8307_v51 = vpack.c.bf16 %v7828_v41, %v7826_v57  ;;  %v5776_v57 = vadd.f32 %v7848_v58, %v7928_v17  ;;  %v6611_v58 = vld [vmem:[#allocation9 + $0x174] ss:$8 sps:$4 sm:$0xff]  }
 0x4c2   :  { %v5805_v8 = vadd.f32 %v4033_v23, %v7936_v14  ;;  %v4035_v27 = vpop.f32.mrb[142].mxu0  ;;  %4669 = vmatprep.subr.bf16.mxu1 %v6602_v20  ;;  %v4232_v62 = vpack.c.bf16 %v8034_v37, %v8025_v46  ;;  %v4124_v20 = vmax.f32 %v5774_v4, 0.0  ;;  %5552 = vmatpush3.bf16.msra.mxu0 %v6625_v16  ;;  %v8321_v46 = vld [vmem:[#allocation19_spill] sm:$0xff] }
 0x4c3   :  { %v4120_v50 = vmax.f32 %v5804_v63, 0.0  ;;  %v5806_v19 = vadd.f32 %v4035_v27, %v7932_v21  ;;  %v4037_v15 = vpop.f32.mrb[143].mxu0  ;;  %4600 = vmatprep.mubr.bf16.mxu1 %v4231_v53  ;;  %v8172_v37 = vrot.slane %v4296_v47, %v8321_v46 }
 0x4c4   :  { %v4121_v24 = vmax.f32 %v5805_v8, 0.0  ;;  %v5807_v3 = vadd.f32 %v4037_v15, %v7936_v14  ;;  %4601 = vmatmul.mubr.bf16.gmra.mrb[136].mxu1 %v8307_v51  ;;  %v6609_v51 = vld [vmem:[#allocation9 + $0x170] ss:$8 sps:$4 sm:$0xff]  }
 0x4c5   :  { %v4195_v28 = vmax.f32 %v4117_v12, %v4120_v50  ;;  %v4126_v10 = vmax.f32 %v5806_v19, 0.0  ;;  %4670 = vmatpush1.bf16.msra.mxu1 %v6600_v22  ;;  %v6606_v22 = vld [vmem:[#allocation9 + $0x160] ss:$8 sps:$4 sm:$0xff]   ;;  %v4130_v19 = vmax.f32 %v5776_v57, 0.0 }
 0x4c6   :  { %v8055_v40 = vmax.f32 %v4118_v59, %v4121_v24  ;;  %v4127_v7 = vmax.f32 %v5807_v3, 0.0  ;;  %4671 = vmatprep.subr.bf16.mxu1 %v6605_v30  ;;  %v4129_v30 = vmax.f32 %v5745_v60, 0.0  ;;  %v4135_v59 = vmax.f32 %v5747_v45, 0.0 }
 0x4c7   :  { %v4198_v6 = vmax.f32 %v4123_v48, %v4126_v10  ;;  %v4136_v48 = vmax.f32 %v5778_v2, 0.0 }
 0x4c8   :  { %v8061_v41 = vmax.f32 %v4124_v20, %v4127_v7  ;;  %v4041_v39 = vpop.f32.mrb[144].mxu0  ;;  %v5780_v7 = vadd.f32 %v7866_v38, %v7928_v17 }
 0x4c9   :  { %v5808_v63 = vadd.f32 %v4041_v39, %v7932_v21  ;;  %v4043_v23 = vpop.f32.mrb[145].mxu0  ;;  %v4234_v53 = vpack.c.bf16 %v4198_v6, %v4195_v28  ;;  %4672 = vmatpush1.bf16.msra.mxu1 %v6603_v11  ;;  %v5749_v11 = vadd.f32 %v7869_v43, %v7924_v31  ;;  %v5782_v39 = vadd.f32 %v7872_v33, %v7928_v17 }
 0x4ca   :  { %v5809_v4 = vadd.f32 %v4043_v23, %v7936_v14  ;;  %v4045_v8 = vpop.f32.mrb[146].mxu0  ;;  %4673 = vmatprep.subr.bf16.mxu1 %v6608_v0  ;;  %v4235_v27 = vpack.c.bf16 %v8061_v41, %v8055_v40  ;;  %v4142_v9 = vmax.f32 %v5780_v7, 0.0  ;;  %v4147_v33 = vmax.f32 %v5751_v18, 0.0 }
 0x4cb   :  { %v4132_v12 = vmax.f32 %v5808_v63, 0.0  ;;  %v5810_v1 = vadd.f32 %v4045_v8, %v7932_v21  ;;  %v4047_v50 = vpop.f32.mrb[147].mxu0  ;;  %4610 = vmatprep.mubr.bf16.mxu1 %v4234_v53  ;;  %v4141_v63 = vmax.f32 %v5749_v11, 0.0  ;;  %v8309_v8 = vpack.c.bf16 %v7864_v5, %v7862_v35 }
 0x4cc   :  { %v4133_v15 = vmax.f32 %v5809_v4, 0.0  ;;  %v5811_v16 = vadd.f32 %v4047_v50, %v7936_v14  ;;  %4611 = vmatmul.mubr.bf16.gmra.mrb[140].mxu1 %v8308_v42  ;;  %v5755_v35 = vadd.f32 %v7895_v55, %v7924_v31 }
 0x4cd   :  { %v4201_v24 = vmax.f32 %v4129_v30, %v4132_v12  ;;  %v4138_v3 = vmax.f32 %v5810_v1, 0.0  ;;  %4674 = vmatpush1.bf16.msra.mxu1 %v6606_v22  ;;  %v4148_v12 = vmax.f32 %v5782_v39, 0.0 }
 0x4ce   :  { %v8076_v28 = vmax.f32 %v4130_v19, %v4133_v15  ;;  %v4139_v10 = vmax.f32 %v5811_v16, 0.0  ;;  %4675 = vmatprep.subr.bf16.mxu1 %v6611_v58  ;;  %v5753_v19 = vadd.f32 %v7887_v54, %v7924_v31  ;;  %v5784_v16 = vadd.f32 %v7884_v29, %v7928_v17 }
 0x4cf   :  { %v4204_v20 = vmax.f32 %v4135_v59, %v4138_v3 }
 0x4d0   :  { %v8082_v0 = vmax.f32 %v4136_v48, %v4139_v10  ;;  %v4051_v25 = vpop.f32.mrb[148].mxu0  ;;  %v4153_v29 = vmax.f32 %v5753_v19, 0.0  ;;  %v4154_v55 = vmax.f32 %v5784_v16, 0.0  ;;  %v8313_v16 = vld [vmem:[#allocation17_spill] sm:$0xff] }
 0x4d1   :  { %v5812_v60 = vadd.f32 %v4051_v25, %v7932_v21  ;;  %v4053_v6 = vpop.f32.mrb[149].mxu0  ;;  %v4237_v57 = vpack.c.bf16 %v4204_v20, %v4201_v24  ;;  %4676 = vmatpush1.bf16.msra.mxu1 %v6609_v51  ;;  %v5786_v51 = vadd.f32 %v7890_v44, %v7928_v17  ;;  %v4159_v44 = vmax.f32 %v5755_v35, 0.0 }
 0x4d2   :  { %v5813_v43 = vadd.f32 %v4053_v6, %v7936_v14  ;;  %v4055_v45 = vpop.f32.mrb[150].mxu0  ;;  %v4238_v38 = vpack.c.bf16 %v8082_v0, %v8076_v28 }
 0x4d3   :  { %v4144_v23 = vmax.f32 %v5812_v60, 0.0  ;;  %v5814_v53 = vadd.f32 %v4055_v45, %v7932_v21  ;;  %v4057_v22 = vpop.f32.mrb[151].mxu0  ;;  %4620 = vmatprep.mubr.bf16.mxu1 %v4237_v57  ;;  %v8310_v60 = vpack.c.bf16 %v7882_v61, %v7880_v36  ;;  %v4160_v39 = vmax.f32 %v5786_v51, 0.0 }
 0x4d4   :  { %v4145_v2 = vmax.f32 %v5813_v43, 0.0  ;;  %v5815_v4 = vadd.f32 %v4057_v22, %v7936_v14  ;;  %4621 = vmatmul.mubr.bf16.gmra.mrb[144].mxu1 %v8309_v8  ;;  %v8311_v8 = vld [vmem:[#allocation23_spill] sm:$0xff] }
 0x4d5   :  { %v4207_v58 = vmax.f32 %v4141_v63, %v4144_v23  ;;  %v4150_v30 = vmax.f32 %v5814_v53, 0.0  ;;  %v5757_v63 = vadd.f32 %v7905_v13, %v7924_v31  ;;  %v5788_v53 = vadd.f32 %v7902_v32, %v7928_v17 }
 0x4d6   :  { %v8097_v1 = vmax.f32 %v4142_v9, %v4145_v2  ;;  %v4151_v50 = vmax.f32 %v5815_v4, 0.0  ;;  %v5759_v2 = vadd.f32 %v7913_v34, %v7924_v31  ;;  %v8312_v31 = vld [vmem:[#allocation22_spill] sm:$0xff] }
 0x4d7   :  { %v4210_v15 = vmax.f32 %v4147_v33, %v4150_v30  ;;  %v5790_v33 = vadd.f32 %v8311_v8, %v7928_v17  ;;  %v4166_v19 = vmax.f32 %v5788_v53, 0.0 }
 0x4d8   :  { %v8103_v42 = vmax.f32 %v4148_v12, %v4151_v50  ;;  %v4061_v59 = vpop.f32.mrb[152].mxu0  ;;  %v4165_v12 = vmax.f32 %v5757_v63, 0.0 }
 0x4d9   :  { %v5816_v5 = vadd.f32 %v4061_v59, %v7932_v21  ;;  %v4063_v24 = vpop.f32.mrb[153].mxu0  ;;  %v4240_v3 = vpack.c.bf16 %v4210_v15, %v4207_v58  ;;  %v4171_v59 = vmax.f32 %v5759_v2, 0.0 }
 0x4da   :  { %v5817_v48 = vadd.f32 %v4063_v24, %v7936_v14  ;;  %v4065_v54 = vpop.f32.mrb[154].mxu0  ;;  %v4241_v10 = vpack.c.bf16 %v8103_v42, %v8097_v1  ;;  %v8314_v42 = vpack.c.bf16 %v8312_v31, %v8313_v16 }
 0x4db   :  { %v4156_v11 = vmax.f32 %v5816_v5, 0.0  ;;  %v5818_v20 = vadd.f32 %v4065_v54, %v7932_v21  ;;  %v4067_v7 = vpop.f32.mrb[155].mxu0  ;;  %4630 = vmatprep.mubr.bf16.mxu1 %v4240_v3  ;;  %v4172_v5 = vmax.f32 %v5790_v33, 0.0 }
 0x4dc   :  { %v4157_v25 = vmax.f32 %v5817_v48, 0.0  ;;  %v5819_v18 = vadd.f32 %v4067_v7, %v7936_v14  ;;  %4631 = vmatmul.mubr.bf16.gmra.mrb[148].mxu1 %v8310_v60  ;;  %v8319_v7 = vpack.c.bf16 %v7968_v52, %v7959_v56  ;;  %v6626_v56 = vld [vmem:[%s8261_s9 + $0x78] sm:$0xff]  }
 0x4dd   :  { %v4213_v6 = vmax.f32 %v4153_v29, %v4156_v11  ;;  %v4162_v57 = vmax.f32 %v5818_v20, 0.0  ;;  %v8315_v29 = vld [vmem:[#allocation25_spill] sm:$0xff]  ;;  %v8316_v11 = vld [vmem:[#allocation24_spill] sm:$0xff]  ;;  %5553 = vmatprep.subr.bf16.mxu0 %v6626_v56 }
 0x4de   :  { %v4214_v43 = vmax.f32 %v4154_v55, %v4157_v25  ;;  %v4163_v45 = vmax.f32 %v5819_v18, 0.0  ;;  %v8317_v20 = vpack.c.bf16 %v8315_v29, %v8316_v11  ;;  %v6627_v52 = vld [vmem:[%s8261_s9 + $0x38] sm:$0xff]  }
 0x4df   :  { %v4216_v23 = vmax.f32 %v4159_v44, %v4162_v57  ;;  %5554 = vmatpush3.bf16.msra.mxu0 %v6627_v52 }
 0x4e0   :  { %v4217_v22 = vmax.f32 %v4160_v39, %v4163_v45  ;;  %v4071_v9 = vpop.f32.mrb[156].mxu0 }
 0x4e1   :  { %v5820_v36 = vadd.f32 %v4071_v9, %v7932_v21  ;;  %v4073_v61 = vpop.f32.mrb[157].mxu0  ;;  %v4243_v4 = vpack.c.bf16 %v4216_v23, %v4213_v6 }
 0x4e2   :  { %v5821_v58 = vadd.f32 %v4073_v61, %v7936_v14  ;;  %v4075_v30 = vpop.f32.mrb[158].mxu0  ;;  %v4244_v13 = vpack.c.bf16 %v4217_v22, %v4214_v43 }
 0x4e3   :  { %v4168_v1 = vmax.f32 %v5820_v36, 0.0  ;;  %v5822_v32 = vadd.f32 %v4075_v30, %v7932_v21  ;;  %v4077_v50 = vpop.f32.mrb[159].mxu0  ;;  %4640 = vmatprep.mubr.bf16.mxu1 %v4243_v4 }
 0x4e4   :  { %v4169_v15 = vmax.f32 %v5821_v58, 0.0  ;;  %v5823_v34 = vadd.f32 %v4077_v50, %v7936_v14  ;;  %4641 = vmatmul.mubr.bf16.gmra.mrb[152].mxu1 %v8314_v42  ;;  %v8318_v14 = vmov 0  }
 0x4e5   :  { %v4219_v17 = vmax.f32 %v4165_v12, %v4168_v1  ;;  %v4174_v35 = vmax.f32 %v5822_v32, 0.0 }
 0x4e6   :  { %v4220_v24 = vmax.f32 %v4166_v19, %v4169_v15  ;;  %v4175_v3 = vmax.f32 %v5823_v34, 0.0 }
 0x4e7   :  { %v4222_v51 = vmax.f32 %v4171_v59, %v4174_v35 }
 0x4e8   :  { %v4223_v48 = vmax.f32 %v4172_v5, %v4175_v3 }
 0x4e9   :  { %v4246_v54 = vpack.c.bf16 %v4222_v51, %v4219_v17 }
 0x4ea   :  { %v4247_v21 = vpack.c.bf16 %v4223_v48, %v4220_v24 }
 0x4eb   :  { %4650 = vmatprep.mubr.bf16.mxu1 %v4246_v54 }
 0x4ec   :  { %4651 = vmatmul.mubr.bf16.gmra.mrb[156].mxu1 %v8317_v20 }
 0x4ed   :  { %4693 = vmatprep.mubr.bf16.mxu1 %v8318_v14 }
 0x4f4   :  { %4694 = vmatmul.mubr.bf16.vlgmr.msra.gmra.mrb[128].mxu1 %v8319_v7 }
 0x4f5   :  { %4703 = vmatprep.mubr.bf16.mxu1 %v8318_v14 }
 0x4fc   :  { %4704 = vmatmul.mubr.bf16.gmra.mrb[132].mxu1 %v4229_v49  ;;  %v8169_v49 = vrot.slane %v4296_v47, %v8320_v26 }
 0x4fd   :  { %4713 = vmatprep.mubr.bf16.mxu1 %v8318_v14 }
 0x504   :  { %4714 = vmatmul.mubr.bf16.gmra.mrb[136].mxu1 %v4232_v62 }
 0x505   :  { %4723 = vmatprep.mubr.bf16.mxu1 %v8318_v14 }
 0x50c   :  { %4724 = vmatmul.mubr.bf16.gmra.mrb[140].mxu1 %v4235_v27 }
 0x50d   :  { %4733 = vmatprep.mubr.bf16.mxu1 %v8318_v14 }
 0x514   :  { %4734 = vmatmul.mubr.bf16.gmra.mrb[144].mxu1 %v4238_v38 }
 0x515   :  { %4743 = vmatprep.mubr.bf16.mxu1 %v8318_v14 }
 0x51c   :  { %4744 = vmatmul.mubr.bf16.gmra.mrb[148].mxu1 %v4241_v10 }
 0x51d   :  { %4753 = vmatprep.mubr.bf16.mxu1 %v8318_v14 }
 0x524   :  { %4754 = vmatmul.mubr.bf16.gmra.mrb[152].mxu1 %v4244_v13 }
 0x525   :  { %4763 = vmatprep.mubr.bf16.mxu1 %v8318_v14 }
 0x52c   :  { %4764 = vmatmul.mubr.bf16.gmra.mrb[156].mxu1 %v4247_v21 }
 0x5c7   :  { %v4695_v62 = vpop.f32.mrb[128].mxu1 }
 0x5c8   :  { %v5824_v40 = vadd.f32 %v4695_v62, %v8169_v49  ;;  %v4697_v41 = vpop.f32.mrb[129].mxu1 }
 0x5c9   :  { %v5825_v27 = vadd.f32 %v4697_v41, %v8172_v37  ;;  %v4699_v28 = vpop.f32.mrb[130].mxu1 }
 0x5ca   :  { %v5826_v0 = vadd.f32 %v4699_v28, %v8169_v49  ;;  %v4701_v38 = vpop.f32.mrb[131].mxu1  ;;  %v4774_v55 = vmax.f32 %v5824_v40, 0.0 }
 0x5cb   :  { %v5827_v10 = vadd.f32 %v4701_v38, %v8172_v37  ;;  %v4775_v18 = vmax.f32 %v5825_v27, 0.0 }
 0x5cc   :  { %v4776_v25 = vmax.f32 %v5826_v0, 0.0 }
 0x5cd   :  { %v4777_v60 = vmax.f32 %v5827_v10, 0.0 }
 0x5ce   :  { %v4806_v44 = vpack.c.bf16 %v4776_v25, %v4774_v55 }
 0x5cf   :  { %v4807_v6 = vpack.c.bf16 %v4777_v60, %v4775_v18  ;;  %v4705_v57 = vpop.f32.mrb[132].mxu1 }
 0x5d0   :  { %v5828_v39 = vadd.f32 %v4705_v57, %v8169_v49  ;;  %v4707_v43 = vpop.f32.mrb[133].mxu1 }
 0x5d1   :  { %v5829_v45 = vadd.f32 %v4707_v43, %v8172_v37  ;;  %v4709_v63 = vpop.f32.mrb[134].mxu1  ;;  %4989 = vmatprep.mubr.bf16.mxu0 %v4807_v6 }
 0x5d2   :  { %v5830_v23 = vadd.f32 %v4709_v63, %v8169_v49  ;;  %v4711_v53 = vpop.f32.mrb[135].mxu1  ;;  %4990 = vmatmul.mubr.bf16.vlgmr.msra.gmra.mrb[160].mxu0 %v4806_v44  ;;  %v4778_v9 = vmax.f32 %v5828_v39, 0.0 }
 0x5d3   :  { %v5831_v22 = vadd.f32 %v4711_v53, %v8172_v37  ;;  %v4779_v36 = vmax.f32 %v5829_v45, 0.0 }
 0x5d4   :  { %v4780_v2 = vmax.f32 %v5830_v23, 0.0 }
 0x5d5   :  { %v4781_v61 = vmax.f32 %v5831_v22, 0.0 }
 0x5d6   :  { %v4808_v4 = vpack.c.bf16 %v4780_v2, %v4778_v9 }
 0x5d7   :  { %v4809_v8 = vpack.c.bf16 %v4781_v61, %v4779_v36  ;;  %v4715_v33 = vpop.f32.mrb[136].mxu1 }
 0x5d8   :  { %v5832_v58 = vadd.f32 %v4715_v33, %v8169_v49  ;;  %v4717_v30 = vpop.f32.mrb[137].mxu1 }
 0x5d9   :  { %v5833_v13 = vadd.f32 %v4717_v30, %v8172_v37  ;;  %v4719_v12 = vpop.f32.mrb[138].mxu1  ;;  %4997 = vmatprep.mubr.bf16.mxu0 %v4809_v8 }
 0x5da   :  { %v5834_v1 = vadd.f32 %v4719_v12, %v8169_v49  ;;  %v4721_v32 = vpop.f32.mrb[139].mxu1  ;;  %4998 = vmatmul.mubr.bf16.gmra.mrb[164].mxu0 %v4808_v4  ;;  %v4782_v19 = vmax.f32 %v5832_v58, 0.0 }
 0x5db   :  { %v5835_v50 = vadd.f32 %v4721_v32, %v8172_v37  ;;  %v4783_v34 = vmax.f32 %v5833_v13, 0.0 }
 0x5dc   :  { %v4784_v15 = vmax.f32 %v5834_v1, 0.0 }
 0x5dd   :  { %v4785_v31 = vmax.f32 %v5835_v50, 0.0 }
 0x5de   :  { %v4810_v16 = vpack.c.bf16 %v4784_v15, %v4782_v19 }
 0x5df   :  { %v4811_v42 = vpack.c.bf16 %v4785_v31, %v4783_v34  ;;  %v4725_v59 = vpop.f32.mrb[140].mxu1 }
 0x5e0   :  { %v5836_v17 = vadd.f32 %v4725_v59, %v8169_v49  ;;  %v4727_v35 = vpop.f32.mrb[141].mxu1 }
 0x5e1   :  { %v5837_v5 = vadd.f32 %v4727_v35, %v8172_v37  ;;  %v4729_v24 = vpop.f32.mrb[142].mxu1  ;;  %5005 = vmatprep.mubr.bf16.mxu0 %v4811_v42 }
 0x5e2   :  { %v5838_v3 = vadd.f32 %v4729_v24, %v8169_v49  ;;  %v4731_v51 = vpop.f32.mrb[143].mxu1  ;;  %5006 = vmatmul.mubr.bf16.gmra.mrb[168].mxu0 %v4810_v16  ;;  %v4786_v54 = vmax.f32 %v5836_v17, 0.0 }
 0x5e3   :  { %v5839_v48 = vadd.f32 %v4731_v51, %v8172_v37  ;;  %v4787_v29 = vmax.f32 %v5837_v5, 0.0 }
 0x5e4   :  { %v4788_v21 = vmax.f32 %v5838_v3, 0.0 }
 0x5e5   :  { %v4789_v11 = vmax.f32 %v5839_v48, 0.0 }
 0x5e6   :  { %v4812_v20 = vpack.c.bf16 %v4788_v21, %v4786_v54  ;;  %v6755_v21 = vmov 0.0  }
 0x5e7   :  { %v4813_v14 = vpack.c.bf16 %v4789_v11, %v4787_v29  ;;  %v4735_v7 = vpop.f32.mrb[144].mxu1  ;;  %5612 = vmatprep.subr.bf16.mxu0 %v6755_v21  ;;  %v5079_v29 = vld [vmem:[#allocation2] sm:$0x1] }
 0x5e8   :  { %v5840_v56 = vadd.f32 %v4735_v7, %v8169_v49  ;;  %v4737_v52 = vpop.f32.mrb[145].mxu1  ;;  %5082 = vperm.xlu0 %6092, %v5079_v29  }
 0x5e9   :  { %v5841_v47 = vadd.f32 %v4737_v52, %v8172_v37  ;;  %v4739_v46 = vpop.f32.mrb[146].mxu1  ;;  %5013 = vmatprep.mubr.bf16.mxu0 %v4813_v14 }
 0x5ea   :  { %v5842_v62 = vadd.f32 %v4739_v46, %v8169_v49  ;;  %v4741_v40 = vpop.f32.mrb[147].mxu1  ;;  %5014 = vmatmul.mubr.bf16.gmra.mrb[172].mxu0 %v4812_v20  ;;  %v4790_v27 = vmax.f32 %v5840_v56, 0.0 }
 0x5eb   :  { %v5843_v41 = vadd.f32 %v4741_v40, %v8172_v37  ;;  %v4791_v0 = vmax.f32 %v5841_v47, 0.0 }
 0x5ec   :  { %v4792_v28 = vmax.f32 %v5842_v62, 0.0 }
 0x5ed   :  { %v4793_v38 = vmax.f32 %v5843_v41, 0.0 }
 0x5ee   :  { %v4814_v10 = vpack.c.bf16 %v4792_v28, %v4790_v27 }
 0x5ef   :  { %v4815_v55 = vpack.c.bf16 %v4793_v38, %v4791_v0  ;;  %v4745_v25 = vpop.f32.mrb[148].mxu1 }
 0x5f0   :  { %v5844_v18 = vadd.f32 %v4745_v25, %v8169_v49  ;;  %v4747_v60 = vpop.f32.mrb[149].mxu1 }
 0x5f1   :  { %v5845_v44 = vadd.f32 %v4747_v60, %v8172_v37  ;;  %v4749_v6 = vpop.f32.mrb[150].mxu1  ;;  %5021 = vmatprep.mubr.bf16.mxu0 %v4815_v55 }
 0x5f2   :  { %v5846_v57 = vadd.f32 %v4749_v6, %v8169_v49  ;;  %v4751_v39 = vpop.f32.mrb[151].mxu1  ;;  %5022 = vmatmul.mubr.bf16.gmra.mrb[176].mxu0 %v4814_v10  ;;  %v4794_v45 = vmax.f32 %v5844_v18, 0.0 }
 0x5f3   :  { %v5847_v43 = vadd.f32 %v4751_v39, %v8172_v37  ;;  %v4795_v23 = vmax.f32 %v5845_v44, 0.0 }
 0x5f4   :  { %v4796_v63 = vmax.f32 %v5846_v57, 0.0 }
 0x5f5   :  { %v4797_v53 = vmax.f32 %v5847_v43, 0.0 }
 0x5f6   :  { %v4816_v22 = vpack.c.bf16 %v4796_v63, %v4794_v45 }
 0x5f7   :  { %v4817_v9 = vpack.c.bf16 %v4797_v53, %v4795_v23  ;;  %v4755_v2 = vpop.f32.mrb[152].mxu1 }
 0x5f8   :  { %v5848_v36 = vadd.f32 %v4755_v2, %v8169_v49  ;;  %v4757_v61 = vpop.f32.mrb[153].mxu1 }
 0x5f9   :  { %v5849_v4 = vadd.f32 %v4757_v61, %v8172_v37  ;;  %v4759_v8 = vpop.f32.mrb[154].mxu1  ;;  %5029 = vmatprep.mubr.bf16.mxu0 %v4817_v9 }
 0x5fa   :  { %v5850_v33 = vadd.f32 %v4759_v8, %v8169_v49  ;;  %v4761_v58 = vpop.f32.mrb[155].mxu1  ;;  %5030 = vmatmul.mubr.bf16.gmra.mrb[180].mxu0 %v4816_v22  ;;  %v4798_v13 = vmax.f32 %v5848_v36, 0.0 }
 0x5fb   :  { %v5851_v30 = vadd.f32 %v4761_v58, %v8172_v37  ;;  %v4799_v1 = vmax.f32 %v5849_v4, 0.0 }
 0x5fc   :  { %v4800_v12 = vmax.f32 %v5850_v33, 0.0 }
 0x5fd   :  { %v4801_v32 = vmax.f32 %v5851_v30, 0.0 }
 0x5fe   :  { %v4818_v50 = vpack.c.bf16 %v4800_v12, %v4798_v13 }
 0x5ff   :  { %v4819_v19 = vpack.c.bf16 %v4801_v32, %v4799_v1  ;;  %v4765_v15 = vpop.f32.mrb[156].mxu1 }
 0x600   :  { %v5852_v34 = vadd.f32 %v4765_v15, %v8169_v49  ;;  %v4767_v31 = vpop.f32.mrb[157].mxu1 }
 0x601   :  { %v5853_v16 = vadd.f32 %v4767_v31, %v8172_v37  ;;  %v4769_v42 = vpop.f32.mrb[158].mxu1  ;;  %5037 = vmatprep.mubr.bf16.mxu0 %v4819_v19 }
 0x602   :  { %v5854_v59 = vadd.f32 %v4769_v42, %v8169_v49  ;;  %v4771_v17 = vpop.f32.mrb[159].mxu1  ;;  %5038 = vmatmul.mubr.bf16.gmra.mrb[184].mxu0 %v4818_v50  ;;  %v4802_v5 = vmax.f32 %v5852_v34, 0.0 }
 0x603   :  { %v5855_v35 = vadd.f32 %v4771_v17, %v8172_v37  ;;  %v4803_v3 = vmax.f32 %v5853_v16, 0.0  ;;  %v8211_v37 = vld [vmem:[%s8262_s10] ss:$0 sm:$0xff] }
 0x604   :  { %v4804_v24 = vmax.f32 %v5854_v59, 0.0 }
 0x605   :  { %v4805_v51 = vmax.f32 %v5855_v35, 0.0 }
 0x606   :  { %v4820_v48 = vpack.c.bf16 %v4804_v24, %v4802_v5 }
 0x607   :  { %v4821_v54 = vpack.c.bf16 %v4805_v51, %v4803_v3 }
 0x609   :  { %5045 = vmatprep.mubr.bf16.mxu0 %v4821_v54 }
 0x60a   :  { %5046 = vmatmul.mubr.bf16.gmra.mrb[188].mxu0 %v4820_v48 }
 0x60b   :  { %5628 = vmatprep.mubr.msk.bf16.mxu0 %vm6756_vm2, %v6755_v21 }
 0x6a5   :  { %v5555_v49 = vpop.f32.mrb[160].mxu0 }
 0x6a6   :  { %v5556_v11 = vpop.f32.mrb[161].mxu0 }
 0x6a7   :  { %v5557_v20 = vadd.f32 %v5556_v11, %v5555_v49  ;;  %v5558_v14 = vpop.f32.mrb[162].mxu0 }
 0x6a8   :  { %v5559_v7 = vpop.f32.mrb[163].mxu0 }
 0x6a9   :  { %v4992_v56 = vadd.f32 %v5557_v20, %v8211_v37  ;;  %v5560_v52 = vadd.f32 %v5559_v7, %v5558_v14 }
 0x6ab   :  { %v4995_v47 = vadd.f32 %v5560_v52, %v8211_v37  ;;  %v5054_v46 = vmax.f32 %v4992_v56, 0.0 }
 0x6ad   :  { %v5055_v62 = vmax.f32 %v4995_v47, 0.0  ;;  %v5561_v40 = vpop.f32.mrb[164].mxu0 }
 0x6ae   :  { %v5562_v41 = vpop.f32.mrb[165].mxu0 }
 0x6af   :  { %v5071_v27 = vpack.c.bf16 %v5055_v62, %v5054_v46  ;;  %v5563_v28 = vadd.f32 %v5562_v41, %v5561_v40  ;;  %v5564_v0 = vpop.f32.mrb[166].mxu0 }
 0x6b0   :  { %v5565_v38 = vpop.f32.mrb[167].mxu0 }
 0x6b1   :  { %v5000_v10 = vadd.f32 %v5563_v28, %v8211_v37  ;;  %v5566_v55 = vadd.f32 %v5565_v38, %v5564_v0  ;;  %5613 = vmatpush3.bf16.xpose.msra.mxu0 %v5071_v27 }
 0x6b2   :  { %5614 = vmatprep.subr.bf16.mxu0 %v6755_v21 }
 0x6b3   :  { %v5003_v25 = vadd.f32 %v5566_v55, %v8211_v37  ;;  %v5056_v18 = vmax.f32 %v5000_v10, 0.0 }
 0x6b5   :  { %v5057_v60 = vmax.f32 %v5003_v25, 0.0  ;;  %v5567_v44 = vpop.f32.mrb[168].mxu0 }
 0x6b6   :  { %v5568_v6 = vpop.f32.mrb[169].mxu0 }
 0x6b7   :  { %v5072_v57 = vpack.c.bf16 %v5057_v60, %v5056_v18  ;;  %v5569_v39 = vadd.f32 %v5568_v6, %v5567_v44  ;;  %v5570_v43 = vpop.f32.mrb[170].mxu0 }
 0x6b8   :  { %v5571_v45 = vpop.f32.mrb[171].mxu0 }
 0x6b9   :  { %v5008_v63 = vadd.f32 %v5569_v39, %v8211_v37  ;;  %v5572_v23 = vadd.f32 %v5571_v45, %v5570_v43  ;;  %5615 = vmatpush3.bf16.xpose.msra.mxu0 %v5072_v57 }
 0x6ba   :  { %5616 = vmatprep.subr.bf16.mxu0 %v6755_v21 }
 0x6bb   :  { %v5011_v53 = vadd.f32 %v5572_v23, %v8211_v37  ;;  %v5058_v22 = vmax.f32 %v5008_v63, 0.0  ;;  %v5070_v63 = vld [vmem:[%s8263_s11] sm:$0x1]  ;;  %v5083_v23 = vpop.permute.xlu0 %5082 }
 0x6bd   :  { %v5059_v9 = vmax.f32 %v5011_v53, 0.0  ;;  %v5573_v2 = vpop.f32.mrb[172].mxu0  ;;  %v5088_v53 = vrot.slane %v5083_v23, %v8320_v26 }
 0x6be   :  { %v5574_v36 = vpop.f32.mrb[173].mxu0 }
 0x6bf   :  { %v5073_v61 = vpack.c.bf16 %v5059_v9, %v5058_v22  ;;  %v5575_v4 = vadd.f32 %v5574_v36, %v5573_v2  ;;  %v5576_v8 = vpop.f32.mrb[174].mxu0 }
 0x6c0   :  { %v5577_v33 = vpop.f32.mrb[175].mxu0 }
 0x6c1   :  { %v5016_v58 = vadd.f32 %v5575_v4, %v8211_v37  ;;  %v5578_v30 = vadd.f32 %v5577_v33, %v5576_v8  ;;  %5617 = vmatpush3.bf16.xpose.msra.mxu0 %v5073_v61 }
 0x6c2   :  { %5618 = vmatprep.subr.bf16.mxu0 %v6755_v21 }
 0x6c3   :  { %v5019_v13 = vadd.f32 %v5578_v30, %v8211_v37  ;;  %v5060_v12 = vmax.f32 %v5016_v58, 0.0 }
 0x6c5   :  { %v5061_v1 = vmax.f32 %v5019_v13, 0.0  ;;  %v5579_v32 = vpop.f32.mrb[176].mxu0 }
 0x6c6   :  { %v5580_v50 = vpop.f32.mrb[177].mxu0 }
 0x6c7   :  { %v5074_v19 = vpack.c.bf16 %v5061_v1, %v5060_v12  ;;  %v5581_v15 = vadd.f32 %v5580_v50, %v5579_v32  ;;  %v5582_v34 = vpop.f32.mrb[178].mxu0 }
 0x6c8   :  { %v5583_v31 = vpop.f32.mrb[179].mxu0 }
 0x6c9   :  { %v5024_v16 = vadd.f32 %v5581_v15, %v8211_v37  ;;  %v5584_v42 = vadd.f32 %v5583_v31, %v5582_v34  ;;  %5619 = vmatpush3.bf16.xpose.msra.mxu0 %v5074_v19 }
 0x6ca   :  { %5620 = vmatprep.subr.bf16.mxu0 %v6755_v21 }
 0x6cb   :  { %v5027_v59 = vadd.f32 %v5584_v42, %v8211_v37  ;;  %v5062_v17 = vmax.f32 %v5024_v16, 0.0 }
 0x6cd   :  { %v5063_v35 = vmax.f32 %v5027_v59, 0.0  ;;  %v5585_v5 = vpop.f32.mrb[180].mxu0 }
 0x6ce   :  { %v5586_v24 = vpop.f32.mrb[181].mxu0 }
 0x6cf   :  { %v5075_v3 = vpack.c.bf16 %v5063_v35, %v5062_v17  ;;  %v5587_v51 = vadd.f32 %v5586_v24, %v5585_v5  ;;  %v5588_v48 = vpop.f32.mrb[182].mxu0 }
 0x6d0   :  { %v5589_v54 = vpop.f32.mrb[183].mxu0 }
 0x6d1   :  { %v5032_v29 = vadd.f32 %v5587_v51, %v8211_v37  ;;  %v5590_v49 = vadd.f32 %v5589_v54, %v5588_v48  ;;  %5621 = vmatpush3.bf16.xpose.msra.mxu0 %v5075_v3 }
 0x6d2   :  { %5622 = vmatprep.subr.bf16.mxu0 %v6755_v21 }
 0x6d3   :  { %v5035_v11 = vadd.f32 %v5590_v49, %v8211_v37  ;;  %v5064_v20 = vmax.f32 %v5032_v29, 0.0 }
 0x6d5   :  { %v5065_v14 = vmax.f32 %v5035_v11, 0.0  ;;  %v5591_v7 = vpop.f32.mrb[184].mxu0 }
 0x6d6   :  { %v5592_v56 = vpop.f32.mrb[185].mxu0 }
 0x6d7   :  { %v5076_v52 = vpack.c.bf16 %v5065_v14, %v5064_v20  ;;  %v5593_v47 = vadd.f32 %v5592_v56, %v5591_v7  ;;  %v5594_v46 = vpop.f32.mrb[186].mxu0 }
 0x6d8   :  { %v5595_v62 = vpop.f32.mrb[187].mxu0 }
 0x6d9   :  { %v5040_v40 = vadd.f32 %v5593_v47, %v8211_v37  ;;  %v5596_v41 = vadd.f32 %v5595_v62, %v5594_v46  ;;  %5623 = vmatpush3.bf16.xpose.msra.mxu0 %v5076_v52 }
 0x6da   :  { %5624 = vmatprep.subr.bf16.mxu0 %v6755_v21 }
 0x6db   :  { %v5043_v27 = vadd.f32 %v5596_v41, %v8211_v37  ;;  %v5066_v28 = vmax.f32 %v5040_v40, 0.0 }
 0x6dd   :  { %v5067_v0 = vmax.f32 %v5043_v27, 0.0  ;;  %v5597_v38 = vpop.f32.mrb[188].mxu0 }
 0x6de   :  { %v5598_v10 = vpop.f32.mrb[189].mxu0 }
 0x6df   :  { %v5077_v55 = vpack.c.bf16 %v5067_v0, %v5066_v28  ;;  %v5599_v25 = vadd.f32 %v5598_v10, %v5597_v38  ;;  %v5600_v18 = vpop.f32.mrb[190].mxu0 }
 0x6e0   :  { %v5601_v60 = vpop.f32.mrb[191].mxu0 }
 0x6e1   :  { %v5048_v44 = vadd.f32 %v5599_v25, %v8211_v37  ;;  %v5602_v6 = vadd.f32 %v5601_v60, %v5600_v18  ;;  %5625 = vmatpush3.bf16.xpose.msra.mxu0 %v5077_v55 }
 0x6e2   :  { %5626 = vmatprep.subr.bf16.mxu0 %v6755_v21 }
 0x6e3   :  { %v5051_v57 = vadd.f32 %v5602_v6, %v8211_v37  ;;  %v5068_v39 = vmax.f32 %v5048_v44, 0.0 }
 0x6e5   :  { %v5069_v43 = vmax.f32 %v5051_v57, 0.0 }
 0x6e7   :  { %v5078_v45 = vpack.c.bf16 %v5069_v43, %v5068_v39 }
 0x6e9   :  { %5627 = vmatpush3.bf16.xpose.msra.mxu0 %v5078_v45 }
 0x6f0   :  { %5629 = vmatmul.mubr.bf16.vlgmr.msra.gmra.mrb[192].mxu0 %v5070_v63 }
 0x7c3   :  { %v5123_v22 = vpop.f32.mrb[192].mxu0 }
 0x7c4   :  { %v5124_v9 = vadd.f32 %v5123_v22, %v5088_v53  ;;  %v5630_v2 = vpop.f32.mrb[193].mxu0 }
 0x7c5   :  { %v5126_v21 = vpop.f32.mrb[194].mxu0 }
 0x7c6   :  { %5129 = vst [vmem:[#allocation11] sm:$0x1] %v5124_v9  ;;  %v5631_v37 = vpop.f32.mrb[195].mxu0 }
 0x7c7   :  { %6727 = shalt.err (!%p6724_p8)
}
 0x7c8   :  { %s6728_s27 = scalar_lea.hbm %s8265_s13, 16 }
 0x7c9   :  { %p6729_p9 = scmp.ne.s32.totalorder %s8265_s13, %s6728_s27  ;;  %p6732_p10 = scmp.lt.u32.totalorder %s6728_s27, %s8265_s13 }
 0x7cb   :  { %p6734_p11 = pnand %p6732_p10, %p6729_p9 }
 0x7cd   :  { %6737 = shalt.err (!%p6734_p11)
}
 0x7ce   :  { %5139 = dma.vmem_to_hbm [thread:$0]  %s5137_s7, 16, %s8265_s13, [#allocation5]  }
 0x7cf   :  { %6744 = dma.done.wait [#allocation5], 16  }
 0x7d0   :  { %6745 = vsyncadd [#allocation5], 4294967280 }
 0x7d1   :  { %5143 = vsyncpa [#allocation4], 1 }
 0x7d2   :  { %5144 = vsyncpa [#allocation7], 1 }
 0x7d3   :  { %5145 = vsyncpa [#allocation10], 1 }
 0x7d4   :  { %5146 = vsyncpa [#allocation5], 1 }

</bundles_post_ra>
